<compile_context>
chip_gen: v5e
topology: v5e:2x2
jax: 0.10.0
libtpu: 0.0.40
codegen_flags: <defaults>
</compile_context>

<pallas_src>
import functools

import numpy as np
import jax
import jax.numpy as jnp
from jax.experimental import pallas as pl
from jax.experimental.pallas import tpu as pltpu


# ----------------------------------------------------------------------------
# Hypernetwork (parameter setup, plain JAX — tiny MLP, not the hot path)
# ----------------------------------------------------------------------------
def init_hypernet_params(key, out_len, noise_shape=1, units=(16, 32, 64)):
    """PyTorch-style nn.Linear init: U(-1/sqrt(fan_in), 1/sqrt(fan_in))."""
    params = []
    in_f = noise_shape
    dims = list(units) + [out_len]
    for out_f in dims:
        key, kw, kb = jax.random.split(key, 3)
        bound = 1.0 / jnp.sqrt(in_f)
        W = jax.random.uniform(kw, (out_f, in_f), jnp.float32, -bound, bound)
        b = jax.random.uniform(kb, (out_f,), jnp.float32, -bound, bound)
        params.append((W, b))
        in_f = out_f
    return params


def hypernet_forward(params, z):
    """z: (num_samples, noise_shape) -> (num_samples, out_len)."""
    h = z
    for (W, b) in params[:-1]:
        h = h @ W.T + b
        h = jnp.where(h >= 0, h, 0.1 * h)  # LeakyReLU(0.1)
    W, b = params[-1]
    return h @ W.T + b


# ----------------------------------------------------------------------------
# Weight standardization (mirrors ScaledWSConv2d.standardize_weight)
# ----------------------------------------------------------------------------
def standardize_weight(w, gain, eps=1e-4):
    """w: (C_out, C_in, K, K). torch.var is unbiased -> ddof=1."""
    fan_in = w.shape[1] * w.shape[2] * w.shape[3]
    mean = jnp.mean(w, axis=(1, 2, 3), keepdims=True)
    var = jnp.var(w, axis=(1, 2, 3), keepdims=True, ddof=1)
    w = (w - mean) / jnp.sqrt(var * fan_in + eps)
    if gain is not None:
        w = w * gain.reshape(-1, 1, 1, 1)
    return w


# ----------------------------------------------------------------------------
# VMEM budgeting / batch-tile selection
# ----------------------------------------------------------------------------
_VMEM_BUDGET_BYTES = 40 * 1024 * 1024   # conservative: fits v7x's 64 MiB VMEM
_VMEM_LIMIT_BYTES = 48 * 1024 * 1024    # raise the 32 MiB scoped default


def _pick_b_tile(N, bytes_per_image):
    """Images per grid step: as big as the VMEM budget allows, but keep >= 2
    grid blocks when N >= 2 so v7x's two TensorCores both get work, and keep
    the tile an exact divisor of N (no ragged final block)."""
    cap = max(1, _VMEM_BUDGET_BYTES // max(1, bytes_per_image))
    if N >= 2:
        cap = min(cap, (N + 1) // 2)
    for bt in range(min(cap, N), 0, -1):
        if N % bt == 0:
            return bt
    return 1


# ----------------------------------------------------------------------------
# Fast path: "same" convolution (stride=1, 2*pad == dilation*(K-1)).
# Lane-dense flattened spatial layout; masked lane-shift taps.
# ----------------------------------------------------------------------------
def _same_conv_kernel(x_ref, masks_ref, w_ref, b_ref, o_ref, xpad_ref, *,
                      C_in, C_out, K, pad, dilation, H, W):
    B = x_ref.shape[0]
    HW = H * W
    head = pad * (W + 1)            # covers the most-negative tap offset
    L = xpad_ref.shape[2]
    zdt = xpad_ref.dtype

    # Zero only the halo head/tail; the interior is fully overwritten below
    # (safe under v7x parallel sharding because it runs every grid step).
    xpad_ref[:, :, :head] = jnp.zeros((B, C_in, head), zdt)
    xpad_ref[:, :, head + HW:] = jnp.zeros((B, C_in, L - head - HW), zdt)
    # Single wide, vectorized interior copy (one store pass).
    xpad_ref[:, :, head:head + HW] = x_ref[...].astype(zdt)

    # Hoist the K column-validity masks (f32 0/1, shape (1, HW)); the center
    # tap (dx == 0) needs no mask.
    col_masks = []
    for kw in range(K):
        dx = kw * dilation - pad
        col_masks.append(None if dx == 0 else masks_ref[kw])

    # i -> (kh, kw) -> one window load/mask -> reused by all C_out channels.
    accs = [jnp.zeros((B, HW), jnp.float32) for _ in range(C_out)]
    for i in range(C_in):
        for kh in range(K):
            dy = kh * dilation - pad
            for kw in range(K):
                dx = kw * dilation - pad
                off = head + dy * W + dx
                win = xpad_ref[:, i, off:off + HW].astype(jnp.float32)
                if col_masks[kw] is not None:
                    win = win * col_masks[kw]   # kill wrapped-around columns
                for o in range(C_out):
                    wv = w_ref[((o * C_in + i) * K + kh) * K + kw]
                    accs[o] = accs[o] + wv * win

    # Lane-dense output stores (HW on the lane axis).
    for o in range(C_out):
        o_ref[:, o, :] = (accs[o] + b_ref[o]).astype(o_ref.dtype)


# ----------------------------------------------------------------------------
# General path: arbitrary padding / dilation (stride=1, groups=1).
# ----------------------------------------------------------------------------
def _general_conv_kernel(x_ref, w_ref, b_ref, o_ref, *scratch, C_in, C_out,
                         K, pad, dilation, H_out, W_out):
    B = x_ref.shape[0]
    H, W = x_ref.shape[2], x_ref.shape[3]

    if pad > 0:
        xpad_ref = scratch[0]
        zdt = xpad_ref.dtype
        Hp, Wp = H + 2 * pad, W + 2 * pad
        # Zero only the halo border (not the full scratch).
        xpad_ref[:, :, :pad, :] = jnp.zeros((B, C_in, pad, Wp), zdt)
        xpad_ref[:, :, pad + H:, :] = jnp.zeros((B, C_in, pad, Wp), zdt)
        xpad_ref[:, :, :, :pad] = jnp.zeros((B, C_in, Hp, pad), zdt)
        xpad_ref[:, :, :, pad + W:] = jnp.zeros((B, C_in, Hp, pad), zdt)
        # One vectorized interior copy.
        xpad_ref[:, :, pad:pad + H, pad:pad + W] = x_ref[...].astype(zdt)
        src = xpad_ref
    else:
        src = x_ref          # padding == 0: no scratch staging at all

    # i -> (kh, kw) -> one window load -> reused by all C_out channels.
    accs = [jnp.zeros((B, H_out, W_out), jnp.float32) for _ in range(C_out)]
    for i in range(C_in):
        for kh in range(K):
            for kw in range(K):
                h0 = kh * dilation
                w0 = kw * dilation
                win = src[:, i, h0:h0 + H_out, w0:w0 + W_out].astype(jnp.float32)
                for o in range(C_out):
                    wv = w_ref[((o * C_in + i) * K + kh) * K + kw]
                    accs[o] = accs[o] + wv * win

    for o in range(C_out):
        o_ref[:, o, :, :] = (accs[o] + b_ref[o]).astype(o_ref.dtype)


# ----------------------------------------------------------------------------
# Wrapper
# ----------------------------------------------------------------------------
def scaled_ws_conv2d_pallas(x, w_raw, b, gain, *, stride=1, padding=0,
                            dilation=1, groups=1, eps=1e-4):
    """x: (N, C_in, H, W) NCHW; w_raw: (C_out, C_in, K, K); b, gain: (C_out,)."""
    # TODO(synk): stride>1 and groups>1 are not implemented in the kernel.
    assert stride == 1 and groups == 1, "kernel supports stride=1, groups=1"

    N, C_in, H, W = x.shape
    C_out, _, K, _ = w_raw.shape

    # Tiny parameter-side math (144 elements): plain JAX.
    w = standardize_weight(w_raw, gain, eps=eps)
    w_flat = w.reshape(-1).astype(jnp.float32)           # SMEM scalar table
    b_arr = (b if b is not None else jnp.zeros((C_out,))).astype(jnp.float32)

    H_out = H + 2 * padding - dilation * (K - 1)
    W_out = W + 2 * padding - dilation * (K - 1)
    assert H_out > 0 and W_out > 0

    isz = x.dtype.itemsize
    cparams = pltpu.CompilerParams(dimension_semantics=("parallel",),
                                   vmem_limit_bytes=_VMEM_LIMIT_BYTES)

    same = (padding > 0) and (2 * padding == dilation * (K - 1))
    if same:
        # ----- lane-dense fast path ("same" conv, the NF-ResNet hot case) ---
        HW = H * W
        head = padding * (W + 1)
        L = HW + 2 * head
        per_img = (2 * C_in * HW * isz            # input block (double buf)
                   + 2 * C_out * HW * isz         # output block (double buf)
                   + C_in * L * isz               # padded flat scratch
                   + C_out * HW * 4)              # f32 accumulators (spill)
        B_tile = _pick_b_tile(N, per_img)

        # K column-validity masks (per kw tap), precomputed once (tiny, 0/1 f32).
        col = np.arange(HW, dtype=np.int64) % W
        msk = np.stack([((col + (kw * dilation - padding) >= 0)
                         & (col + (kw * dilation - padding) < W))
                        for kw in range(K)]).astype(np.float32)
        masks = jnp.asarray(msk.reshape(K, 1, HW))

        kernel = functools.partial(_same_conv_kernel, C_in=C_in, C_out=C_out,
                                   K=K, pad=padding, dilation=dilation,
                                   H=H, W=W)
        out_flat = pl.pallas_call(
            kernel,
            out_shape=jax.ShapeDtypeStruct((N, C_out, HW), x.dtype),
            grid=(N // B_tile,),
            in_specs=[
                # Flattened spatial on the lane axis (lane-dense blocks).
                pl.BlockSpec((B_tile, C_in, HW), lambda n: (n, 0, 0)),
                pl.BlockSpec((K, 1, HW), lambda n: (0, 0, 0)),
                # 144 weights + C_out biases as SMEM scalars.
                pl.BlockSpec(memory_space=pltpu.MemorySpace.SMEM),
                pl.BlockSpec(memory_space=pltpu.MemorySpace.SMEM),
            ],
            out_specs=pl.BlockSpec((B_tile, C_out, HW), lambda n: (n, 0, 0)),
            scratch_shapes=[pltpu.VMEM((B_tile, C_in, L), x.dtype)],
            compiler_params=cparams,
        )(x.reshape(N, C_in, HW), masks, w_flat, b_arr)
        # Contiguous reshape back to NCHW (free — same memory layout).
        return out_flat.reshape(N, C_out, H_out, W_out)

    # ----- general path (padding=0 or non-"same" geometry) ------------------
    Hp, Wp = H + 2 * padding, W + 2 * padding
    per_img = (2 * C_in * H * W * isz
               + 2 * C_out * H_out * W_out * isz
               + (C_in * Hp * Wp * isz if padding > 0 else 0)
               + C_out * H_out * W_out * 4)
    B_tile = _pick_b_tile(N, per_img)

    kernel = functools.partial(_general_conv_kernel, C_in=C_in, C_out=C_out,
                               K=K, pad=padding, dilation=dilation,
                               H_out=H_out, W_out=W_out)
    scratch = ([pltpu.VMEM((B_tile, C_in, Hp, Wp), x.dtype)]
               if padding > 0 else [])
    return pl.pallas_call(
        kernel,
        out_shape=jax.ShapeDtypeStruct((N, C_out, H_out, W_out), x.dtype),
        grid=(N // B_tile,),
        in_specs=[
            pl.BlockSpec((B_tile, C_in, H, W), lambda n: (n, 0, 0, 0)),
            pl.BlockSpec(memory_space=pltpu.MemorySpace.SMEM),
            pl.BlockSpec(memory_space=pltpu.MemorySpace.SMEM),
        ],
        out_specs=pl.BlockSpec((B_tile, C_out, H_out, W_out),
                               lambda n: (n, 0, 0, 0)),
        scratch_shapes=scratch,
        compiler_params=cparams,
    )(x, w_flat, b_arr)


# Pure-JAX reference for verification.
def scaled_ws_conv2d_ref(x, w_raw, b, gain, *, stride=1, padding=0,
                         dilation=1, groups=1, eps=1e-4):
    w = standardize_weight(w_raw, gain, eps=eps).astype(jnp.float32)
    out = jax.lax.conv_general_dilated(
        x.astype(jnp.float32), w,
        window_strides=(stride, stride),
        padding=[(padding, padding), (padding, padding)],
        rhs_dilation=(dilation, dilation),
        feature_group_count=groups,
        dimension_numbers=("NCHW", "OIHW", "NCHW"))
    if b is not None:
        out = out + b.reshape(1, -1, 1, 1).astype(jnp.float32)
    return out.astype(x.dtype)


if __name__ == "__main__":
    key = jax.random.PRNGKey(0)
    k_x, k_z, k_w, k_b, k_g = jax.random.split(key, 5)

    # ScaledWSConv2d config (small demo shapes).
    C_in = C_out = 4
    K = 3
    N, H, W = 4, 16, 16        # N=4 -> B_tile=2, grid=(2,): exercises batching

    x = jax.random.normal(k_x, (N, C_in, H, W), jnp.float32)

    # Deterministic hypernetwork parameters + fixed noise input z (num_samples=1).
    noise_shape = 1
    units = (16, 32, 64)
    z = jax.random.normal(k_z, (1, noise_shape), jnp.float32)

    hp_w = init_hypernet_params(k_w, C_out * K * K * C_in, noise_shape, units)
    hp_b = init_hypernet_params(k_b, C_out, noise_shape, units)
    hp_g = init_hypernet_params(k_g, C_out, noise_shape, units)

    conv1_w = hypernet_forward(hp_w, z)[0].reshape(C_out, C_in, K, K)
    conv1_b = hypernet_forward(hp_b, z)[0]
    conv1_gain = hypernet_forward(hp_g, z)[0]

    configs = [
        dict(stride=1, padding=1, dilation=1, groups=1),  # "same": fast path
        dict(stride=1, padding=0, dilation=1, groups=1),  # no-pad: no scratch
        dict(stride=1, padding=1, dilation=2, groups=1),  # general + halo copy
    ]
    for cfg in configs:
        out = scaled_ws_conv2d_pallas(x, conv1_w, conv1_b, conv1_gain, **cfg)
        out = jax.block_until_ready(out)
        ref = scaled_ws_conv2d_ref(x, conv1_w, conv1_b, conv1_gain, **cfg)
        assert out.shape == ref.shape, (cfg, out.shape, ref.shape)
        assert jnp.allclose(out, ref, atol=1e-4, rtol=1e-4), \
            (cfg, float(jnp.max(jnp.abs(out - ref))))

    print("KERNEL_OK")
</pallas_src>

<mosaic_0001>
module attributes {stable_mosaic.version = 11 : i64} {
  func.func @_same_conv_kernel(%arg0: i32, %arg1: memref<2x4x256xf32, #tpu.memory_space<vmem>>, %arg2: memref<3x1x256xf32, #tpu.memory_space<vmem>>, %arg3: memref<144xf32, #tpu.memory_space<smem>>, %arg4: memref<4xf32, #tpu.memory_space<smem>>, %arg5: memref<2x4x256xf32, #tpu.memory_space<vmem>>, %arg6: memref<2x4x290xf32, #tpu.memory_space<vmem>>) attributes {dimension_semantics = [#tpu.dimension_semantics<parallel>], iteration_bounds = array<i64: 2>, scalar_prefetch = 0 : i64, scratch_operands = 1 : i64, tpu.core_type = #tpu.core_type<tc>, window_params = [{transform_indices = @transform_0, window_bounds = array<i64: 2, 4, 256>}, {pipeline_mode = #tpu.pipeline_mode<synchronous>, transform_indices = @transform_1, window_bounds = array<i64: 3, 1, 256>}, {transform_indices = @transform_2, window_bounds = array<i64: 144>}, {transform_indices = @transform_3, window_bounds = array<i64: 4>}, {transform_indices = @transform_4, window_bounds = array<i64: 2, 4, 256>}]} {
    %cst = arith.constant 0.000000e+00 : f32
    %0 = vector.broadcast %cst : f32 to vector<2x4x17xf32>
    %c0 = arith.constant 0 : index
    %c0_0 = arith.constant 0 : index
    %c0_1 = arith.constant 0 : index
    %1 = vector.load %arg6[%c0, %c0_0, %c0_1] : memref<2x4x290xf32, #tpu.memory_space<vmem>>, vector<2x4x17xf32>
    tpu.vector_store %arg6[%c0, %c0_0, %c0_1], %0 {strides = array<i32>} : memref<2x4x290xf32, #tpu.memory_space<vmem>>, vector<2x4x17xf32>,
    %cst_2 = arith.constant 0.000000e+00 : f32
    %2 = vector.broadcast %cst_2 : f32 to vector<2x4x17xf32>
    %c0_3 = arith.constant 0 : index
    %c0_4 = arith.constant 0 : index
    %c273 = arith.constant 273 : index
    %3 = vector.load %arg6[%c0_3, %c0_4, %c273] : memref<2x4x290xf32, #tpu.memory_space<vmem>>, vector<2x4x17xf32>
    tpu.vector_store %arg6[%c0_3, %c0_4, %c273], %2 {strides = array<i32>} : memref<2x4x290xf32, #tpu.memory_space<vmem>>, vector<2x4x17xf32>,
    %c0_5 = arith.constant 0 : index
    %c0_6 = arith.constant 0 : index
    %c0_7 = arith.constant 0 : index
    %4 = vector.load %arg1[%c0_5, %c0_6, %c0_7] : memref<2x4x256xf32, #tpu.memory_space<vmem>>, vector<2x4x256xf32>
    %c0_8 = arith.constant 0 : index
    %c0_9 = arith.constant 0 : index
    %c17 = arith.constant 17 : index
    %5 = vector.load %arg6[%c0_8, %c0_9, %c17] : memref<2x4x290xf32, #tpu.memory_space<vmem>>, vector<2x4x256xf32>
    tpu.vector_store %arg6[%c0_8, %c0_9, %c17], %4 {strides = array<i32>} : memref<2x4x290xf32, #tpu.memory_space<vmem>>, vector<2x4x256xf32>,
    %c0_10 = arith.constant 0 : index
    %c0_11 = arith.constant 0 : index
    %c0_12 = arith.constant 0 : index
    %6 = vector.load %arg2[%c0_10, %c0_11, %c0_12] : memref<3x1x256xf32, #tpu.memory_space<vmem>>, vector<1x1x256xf32>
    %7 = vector.shape_cast %6 : vector<1x1x256xf32> to vector<1x256xf32>
    %c2 = arith.constant 2 : index
    %c0_13 = arith.constant 0 : index
    %c0_14 = arith.constant 0 : index
    %8 = vector.load %arg2[%c2, %c0_13, %c0_14] : memref<3x1x256xf32, #tpu.memory_space<vmem>>, vector<1x1x256xf32>
    %9 = vector.shape_cast %8 : vector<1x1x256xf32> to vector<1x256xf32>
    %cst_15 = arith.constant 0.000000e+00 : f32
    %10 = vector.broadcast %cst_15 : f32 to vector<2x256xf32>
    %cst_16 = arith.constant 0.000000e+00 : f32
    %11 = vector.broadcast %cst_16 : f32 to vector<2x256xf32>
    %cst_17 = arith.constant 0.000000e+00 : f32
    %12 = vector.broadcast %cst_17 : f32 to vector<2x256xf32>
    %cst_18 = arith.constant 0.000000e+00 : f32
    %13 = vector.broadcast %cst_18 : f32 to vector<2x256xf32>
    %c0_19 = arith.constant 0 : index
    %c0_20 = arith.constant 0 : index
    %c0_21 = arith.constant 0 : index
    %14 = vector.load %arg6[%c0_19, %c0_20, %c0_21] : memref<2x4x290xf32, #tpu.memory_space<vmem>>, vector<2x1x256xf32>
    %15 = vector.shape_cast %14 : vector<2x1x256xf32> to vector<2x256xf32>
    %16 = vector.broadcast %7 : vector<1x256xf32> to vector<2x256xf32>
    %17 = arith.mulf %15, %16 : vector<2x256xf32>
    %c0_22 = arith.constant 0 : index
    %18 = memref.load %arg3[%c0_22] : memref<144xf32, #tpu.memory_space<smem>>
    %19 = vector.broadcast %18 : f32 to vector<2x256xf32>
    %20 = arith.mulf %19, %17 : vector<2x256xf32>
    %21 = arith.addf %10, %20 : vector<2x256xf32>
    %c36 = arith.constant 36 : index
    %22 = memref.load %arg3[%c36] : memref<144xf32, #tpu.memory_space<smem>>
    %23 = vector.broadcast %22 : f32 to vector<2x256xf32>
    %24 = arith.mulf %23, %17 : vector<2x256xf32>
    %25 = arith.addf %11, %24 : vector<2x256xf32>
    %c72 = arith.constant 72 : index
    %26 = memref.load %arg3[%c72] : memref<144xf32, #tpu.memory_space<smem>>
    %27 = vector.broadcast %26 : f32 to vector<2x256xf32>
    %28 = arith.mulf %27, %17 : vector<2x256xf32>
    %29 = arith.addf %12, %28 : vector<2x256xf32>
    %c108 = arith.constant 108 : index
    %30 = memref.load %arg3[%c108] : memref<144xf32, #tpu.memory_space<smem>>
    %31 = vector.broadcast %30 : f32 to vector<2x256xf32>
    %32 = arith.mulf %31, %17 : vector<2x256xf32>
    %33 = arith.addf %13, %32 : vector<2x256xf32>
    %c0_23 = arith.constant 0 : index
    %c0_24 = arith.constant 0 : index
    %c1 = arith.constant 1 : index
    %34 = vector.load %arg6[%c0_23, %c0_24, %c1] : memref<2x4x290xf32, #tpu.memory_space<vmem>>, vector<2x1x256xf32>
    %35 = vector.shape_cast %34 : vector<2x1x256xf32> to vector<2x256xf32>
    %c1_25 = arith.constant 1 : index
    %36 = memref.load %arg3[%c1_25] : memref<144xf32, #tpu.memory_space<smem>>
    %37 = vector.broadcast %36 : f32 to vector<2x256xf32>
    %38 = arith.mulf %37, %35 : vector<2x256xf32>
    %39 = arith.addf %21, %38 : vector<2x256xf32>
    %c37 = arith.constant 37 : index
    %40 = memref.load %arg3[%c37] : memref<144xf32, #tpu.memory_space<smem>>
    %41 = vector.broadcast %40 : f32 to vector<2x256xf32>
    %42 = arith.mulf %41, %35 : vector<2x256xf32>
    %43 = arith.addf %25, %42 : vector<2x256xf32>
    %c73 = arith.constant 73 : index
    %44 = memref.load %arg3[%c73] : memref<144xf32, #tpu.memory_space<smem>>
    %45 = vector.broadcast %44 : f32 to vector<2x256xf32>
    %46 = arith.mulf %45, %35 : vector<2x256xf32>
    %47 = arith.addf %29, %46 : vector<2x256xf32>
    %c109 = arith.constant 109 : index
    %48 = memref.load %arg3[%c109] : memref<144xf32, #tpu.memory_space<smem>>
    %49 = vector.broadcast %48 : f32 to vector<2x256xf32>
    %50 = arith.mulf %49, %35 : vector<2x256xf32>
    %51 = arith.addf %33, %50 : vector<2x256xf32>
    %c0_26 = arith.constant 0 : index
    %c0_27 = arith.constant 0 : index
    %c2_28 = arith.constant 2 : index
    %52 = vector.load %arg6[%c0_26, %c0_27, %c2_28] : memref<2x4x290xf32, #tpu.memory_space<vmem>>, vector<2x1x256xf32>
    %53 = vector.shape_cast %52 : vector<2x1x256xf32> to vector<2x256xf32>
    %54 = vector.broadcast %9 : vector<1x256xf32> to vector<2x256xf32>
    %55 = arith.mulf %53, %54 : vector<2x256xf32>
    %c2_29 = arith.constant 2 : index
    %56 = memref.load %arg3[%c2_29] : memref<144xf32, #tpu.memory_space<smem>>
    %57 = vector.broadcast %56 : f32 to vector<2x256xf32>
    %58 = arith.mulf %57, %55 : vector<2x256xf32>
    %59 = arith.addf %39, %58 : vector<2x256xf32>
    %c38 = arith.constant 38 : index
    %60 = memref.load %arg3[%c38] : memref<144xf32, #tpu.memory_space<smem>>
    %61 = vector.broadcast %60 : f32 to vector<2x256xf32>
    %62 = arith.mulf %61, %55 : vector<2x256xf32>
    %63 = arith.addf %43, %62 : vector<2x256xf32>
    %c74 = arith.constant 74 : index
    %64 = memref.load %arg3[%c74] : memref<144xf32, #tpu.memory_space<smem>>
    %65 = vector.broadcast %64 : f32 to vector<2x256xf32>
    %66 = arith.mulf %65, %55 : vector<2x256xf32>
    %67 = arith.addf %47, %66 : vector<2x256xf32>
    %c110 = arith.constant 110 : index
    %68 = memref.load %arg3[%c110] : memref<144xf32, #tpu.memory_space<smem>>
    %69 = vector.broadcast %68 : f32 to vector<2x256xf32>
    %70 = arith.mulf %69, %55 : vector<2x256xf32>
    %71 = arith.addf %51, %70 : vector<2x256xf32>
    %c0_30 = arith.constant 0 : index
    %c0_31 = arith.constant 0 : index
    %c16 = arith.constant 16 : index
    %72 = vector.load %arg6[%c0_30, %c0_31, %c16] : memref<2x4x290xf32, #tpu.memory_space<vmem>>, vector<2x1x256xf32>
    %73 = vector.shape_cast %72 : vector<2x1x256xf32> to vector<2x256xf32>
    %74 = vector.broadcast %7 : vector<1x256xf32> to vector<2x256xf32>
    %75 = arith.mulf %73, %74 : vector<2x256xf32>
    %c3 = arith.constant 3 : index
    %76 = memref.load %arg3[%c3] : memref<144xf32, #tpu.memory_space<smem>>
    %77 = vector.broadcast %76 : f32 to vector<2x256xf32>
    %78 = arith.mulf %77, %75 : vector<2x256xf32>
    %79 = arith.addf %59, %78 : vector<2x256xf32>
    %c39 = arith.constant 39 : index
    %80 = memref.load %arg3[%c39] : memref<144xf32, #tpu.memory_space<smem>>
    %81 = vector.broadcast %80 : f32 to vector<2x256xf32>
    %82 = arith.mulf %81, %75 : vector<2x256xf32>
    %83 = arith.addf %63, %82 : vector<2x256xf32>
    %c75 = arith.constant 75 : index
    %84 = memref.load %arg3[%c75] : memref<144xf32, #tpu.memory_space<smem>>
    %85 = vector.broadcast %84 : f32 to vector<2x256xf32>
    %86 = arith.mulf %85, %75 : vector<2x256xf32>
    %87 = arith.addf %67, %86 : vector<2x256xf32>
    %c111 = arith.constant 111 : index
    %88 = memref.load %arg3[%c111] : memref<144xf32, #tpu.memory_space<smem>>
    %89 = vector.broadcast %88 : f32 to vector<2x256xf32>
    %90 = arith.mulf %89, %75 : vector<2x256xf32>
    %91 = arith.addf %71, %90 : vector<2x256xf32>
    %c0_32 = arith.constant 0 : index
    %c0_33 = arith.constant 0 : index
    %c17_34 = arith.constant 17 : index
    %92 = vector.load %arg6[%c0_32, %c0_33, %c17_34] : memref<2x4x290xf32, #tpu.memory_space<vmem>>, vector<2x1x256xf32>
    %93 = vector.shape_cast %92 : vector<2x1x256xf32> to vector<2x256xf32>
    %c4 = arith.constant 4 : index
    %94 = memref.load %arg3[%c4] : memref<144xf32, #tpu.memory_space<smem>>
    %95 = vector.broadcast %94 : f32 to vector<2x256xf32>
    %96 = arith.mulf %95, %93 : vector<2x256xf32>
    %97 = arith.addf %79, %96 : vector<2x256xf32>
    %c40 = arith.constant 40 : index
    %98 = memref.load %arg3[%c40] : memref<144xf32, #tpu.memory_space<smem>>
    %99 = vector.broadcast %98 : f32 to vector<2x256xf32>
    %100 = arith.mulf %99, %93 : vector<2x256xf32>
    %101 = arith.addf %83, %100 : vector<2x256xf32>
    %c76 = arith.constant 76 : index
    %102 = memref.load %arg3[%c76] : memref<144xf32, #tpu.memory_space<smem>>
    %103 = vector.broadcast %102 : f32 to vector<2x256xf32>
    %104 = arith.mulf %103, %93 : vector<2x256xf32>
    %105 = arith.addf %87, %104 : vector<2x256xf32>
    %c112 = arith.constant 112 : index
    %106 = memref.load %arg3[%c112] : memref<144xf32, #tpu.memory_space<smem>>
    %107 = vector.broadcast %106 : f32 to vector<2x256xf32>
    %108 = arith.mulf %107, %93 : vector<2x256xf32>
    %109 = arith.addf %91, %108 : vector<2x256xf32>
    %c0_35 = arith.constant 0 : index
    %c0_36 = arith.constant 0 : index
    %c18 = arith.constant 18 : index
    %110 = vector.load %arg6[%c0_35, %c0_36, %c18] : memref<2x4x290xf32, #tpu.memory_space<vmem>>, vector<2x1x256xf32>
    %111 = vector.shape_cast %110 : vector<2x1x256xf32> to vector<2x256xf32>
    %112 = vector.broadcast %9 : vector<1x256xf32> to vector<2x256xf32>
    %113 = arith.mulf %111, %112 : vector<2x256xf32>
    %c5 = arith.constant 5 : index
    %114 = memref.load %arg3[%c5] : memref<144xf32, #tpu.memory_space<smem>>
    %115 = vector.broadcast %114 : f32 to vector<2x256xf32>
    %116 = arith.mulf %115, %113 : vector<2x256xf32>
    %117 = arith.addf %97, %116 : vector<2x256xf32>
    %c41 = arith.constant 41 : index
    %118 = memref.load %arg3[%c41] : memref<144xf32, #tpu.memory_space<smem>>
    %119 = vector.broadcast %118 : f32 to vector<2x256xf32>
    %120 = arith.mulf %119, %113 : vector<2x256xf32>
    %121 = arith.addf %101, %120 : vector<2x256xf32>
    %c77 = arith.constant 77 : index
    %122 = memref.load %arg3[%c77] : memref<144xf32, #tpu.memory_space<smem>>
    %123 = vector.broadcast %122 : f32 to vector<2x256xf32>
    %124 = arith.mulf %123, %113 : vector<2x256xf32>
    %125 = arith.addf %105, %124 : vector<2x256xf32>
    %c113 = arith.constant 113 : index
    %126 = memref.load %arg3[%c113] : memref<144xf32, #tpu.memory_space<smem>>
    %127 = vector.broadcast %126 : f32 to vector<2x256xf32>
    %128 = arith.mulf %127, %113 : vector<2x256xf32>
    %129 = arith.addf %109, %128 : vector<2x256xf32>
    %c0_37 = arith.constant 0 : index
    %c0_38 = arith.constant 0 : index
    %c32 = arith.constant 32 : index
    %130 = vector.load %arg6[%c0_37, %c0_38, %c32] : memref<2x4x290xf32, #tpu.memory_space<vmem>>, vector<2x1x256xf32>
    %131 = vector.shape_cast %130 : vector<2x1x256xf32> to vector<2x256xf32>
    %132 = vector.broadcast %7 : vector<1x256xf32> to vector<2x256xf32>
    %133 = arith.mulf %131, %132 : vector<2x256xf32>
    %c6 = arith.constant 6 : index
    %134 = memref.load %arg3[%c6] : memref<144xf32, #tpu.memory_space<smem>>
    %135 = vector.broadcast %134 : f32 to vector<2x256xf32>
    %136 = arith.mulf %135, %133 : vector<2x256xf32>
    %137 = arith.addf %117, %136 : vector<2x256xf32>
    %c42 = arith.constant 42 : index
    %138 = memref.load %arg3[%c42] : memref<144xf32, #tpu.memory_space<smem>>
    %139 = vector.broadcast %138 : f32 to vector<2x256xf32>
    %140 = arith.mulf %139, %133 : vector<2x256xf32>
    %141 = arith.addf %121, %140 : vector<2x256xf32>
    %c78 = arith.constant 78 : index
    %142 = memref.load %arg3[%c78] : memref<144xf32, #tpu.memory_space<smem>>
    %143 = vector.broadcast %142 : f32 to vector<2x256xf32>
    %144 = arith.mulf %143, %133 : vector<2x256xf32>
    %145 = arith.addf %125, %144 : vector<2x256xf32>
    %c114 = arith.constant 114 : index
    %146 = memref.load %arg3[%c114] : memref<144xf32, #tpu.memory_space<smem>>
    %147 = vector.broadcast %146 : f32 to vector<2x256xf32>
    %148 = arith.mulf %147, %133 : vector<2x256xf32>
    %149 = arith.addf %129, %148 : vector<2x256xf32>
    %c0_39 = arith.constant 0 : index
    %c0_40 = arith.constant 0 : index
    %c33 = arith.constant 33 : index
    %150 = vector.load %arg6[%c0_39, %c0_40, %c33] : memref<2x4x290xf32, #tpu.memory_space<vmem>>, vector<2x1x256xf32>
    %151 = vector.shape_cast %150 : vector<2x1x256xf32> to vector<2x256xf32>
    %c7 = arith.constant 7 : index
    %152 = memref.load %arg3[%c7] : memref<144xf32, #tpu.memory_space<smem>>
    %153 = vector.broadcast %152 : f32 to vector<2x256xf32>
    %154 = arith.mulf %153, %151 : vector<2x256xf32>
    %155 = arith.addf %137, %154 : vector<2x256xf32>
    %c43 = arith.constant 43 : index
    %156 = memref.load %arg3[%c43] : memref<144xf32, #tpu.memory_space<smem>>
    %157 = vector.broadcast %156 : f32 to vector<2x256xf32>
    %158 = arith.mulf %157, %151 : vector<2x256xf32>
    %159 = arith.addf %141, %158 : vector<2x256xf32>
    %c79 = arith.constant 79 : index
    %160 = memref.load %arg3[%c79] : memref<144xf32, #tpu.memory_space<smem>>
    %161 = vector.broadcast %160 : f32 to vector<2x256xf32>
    %162 = arith.mulf %161, %151 : vector<2x256xf32>
    %163 = arith.addf %145, %162 : vector<2x256xf32>
    %c115 = arith.constant 115 : index
    %164 = memref.load %arg3[%c115] : memref<144xf32, #tpu.memory_space<smem>>
    %165 = vector.broadcast %164 : f32 to vector<2x256xf32>
    %166 = arith.mulf %165, %151 : vector<2x256xf32>
    %167 = arith.addf %149, %166 : vector<2x256xf32>
    %c0_41 = arith.constant 0 : index
    %c0_42 = arith.constant 0 : index
    %c34 = arith.constant 34 : index
    %168 = vector.load %arg6[%c0_41, %c0_42, %c34] : memref<2x4x290xf32, #tpu.memory_space<vmem>>, vector<2x1x256xf32>
    %169 = vector.shape_cast %168 : vector<2x1x256xf32> to vector<2x256xf32>
    %170 = vector.broadcast %9 : vector<1x256xf32> to vector<2x256xf32>
    %171 = arith.mulf %169, %170 : vector<2x256xf32>
    %c8 = arith.constant 8 : index
    %172 = memref.load %arg3[%c8] : memref<144xf32, #tpu.memory_space<smem>>
    %173 = vector.broadcast %172 : f32 to vector<2x256xf32>
    %174 = arith.mulf %173, %171 : vector<2x256xf32>
    %175 = arith.addf %155, %174 : vector<2x256xf32>
    %c44 = arith.constant 44 : index
    %176 = memref.load %arg3[%c44] : memref<144xf32, #tpu.memory_space<smem>>
    %177 = vector.broadcast %176 : f32 to vector<2x256xf32>
    %178 = arith.mulf %177, %171 : vector<2x256xf32>
    %179 = arith.addf %159, %178 : vector<2x256xf32>
    %c80 = arith.constant 80 : index
    %180 = memref.load %arg3[%c80] : memref<144xf32, #tpu.memory_space<smem>>
    %181 = vector.broadcast %180 : f32 to vector<2x256xf32>
    %182 = arith.mulf %181, %171 : vector<2x256xf32>
    %183 = arith.addf %163, %182 : vector<2x256xf32>
    %c116 = arith.constant 116 : index
    %184 = memref.load %arg3[%c116] : memref<144xf32, #tpu.memory_space<smem>>
    %185 = vector.broadcast %184 : f32 to vector<2x256xf32>
    %186 = arith.mulf %185, %171 : vector<2x256xf32>
    %187 = arith.addf %167, %186 : vector<2x256xf32>
    %c0_43 = arith.constant 0 : index
    %c1_44 = arith.constant 1 : index
    %c0_45 = arith.constant 0 : index
    %188 = vector.load %arg6[%c0_43, %c1_44, %c0_45] : memref<2x4x290xf32, #tpu.memory_space<vmem>>, vector<2x1x256xf32>
    %189 = vector.shape_cast %188 : vector<2x1x256xf32> to vector<2x256xf32>
    %190 = vector.broadcast %7 : vector<1x256xf32> to vector<2x256xf32>
    %191 = arith.mulf %189, %190 : vector<2x256xf32>
    %c9 = arith.constant 9 : index
    %192 = memref.load %arg3[%c9] : memref<144xf32, #tpu.memory_space<smem>>
    %193 = vector.broadcast %192 : f32 to vector<2x256xf32>
    %194 = arith.mulf %193, %191 : vector<2x256xf32>
    %195 = arith.addf %175, %194 : vector<2x256xf32>
    %c45 = arith.constant 45 : index
    %196 = memref.load %arg3[%c45] : memref<144xf32, #tpu.memory_space<smem>>
    %197 = vector.broadcast %196 : f32 to vector<2x256xf32>
    %198 = arith.mulf %197, %191 : vector<2x256xf32>
    %199 = arith.addf %179, %198 : vector<2x256xf32>
    %c81 = arith.constant 81 : index
    %200 = memref.load %arg3[%c81] : memref<144xf32, #tpu.memory_space<smem>>
    %201 = vector.broadcast %200 : f32 to vector<2x256xf32>
    %202 = arith.mulf %201, %191 : vector<2x256xf32>
    %203 = arith.addf %183, %202 : vector<2x256xf32>
    %c117 = arith.constant 117 : index
    %204 = memref.load %arg3[%c117] : memref<144xf32, #tpu.memory_space<smem>>
    %205 = vector.broadcast %204 : f32 to vector<2x256xf32>
    %206 = arith.mulf %205, %191 : vector<2x256xf32>
    %207 = arith.addf %187, %206 : vector<2x256xf32>
    %c0_46 = arith.constant 0 : index
    %c1_47 = arith.constant 1 : index
    %c1_48 = arith.constant 1 : index
    %208 = vector.load %arg6[%c0_46, %c1_47, %c1_48] : memref<2x4x290xf32, #tpu.memory_space<vmem>>, vector<2x1x256xf32>
    %209 = vector.shape_cast %208 : vector<2x1x256xf32> to vector<2x256xf32>
    %c10 = arith.constant 10 : index
    %210 = memref.load %arg3[%c10] : memref<144xf32, #tpu.memory_space<smem>>
    %211 = vector.broadcast %210 : f32 to vector<2x256xf32>
    %212 = arith.mulf %211, %209 : vector<2x256xf32>
    %213 = arith.addf %195, %212 : vector<2x256xf32>
    %c46 = arith.constant 46 : index
    %214 = memref.load %arg3[%c46] : memref<144xf32, #tpu.memory_space<smem>>
    %215 = vector.broadcast %214 : f32 to vector<2x256xf32>
    %216 = arith.mulf %215, %209 : vector<2x256xf32>
    %217 = arith.addf %199, %216 : vector<2x256xf32>
    %c82 = arith.constant 82 : index
    %218 = memref.load %arg3[%c82] : memref<144xf32, #tpu.memory_space<smem>>
    %219 = vector.broadcast %218 : f32 to vector<2x256xf32>
    %220 = arith.mulf %219, %209 : vector<2x256xf32>
    %221 = arith.addf %203, %220 : vector<2x256xf32>
    %c118 = arith.constant 118 : index
    %222 = memref.load %arg3[%c118] : memref<144xf32, #tpu.memory_space<smem>>
    %223 = vector.broadcast %222 : f32 to vector<2x256xf32>
    %224 = arith.mulf %223, %209 : vector<2x256xf32>
    %225 = arith.addf %207, %224 : vector<2x256xf32>
    %c0_49 = arith.constant 0 : index
    %c1_50 = arith.constant 1 : index
    %c2_51 = arith.constant 2 : index
    %226 = vector.load %arg6[%c0_49, %c1_50, %c2_51] : memref<2x4x290xf32, #tpu.memory_space<vmem>>, vector<2x1x256xf32>
    %227 = vector.shape_cast %226 : vector<2x1x256xf32> to vector<2x256xf32>
    %228 = vector.broadcast %9 : vector<1x256xf32> to vector<2x256xf32>
    %229 = arith.mulf %227, %228 : vector<2x256xf32>
    %c11 = arith.constant 11 : index
    %230 = memref.load %arg3[%c11] : memref<144xf32, #tpu.memory_space<smem>>
    %231 = vector.broadcast %230 : f32 to vector<2x256xf32>
    %232 = arith.mulf %231, %229 : vector<2x256xf32>
    %233 = arith.addf %213, %232 : vector<2x256xf32>
    %c47 = arith.constant 47 : index
    %234 = memref.load %arg3[%c47] : memref<144xf32, #tpu.memory_space<smem>>
    %235 = vector.broadcast %234 : f32 to vector<2x256xf32>
    %236 = arith.mulf %235, %229 : vector<2x256xf32>
    %237 = arith.addf %217, %236 : vector<2x256xf32>
    %c83 = arith.constant 83 : index
    %238 = memref.load %arg3[%c83] : memref<144xf32, #tpu.memory_space<smem>>
    %239 = vector.broadcast %238 : f32 to vector<2x256xf32>
    %240 = arith.mulf %239, %229 : vector<2x256xf32>
    %241 = arith.addf %221, %240 : vector<2x256xf32>
    %c119 = arith.constant 119 : index
    %242 = memref.load %arg3[%c119] : memref<144xf32, #tpu.memory_space<smem>>
    %243 = vector.broadcast %242 : f32 to vector<2x256xf32>
    %244 = arith.mulf %243, %229 : vector<2x256xf32>
    %245 = arith.addf %225, %244 : vector<2x256xf32>
    %c0_52 = arith.constant 0 : index
    %c1_53 = arith.constant 1 : index
    %c16_54 = arith.constant 16 : index
    %246 = vector.load %arg6[%c0_52, %c1_53, %c16_54] : memref<2x4x290xf32, #tpu.memory_space<vmem>>, vector<2x1x256xf32>
    %247 = vector.shape_cast %246 : vector<2x1x256xf32> to vector<2x256xf32>
    %248 = vector.broadcast %7 : vector<1x256xf32> to vector<2x256xf32>
    %249 = arith.mulf %247, %248 : vector<2x256xf32>
    %c12 = arith.constant 12 : index
    %250 = memref.load %arg3[%c12] : memref<144xf32, #tpu.memory_space<smem>>
    %251 = vector.broadcast %250 : f32 to vector<2x256xf32>
    %252 = arith.mulf %251, %249 : vector<2x256xf32>
    %253 = arith.addf %233, %252 : vector<2x256xf32>
    %c48 = arith.constant 48 : index
    %254 = memref.load %arg3[%c48] : memref<144xf32, #tpu.memory_space<smem>>
    %255 = vector.broadcast %254 : f32 to vector<2x256xf32>
    %256 = arith.mulf %255, %249 : vector<2x256xf32>
    %257 = arith.addf %237, %256 : vector<2x256xf32>
    %c84 = arith.constant 84 : index
    %258 = memref.load %arg3[%c84] : memref<144xf32, #tpu.memory_space<smem>>
    %259 = vector.broadcast %258 : f32 to vector<2x256xf32>
    %260 = arith.mulf %259, %249 : vector<2x256xf32>
    %261 = arith.addf %241, %260 : vector<2x256xf32>
    %c120 = arith.constant 120 : index
    %262 = memref.load %arg3[%c120] : memref<144xf32, #tpu.memory_space<smem>>
    %263 = vector.broadcast %262 : f32 to vector<2x256xf32>
    %264 = arith.mulf %263, %249 : vector<2x256xf32>
    %265 = arith.addf %245, %264 : vector<2x256xf32>
    %c0_55 = arith.constant 0 : index
    %c1_56 = arith.constant 1 : index
    %c17_57 = arith.constant 17 : index
    %266 = vector.load %arg6[%c0_55, %c1_56, %c17_57] : memref<2x4x290xf32, #tpu.memory_space<vmem>>, vector<2x1x256xf32>
    %267 = vector.shape_cast %266 : vector<2x1x256xf32> to vector<2x256xf32>
    %c13 = arith.constant 13 : index
    %268 = memref.load %arg3[%c13] : memref<144xf32, #tpu.memory_space<smem>>
    %269 = vector.broadcast %268 : f32 to vector<2x256xf32>
    %270 = arith.mulf %269, %267 : vector<2x256xf32>
    %271 = arith.addf %253, %270 : vector<2x256xf32>
    %c49 = arith.constant 49 : index
    %272 = memref.load %arg3[%c49] : memref<144xf32, #tpu.memory_space<smem>>
    %273 = vector.broadcast %272 : f32 to vector<2x256xf32>
    %274 = arith.mulf %273, %267 : vector<2x256xf32>
    %275 = arith.addf %257, %274 : vector<2x256xf32>
    %c85 = arith.constant 85 : index
    %276 = memref.load %arg3[%c85] : memref<144xf32, #tpu.memory_space<smem>>
    %277 = vector.broadcast %276 : f32 to vector<2x256xf32>
    %278 = arith.mulf %277, %267 : vector<2x256xf32>
    %279 = arith.addf %261, %278 : vector<2x256xf32>
    %c121 = arith.constant 121 : index
    %280 = memref.load %arg3[%c121] : memref<144xf32, #tpu.memory_space<smem>>
    %281 = vector.broadcast %280 : f32 to vector<2x256xf32>
    %282 = arith.mulf %281, %267 : vector<2x256xf32>
    %283 = arith.addf %265, %282 : vector<2x256xf32>
    %c0_58 = arith.constant 0 : index
    %c1_59 = arith.constant 1 : index
    %c18_60 = arith.constant 18 : index
    %284 = vector.load %arg6[%c0_58, %c1_59, %c18_60] : memref<2x4x290xf32, #tpu.memory_space<vmem>>, vector<2x1x256xf32>
    %285 = vector.shape_cast %284 : vector<2x1x256xf32> to vector<2x256xf32>
    %286 = vector.broadcast %9 : vector<1x256xf32> to vector<2x256xf32>
    %287 = arith.mulf %285, %286 : vector<2x256xf32>
    %c14 = arith.constant 14 : index
    %288 = memref.load %arg3[%c14] : memref<144xf32, #tpu.memory_space<smem>>
    %289 = vector.broadcast %288 : f32 to vector<2x256xf32>
    %290 = arith.mulf %289, %287 : vector<2x256xf32>
    %291 = arith.addf %271, %290 : vector<2x256xf32>
    %c50 = arith.constant 50 : index
    %292 = memref.load %arg3[%c50] : memref<144xf32, #tpu.memory_space<smem>>
    %293 = vector.broadcast %292 : f32 to vector<2x256xf32>
    %294 = arith.mulf %293, %287 : vector<2x256xf32>
    %295 = arith.addf %275, %294 : vector<2x256xf32>
    %c86 = arith.constant 86 : index
    %296 = memref.load %arg3[%c86] : memref<144xf32, #tpu.memory_space<smem>>
    %297 = vector.broadcast %296 : f32 to vector<2x256xf32>
    %298 = arith.mulf %297, %287 : vector<2x256xf32>
    %299 = arith.addf %279, %298 : vector<2x256xf32>
    %c122 = arith.constant 122 : index
    %300 = memref.load %arg3[%c122] : memref<144xf32, #tpu.memory_space<smem>>
    %301 = vector.broadcast %300 : f32 to vector<2x256xf32>
    %302 = arith.mulf %301, %287 : vector<2x256xf32>
    %303 = arith.addf %283, %302 : vector<2x256xf32>
    %c0_61 = arith.constant 0 : index
    %c1_62 = arith.constant 1 : index
    %c32_63 = arith.constant 32 : index
    %304 = vector.load %arg6[%c0_61, %c1_62, %c32_63] : memref<2x4x290xf32, #tpu.memory_space<vmem>>, vector<2x1x256xf32>
    %305 = vector.shape_cast %304 : vector<2x1x256xf32> to vector<2x256xf32>
    %306 = vector.broadcast %7 : vector<1x256xf32> to vector<2x256xf32>
    %307 = arith.mulf %305, %306 : vector<2x256xf32>
    %c15 = arith.constant 15 : index
    %308 = memref.load %arg3[%c15] : memref<144xf32, #tpu.memory_space<smem>>
    %309 = vector.broadcast %308 : f32 to vector<2x256xf32>
    %310 = arith.mulf %309, %307 : vector<2x256xf32>
    %311 = arith.addf %291, %310 : vector<2x256xf32>
    %c51 = arith.constant 51 : index
    %312 = memref.load %arg3[%c51] : memref<144xf32, #tpu.memory_space<smem>>
    %313 = vector.broadcast %312 : f32 to vector<2x256xf32>
    %314 = arith.mulf %313, %307 : vector<2x256xf32>
    %315 = arith.addf %295, %314 : vector<2x256xf32>
    %c87 = arith.constant 87 : index
    %316 = memref.load %arg3[%c87] : memref<144xf32, #tpu.memory_space<smem>>
    %317 = vector.broadcast %316 : f32 to vector<2x256xf32>
    %318 = arith.mulf %317, %307 : vector<2x256xf32>
    %319 = arith.addf %299, %318 : vector<2x256xf32>
    %c123 = arith.constant 123 : index
    %320 = memref.load %arg3[%c123] : memref<144xf32, #tpu.memory_space<smem>>
    %321 = vector.broadcast %320 : f32 to vector<2x256xf32>
    %322 = arith.mulf %321, %307 : vector<2x256xf32>
    %323 = arith.addf %303, %322 : vector<2x256xf32>
    %c0_64 = arith.constant 0 : index
    %c1_65 = arith.constant 1 : index
    %c33_66 = arith.constant 33 : index
    %324 = vector.load %arg6[%c0_64, %c1_65, %c33_66] : memref<2x4x290xf32, #tpu.memory_space<vmem>>, vector<2x1x256xf32>
    %325 = vector.shape_cast %324 : vector<2x1x256xf32> to vector<2x256xf32>
    %c16_67 = arith.constant 16 : index
    %326 = memref.load %arg3[%c16_67] : memref<144xf32, #tpu.memory_space<smem>>
    %327 = vector.broadcast %326 : f32 to vector<2x256xf32>
    %328 = arith.mulf %327, %325 : vector<2x256xf32>
    %329 = arith.addf %311, %328 : vector<2x256xf32>
    %c52 = arith.constant 52 : index
    %330 = memref.load %arg3[%c52] : memref<144xf32, #tpu.memory_space<smem>>
    %331 = vector.broadcast %330 : f32 to vector<2x256xf32>
    %332 = arith.mulf %331, %325 : vector<2x256xf32>
    %333 = arith.addf %315, %332 : vector<2x256xf32>
    %c88 = arith.constant 88 : index
    %334 = memref.load %arg3[%c88] : memref<144xf32, #tpu.memory_space<smem>>
    %335 = vector.broadcast %334 : f32 to vector<2x256xf32>
    %336 = arith.mulf %335, %325 : vector<2x256xf32>
    %337 = arith.addf %319, %336 : vector<2x256xf32>
    %c124 = arith.constant 124 : index
    %338 = memref.load %arg3[%c124] : memref<144xf32, #tpu.memory_space<smem>>
    %339 = vector.broadcast %338 : f32 to vector<2x256xf32>
    %340 = arith.mulf %339, %325 : vector<2x256xf32>
    %341 = arith.addf %323, %340 : vector<2x256xf32>
    %c0_68 = arith.constant 0 : index
    %c1_69 = arith.constant 1 : index
    %c34_70 = arith.constant 34 : index
    %342 = vector.load %arg6[%c0_68, %c1_69, %c34_70] : memref<2x4x290xf32, #tpu.memory_space<vmem>>, vector<2x1x256xf32>
    %343 = vector.shape_cast %342 : vector<2x1x256xf32> to vector<2x256xf32>
    %344 = vector.broadcast %9 : vector<1x256xf32> to vector<2x256xf32>
    %345 = arith.mulf %343, %344 : vector<2x256xf32>
    %c17_71 = arith.constant 17 : index
    %346 = memref.load %arg3[%c17_71] : memref<144xf32, #tpu.memory_space<smem>>
    %347 = vector.broadcast %346 : f32 to vector<2x256xf32>
    %348 = arith.mulf %347, %345 : vector<2x256xf32>
    %349 = arith.addf %329, %348 : vector<2x256xf32>
    %c53 = arith.constant 53 : index
    %350 = memref.load %arg3[%c53] : memref<144xf32, #tpu.memory_space<smem>>
    %351 = vector.broadcast %350 : f32 to vector<2x256xf32>
    %352 = arith.mulf %351, %345 : vector<2x256xf32>
    %353 = arith.addf %333, %352 : vector<2x256xf32>
    %c89 = arith.constant 89 : index
    %354 = memref.load %arg3[%c89] : memref<144xf32, #tpu.memory_space<smem>>
    %355 = vector.broadcast %354 : f32 to vector<2x256xf32>
    %356 = arith.mulf %355, %345 : vector<2x256xf32>
    %357 = arith.addf %337, %356 : vector<2x256xf32>
    %c125 = arith.constant 125 : index
    %358 = memref.load %arg3[%c125] : memref<144xf32, #tpu.memory_space<smem>>
    %359 = vector.broadcast %358 : f32 to vector<2x256xf32>
    %360 = arith.mulf %359, %345 : vector<2x256xf32>
    %361 = arith.addf %341, %360 : vector<2x256xf32>
    %c0_72 = arith.constant 0 : index
    %c2_73 = arith.constant 2 : index
    %c0_74 = arith.constant 0 : index
    %362 = vector.load %arg6[%c0_72, %c2_73, %c0_74] : memref<2x4x290xf32, #tpu.memory_space<vmem>>, vector<2x1x256xf32>
    %363 = vector.shape_cast %362 : vector<2x1x256xf32> to vector<2x256xf32>
    %364 = vector.broadcast %7 : vector<1x256xf32> to vector<2x256xf32>
    %365 = arith.mulf %363, %364 : vector<2x256xf32>
    %c18_75 = arith.constant 18 : index
    %366 = memref.load %arg3[%c18_75] : memref<144xf32, #tpu.memory_space<smem>>
    %367 = vector.broadcast %366 : f32 to vector<2x256xf32>
    %368 = arith.mulf %367, %365 : vector<2x256xf32>
    %369 = arith.addf %349, %368 : vector<2x256xf32>
    %c54 = arith.constant 54 : index
    %370 = memref.load %arg3[%c54] : memref<144xf32, #tpu.memory_space<smem>>
    %371 = vector.broadcast %370 : f32 to vector<2x256xf32>
    %372 = arith.mulf %371, %365 : vector<2x256xf32>
    %373 = arith.addf %353, %372 : vector<2x256xf32>
    %c90 = arith.constant 90 : index
    %374 = memref.load %arg3[%c90] : memref<144xf32, #tpu.memory_space<smem>>
    %375 = vector.broadcast %374 : f32 to vector<2x256xf32>
    %376 = arith.mulf %375, %365 : vector<2x256xf32>
    %377 = arith.addf %357, %376 : vector<2x256xf32>
    %c126 = arith.constant 126 : index
    %378 = memref.load %arg3[%c126] : memref<144xf32, #tpu.memory_space<smem>>
    %379 = vector.broadcast %378 : f32 to vector<2x256xf32>
    %380 = arith.mulf %379, %365 : vector<2x256xf32>
    %381 = arith.addf %361, %380 : vector<2x256xf32>
    %c0_76 = arith.constant 0 : index
    %c2_77 = arith.constant 2 : index
    %c1_78 = arith.constant 1 : index
    %382 = vector.load %arg6[%c0_76, %c2_77, %c1_78] : memref<2x4x290xf32, #tpu.memory_space<vmem>>, vector<2x1x256xf32>
    %383 = vector.shape_cast %382 : vector<2x1x256xf32> to vector<2x256xf32>
    %c19 = arith.constant 19 : index
    %384 = memref.load %arg3[%c19] : memref<144xf32, #tpu.memory_space<smem>>
    %385 = vector.broadcast %384 : f32 to vector<2x256xf32>
    %386 = arith.mulf %385, %383 : vector<2x256xf32>
    %387 = arith.addf %369, %386 : vector<2x256xf32>
    %c55 = arith.constant 55 : index
    %388 = memref.load %arg3[%c55] : memref<144xf32, #tpu.memory_space<smem>>
    %389 = vector.broadcast %388 : f32 to vector<2x256xf32>
    %390 = arith.mulf %389, %383 : vector<2x256xf32>
    %391 = arith.addf %373, %390 : vector<2x256xf32>
    %c91 = arith.constant 91 : index
    %392 = memref.load %arg3[%c91] : memref<144xf32, #tpu.memory_space<smem>>
    %393 = vector.broadcast %392 : f32 to vector<2x256xf32>
    %394 = arith.mulf %393, %383 : vector<2x256xf32>
    %395 = arith.addf %377, %394 : vector<2x256xf32>
    %c127 = arith.constant 127 : index
    %396 = memref.load %arg3[%c127] : memref<144xf32, #tpu.memory_space<smem>>
    %397 = vector.broadcast %396 : f32 to vector<2x256xf32>
    %398 = arith.mulf %397, %383 : vector<2x256xf32>
    %399 = arith.addf %381, %398 : vector<2x256xf32>
    %c0_79 = arith.constant 0 : index
    %c2_80 = arith.constant 2 : index
    %c2_81 = arith.constant 2 : index
    %400 = vector.load %arg6[%c0_79, %c2_80, %c2_81] : memref<2x4x290xf32, #tpu.memory_space<vmem>>, vector<2x1x256xf32>
    %401 = vector.shape_cast %400 : vector<2x1x256xf32> to vector<2x256xf32>
    %402 = vector.broadcast %9 : vector<1x256xf32> to vector<2x256xf32>
    %403 = arith.mulf %401, %402 : vector<2x256xf32>
    %c20 = arith.constant 20 : index
    %404 = memref.load %arg3[%c20] : memref<144xf32, #tpu.memory_space<smem>>
    %405 = vector.broadcast %404 : f32 to vector<2x256xf32>
    %406 = arith.mulf %405, %403 : vector<2x256xf32>
    %407 = arith.addf %387, %406 : vector<2x256xf32>
    %c56 = arith.constant 56 : index
    %408 = memref.load %arg3[%c56] : memref<144xf32, #tpu.memory_space<smem>>
    %409 = vector.broadcast %408 : f32 to vector<2x256xf32>
    %410 = arith.mulf %409, %403 : vector<2x256xf32>
    %411 = arith.addf %391, %410 : vector<2x256xf32>
    %c92 = arith.constant 92 : index
    %412 = memref.load %arg3[%c92] : memref<144xf32, #tpu.memory_space<smem>>
    %413 = vector.broadcast %412 : f32 to vector<2x256xf32>
    %414 = arith.mulf %413, %403 : vector<2x256xf32>
    %415 = arith.addf %395, %414 : vector<2x256xf32>
    %c128 = arith.constant 128 : index
    %416 = memref.load %arg3[%c128] : memref<144xf32, #tpu.memory_space<smem>>
    %417 = vector.broadcast %416 : f32 to vector<2x256xf32>
    %418 = arith.mulf %417, %403 : vector<2x256xf32>
    %419 = arith.addf %399, %418 : vector<2x256xf32>
    %c0_82 = arith.constant 0 : index
    %c2_83 = arith.constant 2 : index
    %c16_84 = arith.constant 16 : index
    %420 = vector.load %arg6[%c0_82, %c2_83, %c16_84] : memref<2x4x290xf32, #tpu.memory_space<vmem>>, vector<2x1x256xf32>
    %421 = vector.shape_cast %420 : vector<2x1x256xf32> to vector<2x256xf32>
    %422 = vector.broadcast %7 : vector<1x256xf32> to vector<2x256xf32>
    %423 = arith.mulf %421, %422 : vector<2x256xf32>
    %c21 = arith.constant 21 : index
    %424 = memref.load %arg3[%c21] : memref<144xf32, #tpu.memory_space<smem>>
    %425 = vector.broadcast %424 : f32 to vector<2x256xf32>
    %426 = arith.mulf %425, %423 : vector<2x256xf32>
    %427 = arith.addf %407, %426 : vector<2x256xf32>
    %c57 = arith.constant 57 : index
    %428 = memref.load %arg3[%c57] : memref<144xf32, #tpu.memory_space<smem>>
    %429 = vector.broadcast %428 : f32 to vector<2x256xf32>
    %430 = arith.mulf %429, %423 : vector<2x256xf32>
    %431 = arith.addf %411, %430 : vector<2x256xf32>
    %c93 = arith.constant 93 : index
    %432 = memref.load %arg3[%c93] : memref<144xf32, #tpu.memory_space<smem>>
    %433 = vector.broadcast %432 : f32 to vector<2x256xf32>
    %434 = arith.mulf %433, %423 : vector<2x256xf32>
    %435 = arith.addf %415, %434 : vector<2x256xf32>
    %c129 = arith.constant 129 : index
    %436 = memref.load %arg3[%c129] : memref<144xf32, #tpu.memory_space<smem>>
    %437 = vector.broadcast %436 : f32 to vector<2x256xf32>
    %438 = arith.mulf %437, %423 : vector<2x256xf32>
    %439 = arith.addf %419, %438 : vector<2x256xf32>
    %c0_85 = arith.constant 0 : index
    %c2_86 = arith.constant 2 : index
    %c17_87 = arith.constant 17 : index
    %440 = vector.load %arg6[%c0_85, %c2_86, %c17_87] : memref<2x4x290xf32, #tpu.memory_space<vmem>>, vector<2x1x256xf32>
    %441 = vector.shape_cast %440 : vector<2x1x256xf32> to vector<2x256xf32>
    %c22 = arith.constant 22 : index
    %442 = memref.load %arg3[%c22] : memref<144xf32, #tpu.memory_space<smem>>
    %443 = vector.broadcast %442 : f32 to vector<2x256xf32>
    %444 = arith.mulf %443, %441 : vector<2x256xf32>
    %445 = arith.addf %427, %444 : vector<2x256xf32>
    %c58 = arith.constant 58 : index
    %446 = memref.load %arg3[%c58] : memref<144xf32, #tpu.memory_space<smem>>
    %447 = vector.broadcast %446 : f32 to vector<2x256xf32>
    %448 = arith.mulf %447, %441 : vector<2x256xf32>
    %449 = arith.addf %431, %448 : vector<2x256xf32>
    %c94 = arith.constant 94 : index
    %450 = memref.load %arg3[%c94] : memref<144xf32, #tpu.memory_space<smem>>
    %451 = vector.broadcast %450 : f32 to vector<2x256xf32>
    %452 = arith.mulf %451, %441 : vector<2x256xf32>
    %453 = arith.addf %435, %452 : vector<2x256xf32>
    %c130 = arith.constant 130 : index
    %454 = memref.load %arg3[%c130] : memref<144xf32, #tpu.memory_space<smem>>
    %455 = vector.broadcast %454 : f32 to vector<2x256xf32>
    %456 = arith.mulf %455, %441 : vector<2x256xf32>
    %457 = arith.addf %439, %456 : vector<2x256xf32>
    %c0_88 = arith.constant 0 : index
    %c2_89 = arith.constant 2 : index
    %c18_90 = arith.constant 18 : index
    %458 = vector.load %arg6[%c0_88, %c2_89, %c18_90] : memref<2x4x290xf32, #tpu.memory_space<vmem>>, vector<2x1x256xf32>
    %459 = vector.shape_cast %458 : vector<2x1x256xf32> to vector<2x256xf32>
    %460 = vector.broadcast %9 : vector<1x256xf32> to vector<2x256xf32>
    %461 = arith.mulf %459, %460 : vector<2x256xf32>
    %c23 = arith.constant 23 : index
    %462 = memref.load %arg3[%c23] : memref<144xf32, #tpu.memory_space<smem>>
    %463 = vector.broadcast %462 : f32 to vector<2x256xf32>
    %464 = arith.mulf %463, %461 : vector<2x256xf32>
    %465 = arith.addf %445, %464 : vector<2x256xf32>
    %c59 = arith.constant 59 : index
    %466 = memref.load %arg3[%c59] : memref<144xf32, #tpu.memory_space<smem>>
    %467 = vector.broadcast %466 : f32 to vector<2x256xf32>
    %468 = arith.mulf %467, %461 : vector<2x256xf32>
    %469 = arith.addf %449, %468 : vector<2x256xf32>
    %c95 = arith.constant 95 : index
    %470 = memref.load %arg3[%c95] : memref<144xf32, #tpu.memory_space<smem>>
    %471 = vector.broadcast %470 : f32 to vector<2x256xf32>
    %472 = arith.mulf %471, %461 : vector<2x256xf32>
    %473 = arith.addf %453, %472 : vector<2x256xf32>
    %c131 = arith.constant 131 : index
    %474 = memref.load %arg3[%c131] : memref<144xf32, #tpu.memory_space<smem>>
    %475 = vector.broadcast %474 : f32 to vector<2x256xf32>
    %476 = arith.mulf %475, %461 : vector<2x256xf32>
    %477 = arith.addf %457, %476 : vector<2x256xf32>
    %c0_91 = arith.constant 0 : index
    %c2_92 = arith.constant 2 : index
    %c32_93 = arith.constant 32 : index
    %478 = vector.load %arg6[%c0_91, %c2_92, %c32_93] : memref<2x4x290xf32, #tpu.memory_space<vmem>>, vector<2x1x256xf32>
    %479 = vector.shape_cast %478 : vector<2x1x256xf32> to vector<2x256xf32>
    %480 = vector.broadcast %7 : vector<1x256xf32> to vector<2x256xf32>
    %481 = arith.mulf %479, %480 : vector<2x256xf32>
    %c24 = arith.constant 24 : index
    %482 = memref.load %arg3[%c24] : memref<144xf32, #tpu.memory_space<smem>>
    %483 = vector.broadcast %482 : f32 to vector<2x256xf32>
    %484 = arith.mulf %483, %481 : vector<2x256xf32>
    %485 = arith.addf %465, %484 : vector<2x256xf32>
    %c60 = arith.constant 60 : index
    %486 = memref.load %arg3[%c60] : memref<144xf32, #tpu.memory_space<smem>>
    %487 = vector.broadcast %486 : f32 to vector<2x256xf32>
    %488 = arith.mulf %487, %481 : vector<2x256xf32>
    %489 = arith.addf %469, %488 : vector<2x256xf32>
    %c96 = arith.constant 96 : index
    %490 = memref.load %arg3[%c96] : memref<144xf32, #tpu.memory_space<smem>>
    %491 = vector.broadcast %490 : f32 to vector<2x256xf32>
    %492 = arith.mulf %491, %481 : vector<2x256xf32>
    %493 = arith.addf %473, %492 : vector<2x256xf32>
    %c132 = arith.constant 132 : index
    %494 = memref.load %arg3[%c132] : memref<144xf32, #tpu.memory_space<smem>>
    %495 = vector.broadcast %494 : f32 to vector<2x256xf32>
    %496 = arith.mulf %495, %481 : vector<2x256xf32>
    %497 = arith.addf %477, %496 : vector<2x256xf32>
    %c0_94 = arith.constant 0 : index
    %c2_95 = arith.constant 2 : index
    %c33_96 = arith.constant 33 : index
    %498 = vector.load %arg6[%c0_94, %c2_95, %c33_96] : memref<2x4x290xf32, #tpu.memory_space<vmem>>, vector<2x1x256xf32>
    %499 = vector.shape_cast %498 : vector<2x1x256xf32> to vector<2x256xf32>
    %c25 = arith.constant 25 : index
    %500 = memref.load %arg3[%c25] : memref<144xf32, #tpu.memory_space<smem>>
    %501 = vector.broadcast %500 : f32 to vector<2x256xf32>
    %502 = arith.mulf %501, %499 : vector<2x256xf32>
    %503 = arith.addf %485, %502 : vector<2x256xf32>
    %c61 = arith.constant 61 : index
    %504 = memref.load %arg3[%c61] : memref<144xf32, #tpu.memory_space<smem>>
    %505 = vector.broadcast %504 : f32 to vector<2x256xf32>
    %506 = arith.mulf %505, %499 : vector<2x256xf32>
    %507 = arith.addf %489, %506 : vector<2x256xf32>
    %c97 = arith.constant 97 : index
    %508 = memref.load %arg3[%c97] : memref<144xf32, #tpu.memory_space<smem>>
    %509 = vector.broadcast %508 : f32 to vector<2x256xf32>
    %510 = arith.mulf %509, %499 : vector<2x256xf32>
    %511 = arith.addf %493, %510 : vector<2x256xf32>
    %c133 = arith.constant 133 : index
    %512 = memref.load %arg3[%c133] : memref<144xf32, #tpu.memory_space<smem>>
    %513 = vector.broadcast %512 : f32 to vector<2x256xf32>
    %514 = arith.mulf %513, %499 : vector<2x256xf32>
    %515 = arith.addf %497, %514 : vector<2x256xf32>
    %c0_97 = arith.constant 0 : index
    %c2_98 = arith.constant 2 : index
    %c34_99 = arith.constant 34 : index
    %516 = vector.load %arg6[%c0_97, %c2_98, %c34_99] : memref<2x4x290xf32, #tpu.memory_space<vmem>>, vector<2x1x256xf32>
    %517 = vector.shape_cast %516 : vector<2x1x256xf32> to vector<2x256xf32>
    %518 = vector.broadcast %9 : vector<1x256xf32> to vector<2x256xf32>
    %519 = arith.mulf %517, %518 : vector<2x256xf32>
    %c26 = arith.constant 26 : index
    %520 = memref.load %arg3[%c26] : memref<144xf32, #tpu.memory_space<smem>>
    %521 = vector.broadcast %520 : f32 to vector<2x256xf32>
    %522 = arith.mulf %521, %519 : vector<2x256xf32>
    %523 = arith.addf %503, %522 : vector<2x256xf32>
    %c62 = arith.constant 62 : index
    %524 = memref.load %arg3[%c62] : memref<144xf32, #tpu.memory_space<smem>>
    %525 = vector.broadcast %524 : f32 to vector<2x256xf32>
    %526 = arith.mulf %525, %519 : vector<2x256xf32>
    %527 = arith.addf %507, %526 : vector<2x256xf32>
    %c98 = arith.constant 98 : index
    %528 = memref.load %arg3[%c98] : memref<144xf32, #tpu.memory_space<smem>>
    %529 = vector.broadcast %528 : f32 to vector<2x256xf32>
    %530 = arith.mulf %529, %519 : vector<2x256xf32>
    %531 = arith.addf %511, %530 : vector<2x256xf32>
    %c134 = arith.constant 134 : index
    %532 = memref.load %arg3[%c134] : memref<144xf32, #tpu.memory_space<smem>>
    %533 = vector.broadcast %532 : f32 to vector<2x256xf32>
    %534 = arith.mulf %533, %519 : vector<2x256xf32>
    %535 = arith.addf %515, %534 : vector<2x256xf32>
    %c0_100 = arith.constant 0 : index
    %c3_101 = arith.constant 3 : index
    %c0_102 = arith.constant 0 : index
    %536 = vector.load %arg6[%c0_100, %c3_101, %c0_102] : memref<2x4x290xf32, #tpu.memory_space<vmem>>, vector<2x1x256xf32>
    %537 = vector.shape_cast %536 : vector<2x1x256xf32> to vector<2x256xf32>
    %538 = vector.broadcast %7 : vector<1x256xf32> to vector<2x256xf32>
    %539 = arith.mulf %537, %538 : vector<2x256xf32>
    %c27 = arith.constant 27 : index
    %540 = memref.load %arg3[%c27] : memref<144xf32, #tpu.memory_space<smem>>
    %541 = vector.broadcast %540 : f32 to vector<2x256xf32>
    %542 = arith.mulf %541, %539 : vector<2x256xf32>
    %543 = arith.addf %523, %542 : vector<2x256xf32>
    %c63 = arith.constant 63 : index
    %544 = memref.load %arg3[%c63] : memref<144xf32, #tpu.memory_space<smem>>
    %545 = vector.broadcast %544 : f32 to vector<2x256xf32>
    %546 = arith.mulf %545, %539 : vector<2x256xf32>
    %547 = arith.addf %527, %546 : vector<2x256xf32>
    %c99 = arith.constant 99 : index
    %548 = memref.load %arg3[%c99] : memref<144xf32, #tpu.memory_space<smem>>
    %549 = vector.broadcast %548 : f32 to vector<2x256xf32>
    %550 = arith.mulf %549, %539 : vector<2x256xf32>
    %551 = arith.addf %531, %550 : vector<2x256xf32>
    %c135 = arith.constant 135 : index
    %552 = memref.load %arg3[%c135] : memref<144xf32, #tpu.memory_space<smem>>
    %553 = vector.broadcast %552 : f32 to vector<2x256xf32>
    %554 = arith.mulf %553, %539 : vector<2x256xf32>
    %555 = arith.addf %535, %554 : vector<2x256xf32>
    %c0_103 = arith.constant 0 : index
    %c3_104 = arith.constant 3 : index
    %c1_105 = arith.constant 1 : index
    %556 = vector.load %arg6[%c0_103, %c3_104, %c1_105] : memref<2x4x290xf32, #tpu.memory_space<vmem>>, vector<2x1x256xf32>
    %557 = vector.shape_cast %556 : vector<2x1x256xf32> to vector<2x256xf32>
    %c28 = arith.constant 28 : index
    %558 = memref.load %arg3[%c28] : memref<144xf32, #tpu.memory_space<smem>>
    %559 = vector.broadcast %558 : f32 to vector<2x256xf32>
    %560 = arith.mulf %559, %557 : vector<2x256xf32>
    %561 = arith.addf %543, %560 : vector<2x256xf32>
    %c64 = arith.constant 64 : index
    %562 = memref.load %arg3[%c64] : memref<144xf32, #tpu.memory_space<smem>>
    %563 = vector.broadcast %562 : f32 to vector<2x256xf32>
    %564 = arith.mulf %563, %557 : vector<2x256xf32>
    %565 = arith.addf %547, %564 : vector<2x256xf32>
    %c100 = arith.constant 100 : index
    %566 = memref.load %arg3[%c100] : memref<144xf32, #tpu.memory_space<smem>>
    %567 = vector.broadcast %566 : f32 to vector<2x256xf32>
    %568 = arith.mulf %567, %557 : vector<2x256xf32>
    %569 = arith.addf %551, %568 : vector<2x256xf32>
    %c136 = arith.constant 136 : index
    %570 = memref.load %arg3[%c136] : memref<144xf32, #tpu.memory_space<smem>>
    %571 = vector.broadcast %570 : f32 to vector<2x256xf32>
    %572 = arith.mulf %571, %557 : vector<2x256xf32>
    %573 = arith.addf %555, %572 : vector<2x256xf32>
    %c0_106 = arith.constant 0 : index
    %c3_107 = arith.constant 3 : index
    %c2_108 = arith.constant 2 : index
    %574 = vector.load %arg6[%c0_106, %c3_107, %c2_108] : memref<2x4x290xf32, #tpu.memory_space<vmem>>, vector<2x1x256xf32>
    %575 = vector.shape_cast %574 : vector<2x1x256xf32> to vector<2x256xf32>
    %576 = vector.broadcast %9 : vector<1x256xf32> to vector<2x256xf32>
    %577 = arith.mulf %575, %576 : vector<2x256xf32>
    %c29 = arith.constant 29 : index
    %578 = memref.load %arg3[%c29] : memref<144xf32, #tpu.memory_space<smem>>
    %579 = vector.broadcast %578 : f32 to vector<2x256xf32>
    %580 = arith.mulf %579, %577 : vector<2x256xf32>
    %581 = arith.addf %561, %580 : vector<2x256xf32>
    %c65 = arith.constant 65 : index
    %582 = memref.load %arg3[%c65] : memref<144xf32, #tpu.memory_space<smem>>
    %583 = vector.broadcast %582 : f32 to vector<2x256xf32>
    %584 = arith.mulf %583, %577 : vector<2x256xf32>
    %585 = arith.addf %565, %584 : vector<2x256xf32>
    %c101 = arith.constant 101 : index
    %586 = memref.load %arg3[%c101] : memref<144xf32, #tpu.memory_space<smem>>
    %587 = vector.broadcast %586 : f32 to vector<2x256xf32>
    %588 = arith.mulf %587, %577 : vector<2x256xf32>
    %589 = arith.addf %569, %588 : vector<2x256xf32>
    %c137 = arith.constant 137 : index
    %590 = memref.load %arg3[%c137] : memref<144xf32, #tpu.memory_space<smem>>
    %591 = vector.broadcast %590 : f32 to vector<2x256xf32>
    %592 = arith.mulf %591, %577 : vector<2x256xf32>
    %593 = arith.addf %573, %592 : vector<2x256xf32>
    %c0_109 = arith.constant 0 : index
    %c3_110 = arith.constant 3 : index
    %c16_111 = arith.constant 16 : index
    %594 = vector.load %arg6[%c0_109, %c3_110, %c16_111] : memref<2x4x290xf32, #tpu.memory_space<vmem>>, vector<2x1x256xf32>
    %595 = vector.shape_cast %594 : vector<2x1x256xf32> to vector<2x256xf32>
    %596 = vector.broadcast %7 : vector<1x256xf32> to vector<2x256xf32>
    %597 = arith.mulf %595, %596 : vector<2x256xf32>
    %c30 = arith.constant 30 : index
    %598 = memref.load %arg3[%c30] : memref<144xf32, #tpu.memory_space<smem>>
    %599 = vector.broadcast %598 : f32 to vector<2x256xf32>
    %600 = arith.mulf %599, %597 : vector<2x256xf32>
    %601 = arith.addf %581, %600 : vector<2x256xf32>
    %c66 = arith.constant 66 : index
    %602 = memref.load %arg3[%c66] : memref<144xf32, #tpu.memory_space<smem>>
    %603 = vector.broadcast %602 : f32 to vector<2x256xf32>
    %604 = arith.mulf %603, %597 : vector<2x256xf32>
    %605 = arith.addf %585, %604 : vector<2x256xf32>
    %c102 = arith.constant 102 : index
    %606 = memref.load %arg3[%c102] : memref<144xf32, #tpu.memory_space<smem>>
    %607 = vector.broadcast %606 : f32 to vector<2x256xf32>
    %608 = arith.mulf %607, %597 : vector<2x256xf32>
    %609 = arith.addf %589, %608 : vector<2x256xf32>
    %c138 = arith.constant 138 : index
    %610 = memref.load %arg3[%c138] : memref<144xf32, #tpu.memory_space<smem>>
    %611 = vector.broadcast %610 : f32 to vector<2x256xf32>
    %612 = arith.mulf %611, %597 : vector<2x256xf32>
    %613 = arith.addf %593, %612 : vector<2x256xf32>
    %c0_112 = arith.constant 0 : index
    %c3_113 = arith.constant 3 : index
    %c17_114 = arith.constant 17 : index
    %614 = vector.load %arg6[%c0_112, %c3_113, %c17_114] : memref<2x4x290xf32, #tpu.memory_space<vmem>>, vector<2x1x256xf32>
    %615 = vector.shape_cast %614 : vector<2x1x256xf32> to vector<2x256xf32>
    %c31 = arith.constant 31 : index
    %616 = memref.load %arg3[%c31] : memref<144xf32, #tpu.memory_space<smem>>
    %617 = vector.broadcast %616 : f32 to vector<2x256xf32>
    %618 = arith.mulf %617, %615 : vector<2x256xf32>
    %619 = arith.addf %601, %618 : vector<2x256xf32>
    %c67 = arith.constant 67 : index
    %620 = memref.load %arg3[%c67] : memref<144xf32, #tpu.memory_space<smem>>
    %621 = vector.broadcast %620 : f32 to vector<2x256xf32>
    %622 = arith.mulf %621, %615 : vector<2x256xf32>
    %623 = arith.addf %605, %622 : vector<2x256xf32>
    %c103 = arith.constant 103 : index
    %624 = memref.load %arg3[%c103] : memref<144xf32, #tpu.memory_space<smem>>
    %625 = vector.broadcast %624 : f32 to vector<2x256xf32>
    %626 = arith.mulf %625, %615 : vector<2x256xf32>
    %627 = arith.addf %609, %626 : vector<2x256xf32>
    %c139 = arith.constant 139 : index
    %628 = memref.load %arg3[%c139] : memref<144xf32, #tpu.memory_space<smem>>
    %629 = vector.broadcast %628 : f32 to vector<2x256xf32>
    %630 = arith.mulf %629, %615 : vector<2x256xf32>
    %631 = arith.addf %613, %630 : vector<2x256xf32>
    %c0_115 = arith.constant 0 : index
    %c3_116 = arith.constant 3 : index
    %c18_117 = arith.constant 18 : index
    %632 = vector.load %arg6[%c0_115, %c3_116, %c18_117] : memref<2x4x290xf32, #tpu.memory_space<vmem>>, vector<2x1x256xf32>
    %633 = vector.shape_cast %632 : vector<2x1x256xf32> to vector<2x256xf32>
    %634 = vector.broadcast %9 : vector<1x256xf32> to vector<2x256xf32>
    %635 = arith.mulf %633, %634 : vector<2x256xf32>
    %c32_118 = arith.constant 32 : index
    %636 = memref.load %arg3[%c32_118] : memref<144xf32, #tpu.memory_space<smem>>
    %637 = vector.broadcast %636 : f32 to vector<2x256xf32>
    %638 = arith.mulf %637, %635 : vector<2x256xf32>
    %639 = arith.addf %619, %638 : vector<2x256xf32>
    %c68 = arith.constant 68 : index
    %640 = memref.load %arg3[%c68] : memref<144xf32, #tpu.memory_space<smem>>
    %641 = vector.broadcast %640 : f32 to vector<2x256xf32>
    %642 = arith.mulf %641, %635 : vector<2x256xf32>
    %643 = arith.addf %623, %642 : vector<2x256xf32>
    %c104 = arith.constant 104 : index
    %644 = memref.load %arg3[%c104] : memref<144xf32, #tpu.memory_space<smem>>
    %645 = vector.broadcast %644 : f32 to vector<2x256xf32>
    %646 = arith.mulf %645, %635 : vector<2x256xf32>
    %647 = arith.addf %627, %646 : vector<2x256xf32>
    %c140 = arith.constant 140 : index
    %648 = memref.load %arg3[%c140] : memref<144xf32, #tpu.memory_space<smem>>
    %649 = vector.broadcast %648 : f32 to vector<2x256xf32>
    %650 = arith.mulf %649, %635 : vector<2x256xf32>
    %651 = arith.addf %631, %650 : vector<2x256xf32>
    %c0_119 = arith.constant 0 : index
    %c3_120 = arith.constant 3 : index
    %c32_121 = arith.constant 32 : index
    %652 = vector.load %arg6[%c0_119, %c3_120, %c32_121] : memref<2x4x290xf32, #tpu.memory_space<vmem>>, vector<2x1x256xf32>
    %653 = vector.shape_cast %652 : vector<2x1x256xf32> to vector<2x256xf32>
    %654 = vector.broadcast %7 : vector<1x256xf32> to vector<2x256xf32>
    %655 = arith.mulf %653, %654 : vector<2x256xf32>
    %c33_122 = arith.constant 33 : index
    %656 = memref.load %arg3[%c33_122] : memref<144xf32, #tpu.memory_space<smem>>
    %657 = vector.broadcast %656 : f32 to vector<2x256xf32>
    %658 = arith.mulf %657, %655 : vector<2x256xf32>
    %659 = arith.addf %639, %658 : vector<2x256xf32>
    %c69 = arith.constant 69 : index
    %660 = memref.load %arg3[%c69] : memref<144xf32, #tpu.memory_space<smem>>
    %661 = vector.broadcast %660 : f32 to vector<2x256xf32>
    %662 = arith.mulf %661, %655 : vector<2x256xf32>
    %663 = arith.addf %643, %662 : vector<2x256xf32>
    %c105 = arith.constant 105 : index
    %664 = memref.load %arg3[%c105] : memref<144xf32, #tpu.memory_space<smem>>
    %665 = vector.broadcast %664 : f32 to vector<2x256xf32>
    %666 = arith.mulf %665, %655 : vector<2x256xf32>
    %667 = arith.addf %647, %666 : vector<2x256xf32>
    %c141 = arith.constant 141 : index
    %668 = memref.load %arg3[%c141] : memref<144xf32, #tpu.memory_space<smem>>
    %669 = vector.broadcast %668 : f32 to vector<2x256xf32>
    %670 = arith.mulf %669, %655 : vector<2x256xf32>
    %671 = arith.addf %651, %670 : vector<2x256xf32>
    %c0_123 = arith.constant 0 : index
    %c3_124 = arith.constant 3 : index
    %c33_125 = arith.constant 33 : index
    %672 = vector.load %arg6[%c0_123, %c3_124, %c33_125] : memref<2x4x290xf32, #tpu.memory_space<vmem>>, vector<2x1x256xf32>
    %673 = vector.shape_cast %672 : vector<2x1x256xf32> to vector<2x256xf32>
    %c34_126 = arith.constant 34 : index
    %674 = memref.load %arg3[%c34_126] : memref<144xf32, #tpu.memory_space<smem>>
    %675 = vector.broadcast %674 : f32 to vector<2x256xf32>
    %676 = arith.mulf %675, %673 : vector<2x256xf32>
    %677 = arith.addf %659, %676 : vector<2x256xf32>
    %c70 = arith.constant 70 : index
    %678 = memref.load %arg3[%c70] : memref<144xf32, #tpu.memory_space<smem>>
    %679 = vector.broadcast %678 : f32 to vector<2x256xf32>
    %680 = arith.mulf %679, %673 : vector<2x256xf32>
    %681 = arith.addf %663, %680 : vector<2x256xf32>
    %c106 = arith.constant 106 : index
    %682 = memref.load %arg3[%c106] : memref<144xf32, #tpu.memory_space<smem>>
    %683 = vector.broadcast %682 : f32 to vector<2x256xf32>
    %684 = arith.mulf %683, %673 : vector<2x256xf32>
    %685 = arith.addf %667, %684 : vector<2x256xf32>
    %c142 = arith.constant 142 : index
    %686 = memref.load %arg3[%c142] : memref<144xf32, #tpu.memory_space<smem>>
    %687 = vector.broadcast %686 : f32 to vector<2x256xf32>
    %688 = arith.mulf %687, %673 : vector<2x256xf32>
    %689 = arith.addf %671, %688 : vector<2x256xf32>
    %c0_127 = arith.constant 0 : index
    %c3_128 = arith.constant 3 : index
    %c34_129 = arith.constant 34 : index
    %690 = vector.load %arg6[%c0_127, %c3_128, %c34_129] : memref<2x4x290xf32, #tpu.memory_space<vmem>>, vector<2x1x256xf32>
    %691 = vector.shape_cast %690 : vector<2x1x256xf32> to vector<2x256xf32>
    %692 = vector.broadcast %9 : vector<1x256xf32> to vector<2x256xf32>
    %693 = arith.mulf %691, %692 : vector<2x256xf32>
    %c35 = arith.constant 35 : index
    %694 = memref.load %arg3[%c35] : memref<144xf32, #tpu.memory_space<smem>>
    %695 = vector.broadcast %694 : f32 to vector<2x256xf32>
    %696 = arith.mulf %695, %693 : vector<2x256xf32>
    %697 = arith.addf %677, %696 : vector<2x256xf32>
    %c71 = arith.constant 71 : index
    %698 = memref.load %arg3[%c71] : memref<144xf32, #tpu.memory_space<smem>>
    %699 = vector.broadcast %698 : f32 to vector<2x256xf32>
    %700 = arith.mulf %699, %693 : vector<2x256xf32>
    %701 = arith.addf %681, %700 : vector<2x256xf32>
    %c107 = arith.constant 107 : index
    %702 = memref.load %arg3[%c107] : memref<144xf32, #tpu.memory_space<smem>>
    %703 = vector.broadcast %702 : f32 to vector<2x256xf32>
    %704 = arith.mulf %703, %693 : vector<2x256xf32>
    %705 = arith.addf %685, %704 : vector<2x256xf32>
    %c143 = arith.constant 143 : index
    %706 = memref.load %arg3[%c143] : memref<144xf32, #tpu.memory_space<smem>>
    %707 = vector.broadcast %706 : f32 to vector<2x256xf32>
    %708 = arith.mulf %707, %693 : vector<2x256xf32>
    %709 = arith.addf %689, %708 : vector<2x256xf32>
    %c0_130 = arith.constant 0 : index
    %710 = memref.load %arg4[%c0_130] : memref<4xf32, #tpu.memory_space<smem>>
    %711 = vector.broadcast %710 : f32 to vector<2x256xf32>
    %712 = arith.addf %697, %711 : vector<2x256xf32>
    %c0_131 = arith.constant 0 : index
    %c0_132 = arith.constant 0 : index
    %c0_133 = arith.constant 0 : index
    %713 = vector.load %arg5[%c0_131, %c0_132, %c0_133] : memref<2x4x256xf32, #tpu.memory_space<vmem>>, vector<2x1x256xf32>
    %714 = vector.shape_cast %713 : vector<2x1x256xf32> to vector<2x256xf32>
    %715 = vector.shape_cast %712 : vector<2x256xf32> to vector<2x1x256xf32>
    tpu.vector_store %arg5[%c0_131, %c0_132, %c0_133], %715 {strides = array<i32>} : memref<2x4x256xf32, #tpu.memory_space<vmem>>, vector<2x1x256xf32>,
    %c1_134 = arith.constant 1 : index
    %716 = memref.load %arg4[%c1_134] : memref<4xf32, #tpu.memory_space<smem>>
    %717 = vector.broadcast %716 : f32 to vector<2x256xf32>
    %718 = arith.addf %701, %717 : vector<2x256xf32>
    %c0_135 = arith.constant 0 : index
    %c1_136 = arith.constant 1 : index
    %c0_137 = arith.constant 0 : index
    %719 = vector.load %arg5[%c0_135, %c1_136, %c0_137] : memref<2x4x256xf32, #tpu.memory_space<vmem>>, vector<2x1x256xf32>
    %720 = vector.shape_cast %719 : vector<2x1x256xf32> to vector<2x256xf32>
    %721 = vector.shape_cast %718 : vector<2x256xf32> to vector<2x1x256xf32>
    tpu.vector_store %arg5[%c0_135, %c1_136, %c0_137], %721 {strides = array<i32>} : memref<2x4x256xf32, #tpu.memory_space<vmem>>, vector<2x1x256xf32>,
    %c2_138 = arith.constant 2 : index
    %722 = memref.load %arg4[%c2_138] : memref<4xf32, #tpu.memory_space<smem>>
    %723 = vector.broadcast %722 : f32 to vector<2x256xf32>
    %724 = arith.addf %705, %723 : vector<2x256xf32>
    %c0_139 = arith.constant 0 : index
    %c2_140 = arith.constant 2 : index
    %c0_141 = arith.constant 0 : index
    %725 = vector.load %arg5[%c0_139, %c2_140, %c0_141] : memref<2x4x256xf32, #tpu.memory_space<vmem>>, vector<2x1x256xf32>
    %726 = vector.shape_cast %725 : vector<2x1x256xf32> to vector<2x256xf32>
    %727 = vector.shape_cast %724 : vector<2x256xf32> to vector<2x1x256xf32>
    tpu.vector_store %arg5[%c0_139, %c2_140, %c0_141], %727 {strides = array<i32>} : memref<2x4x256xf32, #tpu.memory_space<vmem>>, vector<2x1x256xf32>,
    %c3_142 = arith.constant 3 : index
    %728 = memref.load %arg4[%c3_142] : memref<4xf32, #tpu.memory_space<smem>>
    %729 = vector.broadcast %728 : f32 to vector<2x256xf32>
    %730 = arith.addf %709, %729 : vector<2x256xf32>
    %c0_143 = arith.constant 0 : index
    %c3_144 = arith.constant 3 : index
    %c0_145 = arith.constant 0 : index
    %731 = vector.load %arg5[%c0_143, %c3_144, %c0_145] : memref<2x4x256xf32, #tpu.memory_space<vmem>>, vector<2x1x256xf32>
    %732 = vector.shape_cast %731 : vector<2x1x256xf32> to vector<2x256xf32>
    %733 = vector.shape_cast %730 : vector<2x256xf32> to vector<2x1x256xf32>
    tpu.vector_store %arg5[%c0_143, %c3_144, %c0_145], %733 {strides = array<i32>} : memref<2x4x256xf32, #tpu.memory_space<vmem>>, vector<2x1x256xf32>,
    return
  }
  func.func @transform_0(%arg0: i32) -> (i32, i32, i32) {
    %c0_i32 = arith.constant 0 : i32
    %c0_i32_0 = arith.constant 0 : i32
    %c0_i32_1 = arith.constant 0 : i32
    return %arg0, %c0_i32, %c0_i32_0 : i32, i32, i32
  }
  func.func @transform_1(%arg0: i32) -> (i32, i32, i32) {
    %c0_i32 = arith.constant 0 : i32
    %c0_i32_0 = arith.constant 0 : i32
    %c0_i32_1 = arith.constant 0 : i32
    %c0_i32_2 = arith.constant 0 : i32
    return %c0_i32, %c0_i32_0, %c0_i32_1 : i32, i32, i32
  }
  func.func @transform_2(%arg0: i32) -> i32 {
    %c0_i32 = arith.constant 0 : i32
    %c0_i32_0 = arith.constant 0 : i32
    return %c0_i32 : i32
  }
  func.func @transform_3(%arg0: i32) -> i32 {
    %c0_i32 = arith.constant 0 : i32
    %c0_i32_0 = arith.constant 0 : i32
    return %c0_i32 : i32
  }
  func.func @transform_4(%arg0: i32) -> (i32, i32, i32) {
    %c0_i32 = arith.constant 0 : i32
    %c0_i32_0 = arith.constant 0 : i32
    %c0_i32_1 = arith.constant 0 : i32
    return %arg0, %c0_i32, %c0_i32_0 : i32, i32, i32
  }
}

</mosaic_0001>

<bundles_post_ra>
// kernel: tpu_custom_call.1
= control target key start
LH: loop header
LB: loop body
LE: loop exit
PB: predicated region body
PF: predicated region fallthrough
CT: control target
= control target key end

     0   :  { %s5837_s0 = inlined_call_operand.hbm [shape: f32[4,4,256], index: 0, kind: input, shape index: {}]   ;;  %s5838_s1 = inlined_call_operand.hbm [shape: f32[3,1,256], index: 1, kind: input, shape index: {}]   ;;  %s5839_s2 = inlined_call_operand.hbm [shape: f32[144], index: 2, kind: input, shape index: {}]   ;;  %s5840_s3 = inlined_call_operand.vmem [shape: f32[4], index: 3, kind: input, shape index: {}]   ;;  %s5841_s4 = inlined_call_operand.hbm [shape: f32[4,4,256], index: 4, kind: output, shape index: {}]  }
   0x1   :  { %5946 = sst [smem:[#allocation125_spill]] %s5837_s0 }
   0x2   :  { %9 = vsyncpa [#allocation4], 0 }
   0x3   :  { %11 = vsyncpa [#allocation4 + $0x1], 0 }
   0x4   :  { %12 = vsyncpa [#allocation9], 0 }
   0x5   :  { %13 = vsyncpa [#allocation6], 0 }
   0x6   :  { %14 = vsyncpa [#allocation7], 0 }
   0x7   :  { %15 = vsyncpa [#allocation5], 0 }
   0x8   :  { %17 = vsyncpa [#allocation5 + $0x1], 0  ;;  %s3507_s15 = smov 0   ;;  %s3509_s16 = smov 0  }
   0x9   :  { %s3511_s17 = smov 0   ;;  %s3513_s18 = smov 0  }
   0xa LB: > { %s3528_s19 = sadd.s32 4294967295, %s3456_s18   ;;  %s3009_s20 = sadd.s32 4294967294, %s3456_s18   ;;  %s3456_s18 = sphi %s3513_s18, %s6191_s18   ;;  %s3452_s17 = sphi %s3511_s17, %s6190_s17   ;;  %s3448_s16 = sphi %s3509_s16, %s6189_s16   ;;  %s3444_s15 = sphi %s3507_s15, %s6188_s15  }
   0xb   : > { %p43_p0 = scmp.ne.s32.totalorder %s3448_s16, %s3444_s15  ;;  %p44_p1 = scmp.eq.s32.totalorder %s3528_s19, 0 }
   0xc   : > { %p130_p2 = scmp.eq.s32.totalorder %s3528_s19, 1  ;;  %p136_p3 = scmp.eq.s32.totalorder %s3009_s20, 1 }
   0xd   : > { %p3537_p4 = por %p44_p1, %p43_p0  ;;  %p3010_p5 = scmp.ge.s32.totalorder %s3456_s18, 1 }
   0xe   : > { %p3542_p6 = por %p136_p3, %p43_p0  ;;  %p143_p7 = scmp.lt.s32.totalorder %s3456_s18, 3 }
   0xf   : > { %s154_s25 = sshll.u32 %s5838_s1, 4  ;;  %s3458_s27 = smov [#allocation8]   ;;  %s155_s25 = int_to_ptr.hbm [resolvable:$true] %s154_s25 }
  0x10   : > { %p3550_p8 = pnand %p3010_p5, %p143_p7  ;;  %s156_s28 = sshll.u32 %s3458_s27, 4  ;;  %s157_s28 = int_to_ptr.vmem [resolvable:$true] %s156_s28 }
  0x11   : > { %s169_s5 = sshll.u32 %s5839_s2, 4  ;;  %s3459_s6 = smov 32   ;;  %s170_s5 = int_to_ptr.hbm [resolvable:$true] %s169_s5 }
  0x12   : > { %p3204_p9 = pneg %p3550_p8  ;;  %s3460_s7 = smov 2  }
  0x13   : > { %s3461_s8 = smov [#allocation10]   ;;  %s179_s11 = sshll.u32 %s5840_s3, 4  ;;  %s180_s11 = int_to_ptr.vmem [resolvable:$true] %s179_s11 }
  0x14   : > { %p3205_p10 = pnand %p3204_p9, %p44_p1  ;;  %s3462_s12 = smov [#allocation11]  }
  0x15   : > { %s3566_s13 = sadd.s32 1, %s3456_s18   ;;  %s30_s20 = sadd.s32 1, %s3452_s17 }
  0x16   : > { %3207 = dma.hbm_to_vmem [thread:$0]  (!%p3205_p10), %s155_s25, 96, %s157_s28, [#allocation9], %s3459_s6, %s3459_s6, %s3460_s7  }
  0x17   : > { %3210 = dma.hbm_to_smem (!%p3205_p10), %s170_s5, 32, %s3461_s8, [#allocation6]  }
  0x18   : > { %3213 = dma.vmem_to_smem (!%p3205_p10), %s180_s11, 16, %s3462_s12, [#allocation7]  }
  0x19   : > { %s27_s14 = ssub.s32 %s3456_s18, %s3566_s13  ;;  %p37_p13 = scmp.ne.s32.totalorder %s3452_s17, %s3448_s16 }
  0x1a   : > { %p28_p12 = scmp.eq.s32.totalorder %s27_s14, 0  ;;  %p38_p0 = scmp.eq.s32.totalorder %s3456_s18, 0 }
  0x1b   : > { %p3225_p3 = scmp.lt.s32.totalorder %s3456_s18, 2  ;;  %p3580_p7 = por %p130_p2, %p37_p13 }
  0x1c   : > { %s3576_s23 = scalar_select %p28_p12, %s3452_s17, %s30_s20  }
  0x1d   : > { %p39_p5 = por %p38_p0, %p37_p13  ;;  %s190_s25 = sand.u32 1, %s3452_s17  }
  0x1e   : > { %s3185_s27 = sshll.u32 %s3456_s18, 4  ;;  %s3015_s28 = sshll.u32 %s190_s25, 4 }
  0x1f   : > { %s5951_s0 = sld [smem:[#allocation125_spill]]  ;;  %s194_s7 = scalar_lea.vmem [#allocation3], %s3015_s28 }
  0x20   : > { %s203_s8 = sshll.u32 %s194_s7, 4  ;;  %p3591_p9 = pnand %p3225_p3, %p39_p5  ;;  %s204_s8 = int_to_ptr.vmem [resolvable:$true] %s203_s8 }
  0x21   : > { %s191_s10 = scalar_lea.sflag [#allocation4], %s190_s25 }
  0x22   : > { %p3352_p10 = pneg %p3591_p9 }
  0x25   : > { %s200_s5 = scalar_lea.hbm %s5951_s0, %s3185_s27  ;;  %s3355_s27 = scalar_lea.hbm %s5951_s0, 32 }
  0x26   : > { %s201_s6 = sshll.u32 %s200_s5, 4  ;;  %s202_s6 = int_to_ptr.hbm [resolvable:$true] %s201_s6 }
  0x27   : > { %s3348_s11 = sshra.s32 %s202_s6, 4  ;;  %s3349_s11 = int_to_ptr.hbm [resolvable:$true] %s3348_s11 }
  0x28   : > { %s3350_s12 = scalar_lea.hbm %s3349_s11, 16  ;;  %p3356_p0 = scmp.lt.s32.totalorder %s3349_s11, %s5951_s0 }
  0x29   : > { %p3351_p2 = scmp.ne.s32.totalorder %s3349_s11, %s3350_s12  ;;  %p3357_p3 = scmp.lt.s32.totalorder %s3355_s27, %s3350_s12 }
  0x2b   : > { %p3353_p12 = pnand %p3352_p10, %p3351_p2  ;;  %p3358_p5 = por %p3357_p3, %p3356_p0 }
  0x2d   : > { %p3354_p13 = pneg %p3353_p12 }
  0x2f   : > { %p3359_p11 = pnand %p3358_p5, %p3354_p13 }
  0x31   : > { %3362 = shalt.err (!%p3359_p11)
}
  0x32   : > { %s3463_s25 = smov 128   ;;  %s3464_s30 = smov 8  }
  0x33   : > { %3217 = dma.hbm_to_vmem [thread:$0]  (!%p3591_p9), %s202_s6, 256, %s204_s8, %s191_s10, %s3463_s25, %s3463_s25, %s3464_s30  }
  0x34   : > { %215 = sbr.rel (%p3550_p8) target bundleno = 1145 (0x479), region = 36 }
  0x39   : > { %s3608_s5 = sand.u32 1, %s3448_s16  }
  0x3a   : > { %s5878_s7 = sshll.u32 %s3608_s5, 4  ;;  %s218_s11 = scalar_lea.sflag [#allocation4], %s3608_s5 }
  0x3b   : > { %s221_s12 = scalar_lea.vmem [#allocation3], %s5878_s7 }
  0x3c   : > { %3423 = dma.done.wait (%p3537_p4), %s218_s11, 256  }
  0x3d   : > { %3425 = vsyncadd (%p3537_p4), %s218_s11, 4294967040 }
  0x3e   : > { %3427 = dma.done.wait (%p44_p1), [#allocation9], 96  }
  0x3f   : > { %3429 = vsyncadd (%p44_p1), [#allocation9], 4294967200 }
  0x40   : > { %3431 = dma.done.wait (%p44_p1), [#allocation6], 32  }
  0x41   : > { %3433 = vsyncadd (%p44_p1), [#allocation6], 4294967264 }
  0x42   : > { %3435 = dma.done.wait (%p44_p1), [#allocation7], 16  }
  0x43   : > { %3437 = vsyncadd (%p44_p1), [#allocation7], 4294967280 }
  0x44   : > { %242 = sfence }
  0x45   : > { %v271_v0 = vld [vmem:[%s221_s12] sm:$0xff]  ;;  %s3465_s21 = smov 17   ;;  %vm305_vm0 = vcmask 1040384   ;;  %vm307_vm1 = vcmask 1041409   ;;  %s3466_s26 = smov 2   ;;  %v272_v11 = vld [vmem:[%s221_s12 + $0x8] sm:$0xff] }
  0x46   : > { %v297_v1 = vld [vmem:[#allocation8 + $0x4] sm:$0x3]  ;;  %275 = vrot.lane.b32.xlu0 %v271_v0, %s3465_s21  ;;  %v295_v4 = vld [vmem:[#allocation8] sm:$0x3]  ;;  %s3467_s6 = smov 32   ;;  %s3468_s8 = smov 16  }
  0x47   : > { %v414_v2 = vperm.slane %v297_v1, 0  ;;  %v415_v3 = vperm.slane %v297_v1, 1  ;;  %v303_v5 = vperm.slane %v295_v4, 1  ;;  %v302_v7 = vperm.slane %v295_v4, 0  ;;  %s3469_s9 = smov 18   ;;  %s3650_s10 = sld [smem:[#allocation10 + $0x49]] }
  0x48   : > { %vm265_vm2 = vcmask 134144   ;;  %vm268_vm3 = vcmask 273544   ;;  %v3470_v16 = vmov 0.0   ;;  %vm288_vm4 = vcmask 1043592   ;;  %s3029_s14 = sld [smem:[#allocation10 + $0x25]]  ;;  %s5892_s27 = smov 127  }
  0x49   : > { %v416_v6 = vrot.slane %v415_v3, 7  ;;  %v304_v8 = vrot.slane %v303_v5, 7  ;;  %266 = vst.msk [vmem:[#allocation2] sm:$0xf] %vm265_vm2, %v3470_v16  ;;  %vm289_vm5 = vcmask 1047556   ;;  %vm281_vm6 = vcmask 138240  }
  0x4a   : > { %267 = vst.msk [vmem:[#allocation2 + $0xc] sm:$0xf] %vm265_vm2, %v3470_v16  ;;  %vm3652_vm7 = vmor %vm289_vm5, %vm288_vm4  ;;  %s3028_s20 = sld [smem:[#allocation10 + $0x1]]  ;;  %s5883_s30 = smov 111   ;;  %vm426_vm8 = vcmask 15360   ;;  %vm512_vm9 = vcmask 130048  }
  0x4b   : > { %v3631_v9 = vsel %vm305_vm0, %v414_v2, %v416_v6  ;;  %v418_v10 = vsel %vm307_vm1, %v414_v2, %v416_v6  ;;  %v308_v13 = vsel %vm307_vm1, %v302_v7, %v304_v8  ;;  %v3640_v15 = vsel %vm305_vm0, %v302_v7, %v304_v8  ;;  %269 = vst.msk [vmem:[#allocation2 + $0x8] sm:$0xf] %vm268_vm3, %v3470_v16  ;;  %s3031_s28 = sld [smem:[#allocation10 + $0x6d]] }
  0x4c   : > { %420 = vrot.lane.b32.xlu1 %v3631_v9, %s3466_s26  ;;  %v3634_v12 = vrot.slane %v418_v10, 1  ;;  %v3637_v14 = vrot.slane %v308_v13, 1  ;;  %5954 = vst [vmem:[#allocation19_spill] sm:$0xff] %v3640_v15  ;;  %s3040_s29 = sld [smem:[#allocation10 + $0x4]]  ;;  %vm671_vm10 = vcmask 146432   ;;  %vm757_vm11 = vcmask 261120  }
  0x4d   : > { %270 = vst.msk [vmem:[#allocation2 + $0x14] sm:$0xf] %vm268_vm3, %v3470_v16  ;;  %v378_v23 = vstv %s3650_s10  ;;  %s3041_s25 = sld [smem:[#allocation10 + $0x28]]  ;;  %vm916_vm12 = vcmask 277504   ;;  %vm352_vm13 = vcmask 1039360   ;;  %vm604_vm14 = vcmask 908288  }
  0x4e   : > { %422 = vrot.lane.b32.xlu2 %v3634_v12, %s3466_s26  ;;  %277 = vrot.lane.b32.xlu0 %v272_v11, %s3465_s21  ;;  %5953 = vst [vmem:[#allocation18_spill] sm:$0xff] %v3637_v14  ;;  %v360_v24 = vstv %s3029_s14  ;;  %s3687_s11 = sld [smem:[#allocation10 + $0x70]]  ;;  %vm445_vm15 = vcmask 1031168   ;;  %vm531_vm0 = vcmask 916480   ;;  %vm690_vm1 = vcmask 900096  }
  0x4f   : > { %s3042_s12 = sld [smem:[#allocation10 + $0x4c]]  ;;  %vm849_vm3 = vcmask 777216   ;;  %vm935_vm4 = vcmask 769024  }
  0x50   : > { %v341_v25 = vstv %s3028_s20  ;;  %s3695_s21 = sld [smem:[#allocation10 + $0x2]] }
  0x51   : > { %v396_v32 = vstv %s3031_s28  ;;  %s3698_s26 = sld [smem:[#allocation10 + $0x26]]  ;;  %s5885_s28 = smov 112  }
  0x52   : > { %v593_v36 = vstv %s3040_s29  ;;  %s3727_s10 = sld [smem:[#allocation10 + $0x3]] }
  0x53   : > { %v612_v40 = vstv %s3041_s25  ;;  %s3737_s14 = sld [smem:[#allocation10 + $0x27]] }
  0x54   : > { %753 = vrot.lane.b32.xlu1 %v3637_v14, %s3467_s6  ;;  %v648_v46 = vstv %s3687_s11  ;;  %s3038_s20 = sld [smem:[#allocation10 + $0x4b]] }
  0x55   : > { %v630_v47 = vstv %s3042_s12  ;;  %s3750_s29 = sld [smem:[#allocation10 + $0x6f]] }
  0x56   : > { %506 = vrot.lane.b32.xlu2 %v3640_v15, %s3468_s8  ;;  %508 = vrot.lane.b32.xlu0 %v3637_v14, %s3468_s8  ;;  %v434_v55 = vstv %s3695_s21  ;;  %s5889_s8 = smov 126   ;;  %s3755_s25 = sld [smem:[#allocation10 + $0x29]] }
  0x57   : > { %v453_v56 = vstv %s3698_s26  ;;  %s3758_s11 = sld [smem:[#allocation10 + $0x5]]  ;;  %s5881_s21 = smov 110  }
  0x58   : > { %v520_v10 = vstv %s3727_s10  ;;  %s3046_s12 = sld [smem:[#allocation10 + $0x4d]]  ;;  %s5879_s10 = smov 96  }
  0x59   : > { %s3048_s26 = sld [smem:[#allocation10 + $0x6]] }
  0x5a   : > { %s4112_s7 = sld [smem:[#allocation10 + $0x9]] }
  0x5b   : > { %s4154_s0 = sld [smem:[#allocation10 + $0x7f]] }
  0x5e   : > { %665 = vrot.lane.b32.xlu2 %v3631_v9, %s3469_s9  ;;  %667 = vrot.lane.b32.xlu0 %v3634_v12, %s3469_s9  ;;  %s3724_s9 = sld [smem:[#allocation10 + $0x6e]] }
  0x64   : > { %v489_v8 = vstv %s3724_s9  ;;  %s3787_s9 = sld [smem:[#allocation10 + $0x4e]] }
  0x66   : > { %751 = vrot.lane.b32.xlu0 %v3640_v15, %s3467_s6  ;;  %s3713_s6 = sld [smem:[#allocation10 + $0x4a]] }
  0x6c   : > { %v471_v0 = vstv %s3713_s6  ;;  %s3776_s6 = sld [smem:[#allocation10 + $0x71]] }
  0xa8   : > { %v423_v52 = vpop.permute.xlu2 %422 }
  0xa9   : > { %v425_v54 = vrot.slane %v423_v52, 7 }
  0xab   : > { %v3716_v59 = vsel %vm426_vm8, %v425_v54, %v423_v52  ;;  %v765_v54 = vstv %s3048_s26  ;;  %s3055_s26 = sld [smem:[#allocation10 + $0x73]] }
  0xac   : > { %5958 = vst [vmem:[#allocation21_spill] sm:$0xff] %v3716_v59 }
  0xb0   : > { %v507_v5 = vpop.permute.xlu2 %506 }
  0xb1   : > { %v510_v7 = vrot.slane %v507_v5, 7 }
  0xb3   : > { %v3742_v16 = vsel %vm512_vm9, %v510_v7, %v507_v5 }
  0xb4   : > { %5960 = vst [vmem:[#allocation23_spill] sm:$0xff] %v3742_v16 }
  0xb8   : > { %v276_v17 = vpop.permute.xlu0 %275 }
  0xb9   : > { %v279_v19 = vrot.slane %v276_v17, 4 }
  0xbb   : > { %v282_v20 = vsel %vm281_vm6, %v279_v19, %v276_v17  ;;  %292 = vst.msk [vmem:[#allocation2 + $0x8] sm:$0xf] %vm265_vm2, %v279_v19  ;;  %v539_v19 = vstv %s3737_s14  ;;  %s3051_s14 = sld [smem:[#allocation10 + $0x72]] }
  0xbc   : > { %291 = vst.msk [vmem:[#allocation2] sm:$0xff] %vm3652_vm7, %v282_v20  ;;  %v557_v20 = vstv %s3038_s20  ;;  %s3049_s20 = sld [smem:[#allocation10 + $0x2a]] }
  0xbe   : > { %v421_v44 = vpop.permute.xlu1 %420 }
  0xbf   : > { %v424_v45 = vrot.slane %v421_v44, 7 }
  0xc0   : > { %v278_v21 = vpop.permute.xlu0 %277 }
  0xc1   : > { %v280_v22 = vrot.slane %v278_v21, 4  ;;  %v3703_v50 = vsel %vm426_vm8, %v424_v45, %v421_v44  ;;  %v716_v45 = vstv %s3046_s12  ;;  %s5899_s12 = smov 95  }
  0xc2   : > { %5957 = vst [vmem:[#allocation20_spill] sm:$0xff] %v3703_v50 }
  0xc3   : > { %v3661_v26 = vld [vmem:[#allocation2] ss:$4 sm:$0x7]  ;;  %v283_v27 = vsel %vm281_vm6, %v280_v22, %v278_v21  ;;  %294 = vst.msk [vmem:[#allocation2 + $0x14] sm:$0xf] %vm265_vm2, %v280_v22  ;;  %vm776_vm2 = vcmask 785408  }
  0xc4   : > { %v379_v28 = vmul.f32 %v378_v23, %v3661_v26  ;;  %v361_v29 = vmul.f32 %v360_v24, %v3661_v26  ;;  %v342_v30 = vmul.f32 %v341_v25, %v3661_v26  ;;  %293 = vst.msk [vmem:[#allocation2 + $0xc] sm:$0xff] %vm3652_vm7, %v283_v27  ;;  %v594_v37 = vmul.f32 %v593_v36, %v3661_v26 }
  0xc5   : > { %v397_v38 = vmul.f32 %v396_v32, %v3661_v26  ;;  %v613_v42 = vmul.f32 %v612_v40, %v3661_v26  ;;  %v649_v48 = vmul.f32 %v648_v46, %v3661_v26  ;;  %v631_v51 = vmul.f32 %v630_v47, %v3661_v26 }
  0xc6   : > { %383 = vrot.lane.b32.xlu0 %v379_v28, %s5892_s27  ;;  %365 = vrot.lane.b32.xlu2 %v361_v29, %s5892_s27  ;;  %v431_v53 = vmul.f32 %v3703_v50, %v3661_v26  ;;  %v517_v18 = vmul.f32 %v3742_v16, %v3661_v26  ;;  %v575_v29 = vstv %s3750_s29  ;;  %s3801_s29 = sld [smem:[#allocation10 + $0x2b]] }
  0xc7   : > { %346 = vrot.lane.b32.xlu1 %v342_v30, %s5892_s27 }
  0xc8   : > { %v435_v57 = vmul.f32 %v434_v55, %v431_v53  ;;  %v454_v58 = vmul.f32 %v453_v56, %v431_v53  ;;  %v509_v61 = vpop.permute.xlu0 %508  ;;  %v490_v11 = vmul.f32 %v489_v8, %v431_v53  ;;  %v472_v17 = vmul.f32 %v471_v0, %v431_v53 }
  0xc9   : > { %v511_v63 = vrot.slane %v509_v61, 7  ;;  %v540_v21 = vmul.f32 %v539_v19, %v517_v18  ;;  %v558_v22 = vmul.f32 %v557_v20, %v517_v18 }
  0xcb   : > { %v3673_v31 = vld [vmem:[#allocation2 + $0xc] ss:$4 sm:$0x7]  ;;  %v3730_v3 = vsel %vm512_vm9, %v511_v63, %v509_v61 }
  0xcc   : > { %v398_v33 = vmul.f32 %v396_v32, %v3673_v31  ;;  %v362_v34 = vmul.f32 %v360_v24, %v3673_v31  ;;  %v343_v35 = vmul.f32 %v341_v25, %v3673_v31  ;;  %v380_v39 = vmul.f32 %v378_v23, %v3673_v31  ;;  %5959 = vst [vmem:[#allocation22_spill] sm:$0xff] %v3730_v3  ;;  %v666_v24 = vpop.permute.xlu2 %665 }
  0xcd   : > { %v614_v41 = vmul.f32 %v612_v40, %v3673_v31  ;;  %v595_v43 = vmul.f32 %v593_v36, %v3673_v31  ;;  %v632_v49 = vmul.f32 %v630_v47, %v3673_v31  ;;  %v650_v60 = vmul.f32 %v648_v46, %v3673_v31 }
  0xce   : > { %403 = vrot.lane.b32.xlu0 %v398_v33, %s5892_s27  ;;  %367 = vrot.lane.b32.xlu2 %v362_v34, %s5892_s27  ;;  %v432_v62 = vmul.f32 %v3716_v59, %v3673_v31  ;;  %v518_v6 = vmul.f32 %v3730_v3, %v3673_v31  ;;  %v669_v27 = vrot.slane %v666_v24, 7 }
  0xcf   : > { %348 = vrot.lane.b32.xlu1 %v343_v35, %s5892_s27  ;;  %v521_v35 = vmul.f32 %v520_v10, %v517_v18 }
  0xd0   : > { %v455_v1 = vmul.f32 %v453_v56, %v432_v62  ;;  %v473_v2 = vmul.f32 %v471_v0, %v432_v62  ;;  %v436_v4 = vmul.f32 %v434_v55, %v432_v62  ;;  %v522_v13 = vmul.f32 %v520_v10, %v518_v6  ;;  %v668_v25 = vpop.permute.xlu0 %667 }
  0xd1   : > { %v491_v23 = vmul.f32 %v489_v8, %v432_v62  ;;  %v670_v28 = vrot.slane %v668_v25, 7  ;;  %v559_v30 = vmul.f32 %v557_v20, %v518_v6  ;;  %v577_v32 = vmul.f32 %v575_v29, %v518_v6 }
  0xd2   : > { %v3760_v33 = vsel %vm671_vm10, %v669_v27, %v666_v24  ;;  %v734_v55 = vstv %s3776_s6  ;;  %v802_v62 = vstv %s3787_s9  ;;  %s3478_s6 = smov 34   ;;  %s3910_s9 = sld [smem:[#allocation10 + $0x8]] }
  0xd3   : > { %5961 = vst [vmem:[#allocation24_spill] sm:$0xff] %v3760_v33  ;;  %v3762_v34 = vsel %vm671_vm10, %v670_v28, %v668_v25  ;;  %v676_v36 = vmul.f32 %v3760_v33, %v3661_v26 }
  0xd4   : > { %5962 = vst [vmem:[#allocation25_spill] sm:$0xff] %v3762_v34 }
  0xd5   : > { %v717_v47 = vmul.f32 %v716_v45, %v676_v36  ;;  %v735_v7 = vmul.f32 %v734_v55, %v676_v36 }
  0xd6   : > { %598 = vrot.lane.b32.xlu0 %v594_v37, %s5883_s30  ;;  %401 = vrot.lane.b32.xlu2 %v397_v38, %s5892_s27  ;;  %v677_v37 = vmul.f32 %v3762_v34, %v3673_v31  ;;  %v698_v38 = vstv %s3755_s25  ;;  %s3054_s25 = sld [smem:[#allocation10 + $0x4f]] }
  0xd7   : > { %385 = vrot.lane.b32.xlu1 %v380_v39, %s5892_s27  ;;  %v679_v39 = vstv %s3758_s11  ;;  %v699_v40 = vmul.f32 %v698_v38, %v676_v36  ;;  %s3052_s11 = sld [smem:[#allocation10 + $0x7]] }
  0xd8   : > { %v718_v46 = vmul.f32 %v716_v45, %v677_v37 }
  0xde   : > { %619 = vrot.lane.b32.xlu0 %v614_v41, %s5883_s30  ;;  %617 = vrot.lane.b32.xlu2 %v613_v42, %s5883_s30  ;;  %v681_v41 = vmul.f32 %v679_v39, %v677_v37  ;;  %v541_v42 = vmul.f32 %v539_v19, %v518_v6 }
  0xdf   : > { %600 = vrot.lane.b32.xlu1 %v595_v43, %s5883_s30  ;;  %v754_v43 = vpop.permute.xlu1 %753 }
  0xe0   : > { %v756_v44 = vrot.slane %v754_v43, 7 }
  0xe6   : > { %653 = vrot.lane.b32.xlu0 %v649_v48, %s5883_s30  ;;  %637 = vrot.lane.b32.xlu2 %v632_v49, %s5883_s30  ;;  %v3779_v48 = vsel %vm757_vm11, %v756_v44, %v754_v43  ;;  %v576_v49 = vmul.f32 %v575_v29, %v517_v18 }
  0xe7   : > { %635 = vrot.lane.b32.xlu1 %v631_v51, %s5883_s30  ;;  %5963 = vst [vmem:[#allocation26_spill] sm:$0xff] %v3779_v48  ;;  %v752_v51 = vpop.permute.xlu0 %751  ;;  %v763_v52 = vmul.f32 %v3779_v48, %v3673_v31 }
  0xe8   : > { %v755_v53 = vrot.slane %v752_v51, 7 }
  0xe9   : > { %v767_v56 = vmul.f32 %v765_v54, %v763_v52  ;;  %v804_v25 = vmul.f32 %v802_v62, %v763_v52 }
  0xee   : > { %439 = vrot.lane.b32.xlu0 %v435_v57, %s5889_s8  ;;  %458 = vrot.lane.b32.xlu2 %v454_v58, %s5889_s8  ;;  %v736_v57 = vmul.f32 %v734_v55, %v677_v37  ;;  %v3790_v58 = vsel %vm757_vm11, %v755_v53, %v752_v51 }
  0xef   : > { %655 = vrot.lane.b32.xlu1 %v650_v60, %s5883_s30  ;;  %5964 = vst [vmem:[#allocation27_spill] sm:$0xff] %v3790_v58  ;;  %v680_v60 = vmul.f32 %v679_v39, %v676_v36  ;;  %v762_v61 = vmul.f32 %v3790_v58, %v3661_v26  ;;  %v893_v36 = vstv %s3055_s26  ;;  %s3065_s26 = sld [smem:[#allocation10 + $0x2e]] }
  0xf1   : > { %v803_v63 = vmul.f32 %v802_v62, %v762_v61  ;;  %v766_v0 = vmul.f32 %v765_v54, %v762_v61 }
  0xf6   : > { %460 = vrot.lane.b32.xlu0 %v455_v1, %s5889_s8  ;;  %478 = vrot.lane.b32.xlu2 %v473_v2, %s5889_s8  ;;  %v700_v1 = vmul.f32 %v698_v38, %v677_v37  ;;  %v820_v2 = vstv %s3051_s14  ;;  %v895_v37 = vmul.f32 %v893_v36, %v3673_v31  ;;  %s3057_s14 = sld [smem:[#allocation10 + $0x2c]] }
  0xf7   : > { %441 = vrot.lane.b32.xlu1 %v436_v4, %s5889_s8  ;;  %v784_v4 = vstv %s3049_s20  ;;  %v822_v5 = vmul.f32 %v820_v2, %v763_v52  ;;  %s3479_s20 = smov 94  }
  0xf8   : > { %v786_v6 = vmul.f32 %v784_v4, %v763_v52  ;;  %v785_v18 = vmul.f32 %v784_v4, %v762_v61 }
  0xfe   : > { %494 = vrot.lane.b32.xlu0 %v490_v11, %s5889_s8  ;;  %527 = vrot.lane.b32.xlu2 %v522_v13, %s5885_s28  ;;  %v857_v11 = vstv %s3801_s29  ;;  %s3058_s29 = sld [smem:[#allocation10 + $0x50]] }
  0xff   : > { %476 = vrot.lane.b32.xlu1 %v472_v17, %s5889_s8  ;;  %v858_v13 = vmul.f32 %v857_v11, %v3661_v26  ;;  %v821_v17 = vmul.f32 %v820_v2, %v762_v61  ;;  %v859_v38 = vmul.f32 %v857_v11, %v3673_v31 }
 0x106   : > { %544 = vrot.lane.b32.xlu0 %v540_v21, %s5885_s28  ;;  %562 = vrot.lane.b32.xlu2 %v558_v22, %s5885_s28  ;;  %v875_v21 = vstv %s3054_s25  ;;  %v838_v22 = vstv %s3052_s11  ;;  %s3064_s25 = sld [smem:[#allocation10 + $0xa]] }
 0x107   : > { %496 = vrot.lane.b32.xlu1 %v491_v23, %s5889_s8  ;;  %v877_v23 = vmul.f32 %v875_v21, %v3673_v31  ;;  %v840_v24 = vmul.f32 %v838_v22, %v3673_v31  ;;  %v876_v29 = vmul.f32 %v875_v21, %v3661_v26  ;;  %s3059_s11 = sld [smem:[#allocation10 + $0x74]] }
 0x10e   : > { %564 = vrot.lane.b32.xlu0 %v559_v30, %s5885_s28  ;;  %582 = vrot.lane.b32.xlu2 %v577_v32, %s5885_s28  ;;  %v839_v30 = vmul.f32 %v838_v22, %v3661_v26 }
 0x10f   : > { %525 = vrot.lane.b32.xlu1 %v521_v35, %s5885_s28 }
 0x116   : > { %703 = vrot.lane.b32.xlu0 %v699_v40, %s5881_s21  ;;  %686 = vrot.lane.b32.xlu2 %v681_v41, %s5881_s21  ;;  %v894_v40 = vmul.f32 %v893_v36, %v3661_v26 }
 0x117   : > { %546 = vrot.lane.b32.xlu1 %v541_v42, %s5885_s28 }
 0x11e   : > { %723 = vrot.lane.b32.xlu0 %v718_v46, %s5881_s21  ;;  %721 = vrot.lane.b32.xlu2 %v717_v47, %s5881_s21 }
 0x11f   : > { %580 = vrot.lane.b32.xlu1 %v576_v49, %s5885_s28 }
 0x120   : > { %v3860_v47 = vpop.permute.xlu2 %365 }
 0x126   : > { %772 = vrot.lane.b32.xlu0 %v767_v56, %s5879_s10  ;;  %741 = vrot.lane.b32.xlu2 %v736_v57, %s5881_s21 }
 0x127   : > { %684 = vrot.lane.b32.xlu1 %v680_v60, %s5881_s21 }
 0x128   : > { %v3868_v53 = vpop.permute.xlu2 %367 }
 0x12e   : > { %807 = vrot.lane.b32.xlu0 %v803_v63, %s5879_s10  ;;  %770 = vrot.lane.b32.xlu2 %v766_v0, %s5879_s10 }
 0x12f   : > { %705 = vrot.lane.b32.xlu1 %v700_v1, %s5881_s21 }
 0x130   : > { %v3876_v56 = vpop.permute.xlu2 %401 }
 0x136   : > { %827 = vrot.lane.b32.xlu0 %v822_v5, %s5879_s10  ;;  %791 = vrot.lane.b32.xlu2 %v786_v6, %s5879_s10 }
 0x137   : > { %739 = vrot.lane.b32.xlu1 %v735_v7, %s5881_s21 }
 0x138   : > { %v3805_v8 = vpop.permute.xlu0 %383  ;;  %v3882_v61 = vpop.permute.xlu2 %617 }
 0x139   : > { %v3808_v10 = vpop.permute.xlu1 %346 }
 0x13e   : > { %862 = vrot.lane.b32.xlu0 %v858_v13, %s5899_s12  ;;  %825 = vrot.lane.b32.xlu2 %v821_v17, %s5879_s10 }
 0x13f   : > { %789 = vrot.lane.b32.xlu1 %v785_v18, %s5879_s10 }
 0x140   : > { %v3815_v19 = vpop.permute.xlu0 %403  ;;  %v3888_v0 = vpop.permute.xlu2 %637 }
 0x141   : > { %v3817_v20 = vpop.permute.xlu1 %348 }
 0x146   : > { %882 = vrot.lane.b32.xlu0 %v877_v23, %s5899_s12  ;;  %845 = vrot.lane.b32.xlu2 %v840_v24, %s5899_s12 }
 0x147   : > { %809 = vrot.lane.b32.xlu1 %v804_v25, %s5879_s10 }
 0x148   : > { %v3824_v27 = vpop.permute.xlu0 %598  ;;  %v3896_v5 = vpop.permute.xlu2 %458 }
 0x149   : > { %v3826_v28 = vpop.permute.xlu1 %385 }
 0x14e   : > { %910 = vrot.lane.b32.xlu0 %v3631_v9, %s3478_s6  ;;  %880 = vrot.lane.b32.xlu2 %v876_v29, %s5899_s12  ;;  %v924_v29 = vstv %s3910_s9  ;;  %s3066_s9 = sld [smem:[#allocation10 + $0x52]] }
 0x14f   : > { %843 = vrot.lane.b32.xlu1 %v839_v30, %s5899_s12  ;;  %v943_v30 = vstv %s3057_s14  ;;  %s3068_s14 = sld [smem:[#allocation10 + $0xb]] }
 0x150   : > { %v3833_v32 = vpop.permute.xlu0 %619  ;;  %v3904_v13 = vpop.permute.xlu2 %478 }
 0x151   : > { %v3835_v35 = vpop.permute.xlu1 %600 }
 0x156   : > { %900 = vrot.lane.b32.xlu2 %v895_v37, %s5899_s12 }
 0x157   : > { %864 = vrot.lane.b32.xlu1 %v859_v38, %s5899_s12 }
 0x158   : > { %v3841_v39 = vpop.permute.xlu0 %653  ;;  %v3912_v21 = vpop.permute.xlu2 %527 }
 0x159   : > { %v3843_v9 = vpop.permute.xlu1 %635 }
 0x15f   : > { %898 = vrot.lane.b32.xlu1 %v894_v40, %s5899_s12 }
 0x160   : > { %v3847_v41 = vpop.permute.xlu0 %439  ;;  %v3922_v40 = vpop.permute.xlu2 %562 }
 0x161   : > { %v3849_v42 = vpop.permute.xlu1 %655 }
 0x162   : > { %5965 = vst [vmem:[#allocation28_spill] sm:$0xff] %v3849_v42 }
 0x167   : > { %912 = vrot.lane.b32.xlu1 %v3634_v12, %s3478_s6  ;;  %s3067_s6 = sld [smem:[#allocation10 + $0x76]] }
 0x168   : > { %v3852_v43 = vpop.permute.xlu0 %460 }
 0x169   : > { %5966 = vst [vmem:[#allocation29_spill] sm:$0xff] %v3852_v43  ;;  %v3854_v44 = vpop.permute.xlu1 %441 }
 0x170   : > { %v3856_v45 = vpop.permute.xlu0 %494 }
 0x171   : > { %5967 = vst [vmem:[#allocation30_spill] sm:$0xff] %v3856_v45  ;;  %v3858_v46 = vpop.permute.xlu1 %476 }
 0x178   : > { %v3862_v49 = vpop.permute.xlu0 %544 }
 0x179   : > { %5968 = vst [vmem:[#allocation31_spill] sm:$0xff] %v3862_v49  ;;  %v3864_v51 = vpop.permute.xlu1 %496 }
 0x180   : > { %v3866_v52 = vpop.permute.xlu0 %564 }
 0x181   : > { %5969 = vst [vmem:[#allocation32_spill] sm:$0xff] %v3866_v52  ;;  %v3870_v54 = vpop.permute.xlu1 %525 }
 0x182   : > { %5970 = vst [vmem:[#allocation33_spill] sm:$0xff] %v3870_v54 }
 0x188   : > { %v3872_v12 = vpop.permute.xlu0 %703 }
 0x189   : > { %5971 = vst [vmem:[#allocation34_spill] sm:$0xff] %v3872_v12  ;;  %v3874_v55 = vpop.permute.xlu1 %546 }
 0x18a   : > { %5972 = vst [vmem:[#allocation35_spill] sm:$0xff] %v3874_v55 }
 0x190   : > { %v3878_v57 = vpop.permute.xlu0 %723 }
 0x191   : > { %5973 = vst [vmem:[#allocation36_spill] sm:$0xff] %v3878_v57  ;;  %v3880_v60 = vpop.permute.xlu1 %580 }
 0x192   : > { %5974 = vst [vmem:[#allocation37_spill] sm:$0xff] %v3880_v60 }
 0x198   : > { %v3884_v62 = vpop.permute.xlu0 %772 }
 0x199   : > { %5975 = vst [vmem:[#allocation38_spill] sm:$0xff] %v3884_v62  ;;  %v3886_v63 = vpop.permute.xlu1 %684 }
 0x19a   : > { %5976 = vst [vmem:[#allocation39_spill] sm:$0xff] %v3886_v63 }
 0x1a0   : > { %v3890_v1 = vpop.permute.xlu0 %807 }
 0x1a1   : > { %5977 = vst [vmem:[#allocation40_spill] sm:$0xff] %v3890_v1  ;;  %v3892_v2 = vpop.permute.xlu1 %705  ;;  %v1029_v1 = vstv %s3064_s25  ;;  %s3069_s25 = sld [smem:[#allocation10 + $0x2f]] }
 0x1a2   : > { %5978 = vst [vmem:[#allocation41_spill] sm:$0xff] %v3892_v2 }
 0x1a8   : > { %v3894_v4 = vpop.permute.xlu0 %827 }
 0x1a9   : > { %5979 = vst [vmem:[#allocation42_spill] sm:$0xff] %v3894_v4  ;;  %v3898_v6 = vpop.permute.xlu1 %739 }
 0x1aa   : > { %5980 = vst [vmem:[#allocation43_spill] sm:$0xff] %v3898_v6  ;;  %v979_v6 = vstv %s3059_s11  ;;  %s3071_s11 = sld [smem:[#allocation10 + $0x77]] }
 0x1b0   : > { %v3900_v7 = vpop.permute.xlu0 %862 }
 0x1b1   : > { %5981 = vst [vmem:[#allocation44_spill] sm:$0xff] %v3900_v7  ;;  %v3902_v11 = vpop.permute.xlu1 %789 }
 0x1b2   : > { %5982 = vst [vmem:[#allocation45_spill] sm:$0xff] %v3902_v11 }
 0x1b8   : > { %v3906_v17 = vpop.permute.xlu0 %882 }
 0x1b9   : > { %5983 = vst [vmem:[#allocation46_spill] sm:$0xff] %v3906_v17  ;;  %v3908_v18 = vpop.permute.xlu1 %809 }
 0x1ba   : > { %5984 = vst [vmem:[#allocation47_spill] sm:$0xff] %v3908_v18 }
 0x1c0   : > { %v911_v22 = vpop.permute.xlu0 %910 }
 0x1c1   : > { %v914_v23 = vrot.slane %v911_v22, 7  ;;  %v3914_v24 = vpop.permute.xlu1 %843 }
 0x1c2   : > { %5985 = vst [vmem:[#allocation48_spill] sm:$0xff] %v3914_v24  ;;  %v3928_v24 = vpop.permute.xlu2 %582 }
 0x1c3   : > { %v3917_v25 = vsel %vm916_vm12, %v914_v23, %v911_v22  ;;  %5988 = vst [vmem:[#allocation51_spill] sm:$0xff] %v3928_v24 }
 0x1c4   : > { %5986 = vst [vmem:[#allocation49_spill] sm:$0xff] %v3917_v25  ;;  %v921_v36 = vmul.f32 %v3917_v25, %v3661_v26 }
 0x1c6   : > { %v925_v37 = vmul.f32 %v924_v29, %v921_v36  ;;  %v944_v38 = vmul.f32 %v943_v30, %v921_v36 }
 0x1c8   : > { %929 = vrot.lane.b32.xlu2 %v925_v37, %s3479_s20  ;;  %948 = vrot.lane.b32.xlu1 %v944_v38, %s3479_s20  ;;  %v961_v38 = vstv %s3058_s29  ;;  %s3070_s29 = sld [smem:[#allocation10 + $0x53]] }
 0x1c9   : > { %v3926_v17 = vpop.permute.xlu1 %864  ;;  %v962_v62 = vmul.f32 %v961_v38, %v921_v36 }
 0x1ca   : > { %5987 = vst [vmem:[#allocation50_spill] sm:$0xff] %v3926_v17  ;;  %v3932_v7 = vpop.permute.xlu2 %686 }
 0x1cb   : > { %5990 = vst [vmem:[#allocation53_spill] sm:$0xff] %v3932_v7  ;;  %v1003_v7 = vstv %s4112_s7  ;;  %s4241_s7 = sld [smem:[#allocation10 + $0x39]] }
 0x1d1   : > { %v3930_v22 = vpop.permute.xlu1 %898  ;;  %v1813_v24 = vstv %s4241_s7  ;;  %s4926_s7 = sld [smem:[#allocation10 + $0x18]] }
 0x1d2   : > { %5989 = vst [vmem:[#allocation52_spill] sm:$0xff] %v3930_v22  ;;  %v3942_v22 = vld [vmem:[#allocation2 + $0x1] ss:$4 sm:$0x7] }
 0x1d9   : > { %v913_v23 = vpop.permute.xlu1 %912 }
 0x1da   : > { %v915_v18 = vrot.slane %v913_v23, 7 }
 0x1dc   : > { %v3935_v26 = vsel %vm916_vm12, %v915_v18, %v913_v23  ;;  %v3944_v18 = vpop.permute.xlu2 %721  ;;  %v1030_v23 = vmul.f32 %v1029_v1, %v3942_v22 }
 0x1dd   : > { %5991 = vst [vmem:[#allocation54_spill] sm:$0xff] %v3935_v26  ;;  %v922_v37 = vmul.f32 %v3935_v26, %v3673_v31  ;;  %v980_v31 = vmul.f32 %v979_v6, %v921_v36  ;;  %v1083_v36 = vstv %s3067_s6  ;;  %s3072_s6 = sld [smem:[#allocation10 + $0xc]] }
 0x1de   : > { %5992 = vst [vmem:[#allocation55_spill] sm:$0xff] %v3944_v18 }
 0x1df   : > { %v963_v11 = vmul.f32 %v961_v38, %v922_v37  ;;  %v945_v17 = vmul.f32 %v943_v30, %v922_v37  ;;  %v926_v4 = vmul.f32 %v924_v29, %v922_v37  ;;  %v981_v57 = vmul.f32 %v979_v6, %v922_v37 }
 0x1e0   : > { %v1084_v38 = vmul.f32 %v1083_v36, %v3942_v22 }
 0x1e1   : > { %968 = vrot.lane.b32.xlu1 %v963_v11, %s3479_s20  ;;  %950 = vrot.lane.b32.xlu2 %v945_v17, %s3479_s20  ;;  %v3950_v11 = vld [vmem:[#allocation2 + $0xd] ss:$4 sm:$0x7] }
 0x1e2   : > { %931 = vrot.lane.b32.xlu0 %v926_v4, %s3479_s20  ;;  %v1047_v4 = vstv %s3065_s26  ;;  %v1031_v30 = vmul.f32 %v1029_v1, %v3950_v11  ;;  %v1103_v1 = vstv %s3068_s14  ;;  %v1085_v37 = vmul.f32 %v1083_v36, %v3950_v11  ;;  %s3073_s26 = sld [smem:[#allocation10 + $0x30]] }
 0x1e3   : > { %v1049_v29 = vmul.f32 %v1047_v4, %v3950_v11  ;;  %s3076_s14 = sld [smem:[#allocation10 + $0xd]] }
 0x1e4   : > { %v3952_v17 = vpop.permute.xlu2 %741 }
 0x1e5   : > { %5993 = vst [vmem:[#allocation56_spill] sm:$0xff] %v3952_v17 }
 0x1e9   : > { %1034 = vrot.lane.b32.xlu1 %v1030_v23, %s5892_s27  ;;  %984 = vrot.lane.b32.xlu2 %v980_v31, %s3479_s20  ;;  %v1048_v31 = vmul.f32 %v1047_v4, %v3942_v22  ;;  %v1100_v4 = vmul.f32 %v3942_v22, %v3703_v50 }
 0x1ea   : > { %966 = vrot.lane.b32.xlu0 %v962_v62, %s3479_s20  ;;  %v1065_v62 = vstv %s3066_s9  ;;  %s3074_s9 = sld [smem:[#allocation10 + $0x54]] }
 0x1eb   : > { %v1066_v23 = vmul.f32 %v1065_v62, %v3942_v22  ;;  %v1104_v63 = vmul.f32 %v1103_v1, %v1100_v4 }
 0x1ec   : > { %v3962_v2 = vpop.permute.xlu2 %770 }
 0x1ed   : > { %5994 = vst [vmem:[#allocation57_spill] sm:$0xff] %v3962_v2 }
 0x1f1   : > { %1054 = vrot.lane.b32.xlu1 %v1049_v29, %s5892_s27  ;;  %1036 = vrot.lane.b32.xlu2 %v1031_v30, %s5892_s27  ;;  %v1067_v29 = vmul.f32 %v1065_v62, %v3950_v11  ;;  %v1157_v62 = vstv %s3071_s11  ;;  %s3079_s11 = sld [smem:[#allocation10 + $0x79]] }
 0x1f2   : > { %986 = vrot.lane.b32.xlu0 %v981_v57, %s3479_s20  ;;  %v1101_v57 = vmul.f32 %v3950_v11, %v3716_v59  ;;  %v1158_v12 = vmul.f32 %v1157_v62, %v1100_v4 }
 0x1f4   : > { %v1105_v6 = vmul.f32 %v1103_v1, %v1101_v57  ;;  %v3976_v30 = vpop.permute.xlu2 %791  ;;  %v1174_v1 = vmul.f32 %v3942_v22, %v3742_v16 }
 0x1f5   : > { %5995 = vst [vmem:[#allocation58_spill] sm:$0xff] %v3976_v30 }
 0x1f9   : > { %1088 = vrot.lane.b32.xlu1 %v1084_v38, %s5892_s27  ;;  %1070 = vrot.lane.b32.xlu2 %v1066_v23, %s5892_s27  ;;  %v1139_v38 = vstv %s3070_s29  ;;  %v1121_v23 = vstv %s3069_s25  ;;  %s3075_s29 = sld [smem:[#allocation10 + $0x78]] }
 0x1fa   : > { %1052 = vrot.lane.b32.xlu0 %v1048_v31, %s5892_s27  ;;  %v1140_v31 = vmul.f32 %v1139_v38, %v1100_v4  ;;  %v1122_v2 = vmul.f32 %v1121_v23, %v1100_v4  ;;  %v1249_v4 = vstv %s3076_s14  ;;  %s3077_s25 = sld [smem:[#allocation10 + $0x31]] }
 0x1fb   : > { %s3081_s14 = sld [smem:[#allocation10 + $0x32]] }
 0x1fc   : > { %v3981_v36 = vpop.permute.xlu2 %825 }
 0x1fd   : > { %5996 = vst [vmem:[#allocation59_spill] sm:$0xff] %v3981_v36 }
 0x201   : > { %1110 = vrot.lane.b32.xlu1 %v1105_v6, %s5889_s8  ;;  %1090 = vrot.lane.b32.xlu2 %v1085_v37, %s5892_s27  ;;  %v1159_v6 = vmul.f32 %v1157_v62, %v1101_v57  ;;  %v1141_v37 = vmul.f32 %v1139_v38, %v1101_v57  ;;  %v1213_v38 = vstv %s3074_s9  ;;  %s3082_s9 = sld [smem:[#allocation10 + $0x56]] }
 0x202   : > { %1072 = vrot.lane.b32.xlu0 %v1067_v29, %s5892_s27  ;;  %v1123_v29 = vmul.f32 %v1121_v23, %v1101_v57  ;;  %v1175_v57 = vmul.f32 %v3950_v11, %v3730_v3  ;;  %v1214_v62 = vmul.f32 %v1213_v38, %v1174_v1  ;;  %s4146_s27 = sld [smem:[#allocation10 + $0x5b]] }
 0x204   : > { %v1215_v23 = vmul.f32 %v1213_v38, %v1175_v57  ;;  %v1303_v38 = vstv %s3079_s11  ;;  %s3084_s11 = sld [smem:[#allocation10 + $0xf]] }
 0x209   : > { %1144 = vrot.lane.b32.xlu1 %v1140_v31, %s5889_s8  ;;  %1126 = vrot.lane.b32.xlu2 %v1122_v2, %s5889_s8  ;;  %v1195_v2 = vstv %s3073_s26  ;;  %v1177_v31 = vstv %s3072_s6  ;;  %s3078_s26 = sld [smem:[#allocation10 + $0x55]] }
 0x20a   : > { %1108 = vrot.lane.b32.xlu0 %v1104_v63, %s5889_s8  ;;  %v3988_v63 = vpop.permute.xlu2 %845  ;;  %v1196_v30 = vmul.f32 %v1195_v2, %v1174_v1  ;;  %v1178_v36 = vmul.f32 %v1177_v31, %v1174_v1  ;;  %s3080_s6 = sld [smem:[#allocation10 + $0xe]] }
 0x20b   : > { %5997 = vst [vmem:[#allocation60_spill] sm:$0xff] %v3988_v63 }
 0x211   : > { %1164 = vrot.lane.b32.xlu1 %v1159_v6, %s5889_s8  ;;  %1146 = vrot.lane.b32.xlu2 %v1141_v37, %s5889_s8  ;;  %v1197_v6 = vmul.f32 %v1195_v2, %v1175_v57  ;;  %v1179_v37 = vmul.f32 %v1177_v31, %v1175_v57  ;;  %v1267_v31 = vstv %s3077_s25  ;;  %s3085_s25 = sld [smem:[#allocation10 + $0x33]] }
 0x212   : > { %1128 = vrot.lane.b32.xlu0 %v1123_v29, %s5889_s8  ;;  %v3995_v29 = vpop.permute.xlu2 %880 }
 0x213   : > { %5998 = vst [vmem:[#allocation61_spill] sm:$0xff] %v3995_v29 }
 0x219   : > { %1200 = vrot.lane.b32.xlu1 %v1196_v30, %s5885_s28  ;;  %1182 = vrot.lane.b32.xlu2 %v1178_v36, %s5885_s28  ;;  %v1231_v30 = vstv %s3075_s29  ;;  %s3083_s29 = sld [smem:[#allocation10 + $0x7a]] }
 0x21a   : > { %1162 = vrot.lane.b32.xlu0 %v1158_v12, %s5889_s8  ;;  %v1250_v12 = vmul.f32 %v1249_v4, %v3942_v22  ;;  %v1232_v36 = vmul.f32 %v1231_v30, %v1174_v1  ;;  %v4004_v2 = vpop.permute.xlu2 %900  ;;  %s4143_s8 = sld [smem:[#allocation10 + $0x13]] }
 0x21b   : > { %5999 = vst [vmem:[#allocation62_spill] sm:$0xff] %v4004_v2  ;;  %v1268_v2 = vmul.f32 %v1267_v31, %v3942_v22 }
 0x221   : > { %1220 = vrot.lane.b32.xlu1 %v1215_v23, %s5885_s28  ;;  %1202 = vrot.lane.b32.xlu2 %v1197_v6, %s5885_s28  ;;  %v1269_v23 = vmul.f32 %v1267_v31, %v3950_v11  ;;  %v1251_v6 = vmul.f32 %v1249_v4, %v3950_v11 }
 0x222   : > { %1184 = vrot.lane.b32.xlu0 %v1179_v37, %s5885_s28  ;;  %v1233_v37 = vmul.f32 %v1231_v30, %v1175_v57  ;;  %v4011_v1 = vpop.permute.xlu2 %929  ;;  %v1321_v57 = vmul.f32 %v3950_v11, %v3762_v34  ;;  %v1323_v30 = vstv %s3080_s6  ;;  %s3088_s6 = sld [smem:[#allocation10 + $0x10]] }
 0x223   : > { %6000 = vst [vmem:[#allocation63_spill] sm:$0xff] %v4011_v1 }
 0x229   : > { %1254 = vrot.lane.b32.xlu1 %v1250_v12, %s5883_s30  ;;  %1236 = vrot.lane.b32.xlu2 %v1232_v36, %s5885_s28  ;;  %v1285_v12 = vstv %s3078_s26  ;;  %v1304_v36 = vmul.f32 %v1303_v38, %v3942_v22  ;;  %s3086_s26 = sld [smem:[#allocation10 + $0x57]] }
 0x22a   : > { %1218 = vrot.lane.b32.xlu0 %v1214_v62, %s5885_s28  ;;  %v1286_v62 = vmul.f32 %v1285_v12, %v3942_v22 }
 0x231   : > { %1274 = vrot.lane.b32.xlu1 %v1269_v23, %s5883_s30  ;;  %1256 = vrot.lane.b32.xlu2 %v1251_v6, %s5883_s30  ;;  %v1325_v23 = vmul.f32 %v1323_v30, %v1321_v57  ;;  %v1305_v6 = vmul.f32 %v1303_v38, %v3950_v11 }
 0x232   : > { %1238 = vrot.lane.b32.xlu0 %v1233_v37, %s5885_s28  ;;  %v1287_v37 = vmul.f32 %v1285_v12, %v3950_v11  ;;  %s4139_s28 = sld [smem:[#allocation10 + $0x37]] }
 0x239   : > { %1308 = vrot.lane.b32.xlu1 %v1304_v36, %s5883_s30  ;;  %1290 = vrot.lane.b32.xlu2 %v1286_v62, %s5883_s30  ;;  %v1359_v36 = vstv %s3082_s9  ;;  %v1341_v62 = vstv %s3081_s14  ;;  %s3087_s9 = sld [smem:[#allocation10 + $0x7b]] }
 0x23a   : > { %1272 = vrot.lane.b32.xlu0 %v1268_v2, %s5883_s30  ;;  %v1320_v2 = vmul.f32 %v3942_v22, %v3760_v33  ;;  %v4035_v38 = vpop.permute.xlu1 %948  ;;  %s4070_s14 = sld [smem:[#allocation10 + $0x34]] }
 0x23b   : > { %v4021_v4 = vpop.permute.xlu2 %950  ;;  %6003 = vst [vmem:[#allocation66_spill] sm:$0xff] %v4035_v38  ;;  %v1397_v38 = vstv %s3084_s11  ;;  %s4092_s11 = sld [smem:[#allocation10 + $0x24]] }
 0x23c   : > { %6001 = vst [vmem:[#allocation64_spill] sm:$0xff] %v4021_v4  ;;  %v1360_v4 = vmul.f32 %v1359_v36, %v1320_v2  ;;  %v1342_v1 = vmul.f32 %v1341_v62, %v1320_v2  ;;  %v1324_v29 = vmul.f32 %v1323_v30, %v1320_v2 }
 0x241   : > { %1330 = vrot.lane.b32.xlu1 %v1325_v23, %s5881_s21  ;;  %1310 = vrot.lane.b32.xlu2 %v1305_v6, %s5883_s30  ;;  %v1377_v23 = vstv %s3083_s29  ;;  %s4080_s29 = sld [smem:[#allocation10 + $0x7c]] }
 0x242   : > { %1292 = vrot.lane.b32.xlu0 %v1287_v37, %s5883_s30  ;;  %v1379_v6 = vmul.f32 %v1377_v23, %v1321_v57  ;;  %v1361_v37 = vmul.f32 %v1359_v36, %v1321_v57  ;;  %s4136_s30 = sld [smem:[#allocation10 + $0x2d]] }
 0x243   : > { %v4030_v31 = vpop.permute.xlu2 %984 }
 0x244   : > { %6002 = vst [vmem:[#allocation65_spill] sm:$0xff] %v4030_v31  ;;  %v1343_v31 = vmul.f32 %v1341_v62, %v1321_v57  ;;  %v1378_v62 = vmul.f32 %v1377_v23, %v1320_v2 }
 0x249   : > { %1364 = vrot.lane.b32.xlu1 %v1360_v4, %s5881_s21  ;;  %1346 = vrot.lane.b32.xlu2 %v1342_v1, %s5881_s21  ;;  %v1394_v1 = vmul.f32 %v3942_v22, %v3790_v58 }
 0x24a   : > { %1328 = vrot.lane.b32.xlu0 %v1324_v29, %s5881_s21 }
 0x24b   : > { %v4037_v12 = vpop.permute.xlu2 %1036  ;;  %v1398_v57 = vmul.f32 %v1397_v38, %v1394_v1 }
 0x24c   : > { %6004 = vst [vmem:[#allocation67_spill] sm:$0xff] %v4037_v12  ;;  %v1415_v12 = vstv %s3085_s25  ;;  %s4084_s25 = sld [smem:[#allocation10 + $0x58]] }
 0x24d   : > { %v1416_v36 = vmul.f32 %v1415_v12, %v1394_v1 }
 0x251   : > { %1384 = vrot.lane.b32.xlu1 %v1379_v6, %s5881_s21  ;;  %1366 = vrot.lane.b32.xlu2 %v1361_v37, %s5881_s21 }
 0x252   : > { %1348 = vrot.lane.b32.xlu0 %v1343_v31, %s5881_s21  ;;  %v1395_v31 = vmul.f32 %v3950_v11, %v3779_v48 }
 0x253   : > { %v4044_v29 = vpop.permute.xlu2 %1070  ;;  %v4046_v4 = vpop.permute.xlu1 %968 }
 0x254   : > { %6005 = vst [vmem:[#allocation68_spill] sm:$0xff] %v4044_v29  ;;  %v4048_v30 = vpop.permute.xlu0 %931  ;;  %v1433_v29 = vstv %s3086_s26  ;;  %v1417_v2 = vmul.f32 %v1415_v12, %v1395_v31  ;;  %v1399_v23 = vmul.f32 %v1397_v38, %v1395_v31  ;;  %s4098_s26 = sld [smem:[#allocation10 + $0x6c]] }
 0x255   : > { %6006 = vst [vmem:[#allocation69_spill] sm:$0xff] %v4046_v4  ;;  %v1435_v4 = vmul.f32 %v1433_v29, %v1395_v31 }
 0x256   : > { %6007 = vst [vmem:[#allocation70_spill] sm:$0xff] %v4048_v30 }
 0x259   : > { %1420 = vrot.lane.b32.xlu1 %v1416_v36, %s5879_s10  ;;  %1402 = vrot.lane.b32.xlu2 %v1398_v57, %s5879_s10 }
 0x25a   : > { %1382 = vrot.lane.b32.xlu0 %v1378_v62, %s5881_s21  ;;  %s4134_s21 = sld [smem:[#allocation10 + $0x35]] }
 0x25b   : > { %v4055_v6 = vpop.permute.xlu2 %1090  ;;  %v4057_v37 = vpop.permute.xlu1 %1034 }
 0x25c   : > { %6008 = vst [vmem:[#allocation71_spill] sm:$0xff] %v4055_v6  ;;  %v4059_v58 = vpop.permute.xlu0 %966  ;;  %v1469_v6 = vstv %s3088_s6  ;;  %s4104_s6 = sld [smem:[#allocation10 + $0x48]] }
 0x25d   : > { %6009 = vst [vmem:[#allocation72_spill] sm:$0xff] %v4057_v37  ;;  %v1451_v37 = vstv %s3087_s9  ;;  %v1470_v12 = vmul.f32 %v1469_v6, %v3942_v22  ;;  %s4106_s9 = sld [smem:[#allocation10 + $0x11]] }
 0x25e   : > { %6010 = vst [vmem:[#allocation73_spill] sm:$0xff] %v4059_v58  ;;  %v1452_v38 = vmul.f32 %v1451_v37, %v1394_v1  ;;  %v1434_v58 = vmul.f32 %v1433_v29, %v1394_v1  ;;  %v1471_v29 = vmul.f32 %v1469_v6, %v3950_v11 }
 0x261   : > { %1440 = vrot.lane.b32.xlu1 %v1435_v4, %s5879_s10  ;;  %1422 = vrot.lane.b32.xlu2 %v1417_v2, %s5879_s10 }
 0x262   : > { %1404 = vrot.lane.b32.xlu0 %v1399_v23, %s5879_s10 }
 0x263   : > { %v4064_v36 = vpop.permute.xlu2 %1126  ;;  %v4066_v57 = vpop.permute.xlu1 %1054 }
 0x264   : > { %6011 = vst [vmem:[#allocation74_spill] sm:$0xff] %v4064_v36  ;;  %v4068_v62 = vpop.permute.xlu0 %986  ;;  %v1487_v36 = vstv %s4070_s14  ;;  %s4108_s14 = sld [smem:[#allocation10]] }
 0x265   : > { %6012 = vst [vmem:[#allocation75_spill] sm:$0xff] %v4066_v57  ;;  %v1489_v1 = vmul.f32 %v1487_v36, %v3950_v11  ;;  %v1505_v57 = vstv %s4084_s25  ;;  %s4130_s25 = sld [smem:[#allocation10 + $0x59]] }
 0x266   : > { %6013 = vst [vmem:[#allocation76_spill] sm:$0xff] %v4068_v62  ;;  %v1506_v6 = vmul.f32 %v1505_v57, %v3942_v22  ;;  %v999_v62 = vld [vmem:[#allocation2 + $0xd] ss:$4 sm:$0x3] }
 0x267   : > { %v1001_v17 = vmul.f32 %v999_v62, %v3637_v14 }
 0x269   : > { %1474 = vrot.lane.b32.xlu1 %v1470_v12, %s5899_s12  ;;  %1456 = vrot.lane.b32.xlu2 %v1452_v38, %s5879_s10  ;;  %v1453_v12 = vmul.f32 %v1451_v37, %v1395_v31  ;;  %v1488_v37 = vmul.f32 %v1487_v36, %v3942_v22 }
 0x26a   : > { %1438 = vrot.lane.b32.xlu0 %v1434_v58, %s5879_s10  ;;  %v315_v30 = vstv %s4108_s14  ;;  %s4229_s14 = sld [smem:[#allocation10 + $0x5d]] }
 0x26b   : > { %v4076_v4 = vpop.permute.xlu2 %1146  ;;  %v4078_v2 = vpop.permute.xlu1 %1088 }
 0x26c   : > { %6014 = vst [vmem:[#allocation77_spill] sm:$0xff] %v4076_v4  ;;  %v4082_v23 = vpop.permute.xlu0 %1052 }
 0x26d   : > { %6015 = vst [vmem:[#allocation78_spill] sm:$0xff] %v4078_v2  ;;  %v1523_v2 = vstv %s4080_s29  ;;  %s4119_s29 = sld [smem:[#allocation10 + $0x75]] }
 0x26e   : > { %6016 = vst [vmem:[#allocation79_spill] sm:$0xff] %v4082_v23  ;;  %v1524_v31 = vmul.f32 %v1523_v2, %v3942_v22  ;;  %v997_v23 = vld [vmem:[#allocation2 + $0x1] ss:$4 sm:$0x3] }
 0x271   : > { %1494 = vrot.lane.b32.xlu1 %v1489_v1, %s5899_s12  ;;  %1476 = vrot.lane.b32.xlu2 %v1471_v29, %s5899_s12  ;;  %v4124_v1 = vmul.f32 %v3950_v11, %v3935_v26  ;;  %v1525_v26 = vmul.f32 %v1523_v2, %v3950_v11  ;;  %v4156_v2 = vld [vmem:[#allocation2 + $0x2] ss:$4 sm:$0x7] }
 0x272   : > { %1458 = vrot.lane.b32.xlu0 %v1453_v12, %s5879_s10  ;;  %s4115_s10 = sld [smem:[#allocation10 + $0x51]]  ;;  %v4178_v63 = vmul.f32 %v4156_v2, %v3703_v50 }
 0x273   : > { %v4094_v58 = vpop.permute.xlu2 %1182  ;;  %v4096_v38 = vpop.permute.xlu1 %1110 }
 0x274   : > { %6017 = vst [vmem:[#allocation80_spill] sm:$0xff] %v4094_v58  ;;  %v4100_v4 = vpop.permute.xlu0 %1072  ;;  %v4161_v58 = vmul.f32 %v3942_v22, %v3917_v25  ;;  %v4182_v22 = vmul.f32 %v4156_v2, %v3760_v33  ;;  %v4184_v25 = vld [vmem:[#allocation2 + $0xe] ss:$4 sm:$0x7] }
 0x275   : > { %6018 = vst [vmem:[#allocation81_spill] sm:$0xff] %v4096_v38  ;;  %v327_v38 = vstv %s4104_s6  ;;  %v4208_v18 = vmul.f32 %v4184_v25, %v3779_v48  ;;  %v4212_v52 = vmul.f32 %v4184_v25, %v3730_v3  ;;  %s4218_s6 = sld [smem:[#allocation10 + $0x15]]  ;;  %v4222_v62 = vmul.f32 %v4184_v25, %v3762_v34 }
 0x276   : > { %6019 = vst [vmem:[#allocation82_spill] sm:$0xff] %v4100_v4  ;;  %v1561_v4 = vstv %s4134_s21  ;;  %s4189_s21 = sld [smem:[#allocation10 + $0x7d]]  ;;  %v1009_v48 = vstv %s4136_s30  ;;  %v1647_v34 = vstv %s4143_s8 }
 0x277   : > { %v1562_v55 = vmul.f32 %v1561_v4, %v4161_v58  ;;  %6026 = vst [vmem:[#allocation89_spill] sm:$0xff] %v4208_v18  ;;  %v1665_v18 = vstv %s4139_s28  ;;  %s4253_s30 = sld [smem:[#allocation10 + $0x81]] }
 0x278   : > { %6027 = vst [vmem:[#allocation90_spill] sm:$0xff] %v4222_v62  ;;  %s4263_s8 = sld [smem:[#allocation10 + $0x3a]] }
 0x279   : > { %1528 = vrot.lane.b32.xlu1 %v1524_v31, %s5899_s12  ;;  %1510 = vrot.lane.b32.xlu2 %v1506_v6, %s5899_s12  ;;  %v1543_v31 = vstv %s4106_s9  ;;  %v298_v6 = vld [vmem:[#allocation2] ss:$4 sm:$0x3]  ;;  %s4150_s9 = sld [smem:[#allocation10 + $0x14]] }
 0x27a   : > { %1492 = vrot.lane.b32.xlu0 %v1488_v37, %s5899_s12  ;;  %v1545_v37 = vmul.f32 %v1543_v31, %v4124_v1  ;;  %v1544_v54 = vmul.f32 %v1543_v31, %v4161_v58  ;;  %v1021_v31 = vstv %s4119_s29  ;;  %s4270_s28 = sld [smem:[#allocation10 + $0x16]] }
 0x27b   : > { %v4126_v29 = vpop.permute.xlu2 %1202  ;;  %v4128_v12 = vpop.permute.xlu1 %1144  ;;  %s4282_s29 = sld [smem:[#allocation10 + $0x17]] }
 0x27c   : > { %6020 = vst [vmem:[#allocation83_spill] sm:$0xff] %v4126_v29  ;;  %v4132_v36 = vpop.permute.xlu0 %1108  ;;  %v1507_v29 = vmul.f32 %v1505_v57, %v3950_v11  ;;  %v300_v11 = vld [vmem:[#allocation2 + $0xc] ss:$4 sm:$0x3]  ;;  %v321_v57 = vstv %s4092_s11  ;;  %s4197_s11 = sld [smem:[#allocation10 + $0x80]] }
 0x27d   : > { %6021 = vst [vmem:[#allocation84_spill] sm:$0xff] %v4128_v12  ;;  %v312_v12 = vmul.f32 %v3640_v15, %v298_v6 }
 0x27e   : > { %6022 = vst [vmem:[#allocation85_spill] sm:$0xff] %v4132_v36  ;;  %v333_v36 = vstv %s4098_s26  ;;  %s4204_s26 = sld [smem:[#allocation10 + $0x5c]] }
 0x27f   : > { %v4193_v60 = vmul.f32 %v327_v38, %v312_v12  ;;  %v4199_v33 = vmul.f32 %v315_v30, %v312_v12 }
 0x281   : > { %1550 = vrot.lane.b32.xlu1 %v1545_v37, %s3479_s20  ;;  %1530 = vrot.lane.b32.xlu2 %v1525_v26, %s5899_s12 }
 0x282   : > { %1512 = vrot.lane.b32.xlu0 %v1507_v29, %s5899_s12  ;;  %v1579_v29 = vstv %s4130_s25  ;;  %s4173_s12 = sld [smem:[#allocation10 + $0x38]] }
 0x283   : > { %v4163_v37 = vpop.permute.xlu2 %1236  ;;  %v4165_v26 = vpop.permute.xlu1 %1164  ;;  %v1580_v50 = vmul.f32 %v1579_v29, %v4161_v58  ;;  %s4337_s25 = sld [smem:[#allocation10 + $0x5f]] }
 0x284   : > { %6023 = vst [vmem:[#allocation86_spill] sm:$0xff] %v4163_v37  ;;  %v4169_v6 = vpop.permute.xlu0 %1128  ;;  %v4186_v37 = vmul.f32 %v321_v57, %v312_v12 }
 0x285   : > { %6024 = vst [vmem:[#allocation87_spill] sm:$0xff] %v4165_v26  ;;  %v4191_v26 = vmul.f32 %v333_v36, %v312_v12  ;;  %v1015_v12 = vstv %s4115_s10  ;;  %s4276_s10 = sld [smem:[#allocation10 + $0x5e]] }
 0x286   : > { %6025 = vst [vmem:[#allocation88_spill] sm:$0xff] %v4169_v6  ;;  %v313_v6 = vmul.f32 %v3637_v14, %v300_v11  ;;  %v1000_v11 = vmul.f32 %v997_v23, %v3640_v15  ;;  %v4245_v15 = vmul.f32 %v1003_v7, %v1001_v17 }
 0x288   : > { %v4224_v23 = vmul.f32 %v321_v57, %v313_v6  ;;  %v4231_v3 = vmul.f32 %v333_v36, %v313_v6  ;;  %v4233_v14 = vmul.f32 %v315_v30, %v313_v6  ;;  %v4243_v57 = vmul.f32 %v327_v38, %v313_v6  ;;  %6030 = vst [vmem:[#allocation93_spill] sm:$0xff] %v4245_v15 }
 0x289   : > { %1584 = vrot.lane.b32.xlu1 %v1580_v50, %s3479_s20  ;;  %1566 = vrot.lane.b32.xlu2 %v1562_v55, %s3479_s20  ;;  %v4249_v36 = vmul.f32 %v1003_v7, %v1000_v11  ;;  %v4259_v38 = vmul.f32 %v1009_v48, %v1000_v11  ;;  %v4261_v6 = vmul.f32 %v1021_v31, %v1000_v11  ;;  %v1739_v15 = vstv %s4173_s12  ;;  %s4327_s12 = sld [smem:[#allocation10 + $0x83]] }
 0x28a   : > { %1548 = vrot.lane.b32.xlu0 %v1544_v54, %s3479_s20  ;;  %v4247_v54 = vmul.f32 %v1015_v12, %v1000_v11  ;;  %v4265_v7 = vmul.f32 %v1015_v12, %v1001_v17  ;;  %v1563_v11 = vmul.f32 %v1561_v4, %v4124_v1  ;;  %v1775_v12 = vstv %s4197_s11  ;;  %s6098_s11 = smov 112  }
 0x28b   : > { %v4235_v50 = vpop.permute.xlu2 %1256  ;;  %v4237_v55 = vpop.permute.xlu1 %1200  ;;  %6032 = vst [vmem:[#allocation95_spill] sm:$0xff] %v4249_v36  ;;  %v1648_v36 = vmul.f32 %v1647_v34, %v4156_v2  ;;  %v4299_v4 = vmul.f32 %v1647_v34, %v4184_v25 }
 0x28c   : > { %6028 = vst [vmem:[#allocation91_spill] sm:$0xff] %v4235_v50  ;;  %v4251_v30 = vpop.permute.xlu0 %1162  ;;  %v4255_v50 = vmul.f32 %v1021_v31, %v1001_v17  ;;  %v1757_v31 = vstv %s4204_s26  ;;  %s6140_s26 = smov 111  }
 0x28d   : > { %6029 = vst [vmem:[#allocation92_spill] sm:$0xff] %v4237_v55  ;;  %v4257_v55 = vmul.f32 %v1009_v48, %v1001_v17  ;;  %v1581_v48 = vmul.f32 %v1579_v29, %v4124_v1  ;;  %v1683_v17 = vstv %s4146_s27  ;;  %v4290_v29 = vmul.f32 %v1665_v18, %v4184_v25  ;;  %s4310_s27 = sld [smem:[#allocation10 + $0x3b]] }
 0x28e   : > { %6031 = vst [vmem:[#allocation94_spill] sm:$0xff] %v4247_v54  ;;  %v1597_v54 = vstv %s4189_s21  ;;  %v4317_v34 = vmul.f32 %v1683_v17, %v4156_v2  ;;  %v4323_v45 = vmul.f32 %v1757_v31, %v4178_v63  ;;  %s6065_s21 = smov 126  }
 0x28f   : > { %6033 = vst [vmem:[#allocation96_spill] sm:$0xff] %v4251_v30  ;;  %v1666_v30 = vmul.f32 %v1665_v18, %v4156_v2 }
 0x290   : > { %6034 = vst [vmem:[#allocation97_spill] sm:$0xff] %v4255_v50  ;;  %v1599_v50 = vmul.f32 %v1597_v54, %v4124_v1 }
 0x291   : > { %6035 = vst [vmem:[#allocation98_spill] sm:$0xff] %v4257_v55  ;;  %v1701_v55 = vstv %s4154_s0  ;;  %1586 = vrot.lane.b32.xlu2 %v1581_v48, %s3479_s20  ;;  %s4295_s0 = sld [smem:[#allocation10 + $0x82]] }
 0x292   : > { %6036 = vst [vmem:[#allocation99_spill] sm:$0xff] %v4259_v38  ;;  %v1721_v38 = vstv %s4150_s9  ;;  %1604 = vrot.lane.b32.xlu1 %v1599_v50, %s3479_s20  ;;  %1568 = vrot.lane.b32.xlu0 %v1563_v11, %s3479_s20  ;;  %v4305_v18 = vmul.f32 %v1701_v55, %v4156_v2  ;;  %v4308_v50 = vmul.f32 %v1701_v55, %v4184_v25  ;;  %s6051_s9 = smov 127  }
 0x293   : > { %6037 = vst [vmem:[#allocation100_spill] sm:$0xff] %v4261_v6  ;;  %v1719_v6 = vmul.f32 %v4184_v25, %v3716_v59  ;;  %v4302_v1 = vmul.f32 %v1721_v38, %v4178_v63  ;;  %v4312_v48 = vpop.permute.xlu2 %1290  ;;  %v4314_v11 = vpop.permute.xlu1 %1220  ;;  %v4320_v59 = vmul.f32 %v1775_v12, %v4178_v63  ;;  %v1792_v55 = vmul.f32 %v4156_v2, %v3742_v16 }
 0x294   : > { %6038 = vst [vmem:[#allocation101_spill] sm:$0xff] %v4265_v7  ;;  %v4287_v7 = vmul.f32 %v1683_v17, %v4184_v25  ;;  %v1795_v17 = vstv %s4218_s6  ;;  %v1885_v16 = vstv %s4263_s8  ;;  %s6159_s6 = smov 110   ;;  %s4992_s8 = sld [smem:[#allocation10 + $0x60]] }
 0x295   : > { %6039 = vst [vmem:[#allocation102_spill] sm:$0xff] %v4308_v50  ;;  %v1831_v50 = vstv %s4229_s14  ;;  %v4341_v49 = vmul.f32 %v1721_v38, %v1719_v6  ;;  %v4347_v43 = vmul.f32 %v1775_v12, %v1719_v6  ;;  %v4361_v38 = vmul.f32 %v1813_v24, %v4212_v52  ;;  %s4916_s14 = sld [smem:[#allocation10 + $0x12]] }
 0x296   : > { %6040 = vst [vmem:[#allocation103_spill] sm:$0xff] %v4312_v48  ;;  %v4329_v48 = vpop.permute.xlu0 %1184  ;;  %v4353_v42 = vmul.f32 %v1831_v50, %v1792_v55  ;;  %v1598_v12 = vmul.f32 %v1597_v54, %v4161_v58  ;;  %v1903_v58 = vstv %s4276_s10  ;;  %v4381_v54 = vmul.f32 %v1885_v16, %v4184_v25  ;;  %s6171_s10 = smov 96  }
 0x297   : > { %6041 = vst [vmem:[#allocation104_spill] sm:$0xff] %v4314_v11  ;;  %v4332_v11 = vmul.f32 %v1739_v15, %v4178_v63  ;;  %v1849_v63 = vstv %s4253_s30  ;;  %s4985_s30 = sld [smem:[#allocation10 + $0x36]] }
 0x298   : > { %6042 = vst [vmem:[#allocation105_spill] sm:$0xff] %v4317_v34  ;;  %v4355_v34 = vmul.f32 %v1813_v24, %v1792_v55  ;;  %v4377_v24 = vmul.f32 %v1849_v63, %v1792_v55 }
 0x299   : > { %6043 = vst [vmem:[#allocation106_spill] sm:$0xff] %v4320_v59  ;;  %v4339_v59 = vmul.f32 %v1739_v15, %v1719_v6  ;;  %v4358_v15 = vmul.f32 %v1831_v50, %v4212_v52  ;;  %1652 = vrot.lane.b32.xlu2 %v1648_v36, %s6051_s9  ;;  %v1921_v36 = vstv %s4295_s0  ;;  %s5033_s0 = sld [smem:[#allocation10 + $0x7e]] }
 0x29a   : > { %6044 = vst [vmem:[#allocation107_spill] sm:$0xff] %v4323_v45  ;;  %v4344_v45 = vmul.f32 %v1795_v17, %v4212_v52  ;;  %1670 = vrot.lane.b32.xlu1 %v1666_v30, %s6051_s9  ;;  %1602 = vrot.lane.b32.xlu0 %v1598_v12, %s3479_s20  ;;  %v405_v12 = vrot.slane %v3876_v56, 1 }
 0x29b   : > { %6045 = vst [vmem:[#allocation108_spill] sm:$0xff] %v4329_v48  ;;  %v4349_v48 = vmul.f32 %v1757_v31, %v1719_v6  ;;  %v4367_v6 = vmul.f32 %v1849_v63, %v4212_v52  ;;  %v4370_v31 = vmul.f32 %v1885_v16, %v4156_v2  ;;  %v4385_v52 = vmul.f32 %v1903_v58, %v4184_v25  ;;  %v4394_v63 = vpop.permute.xlu2 %1310 }
 0x29c   : > { %6046 = vst [vmem:[#allocation109_spill] sm:$0xff] %v4332_v11  ;;  %v1867_v11 = vstv %s4270_s28  ;;  %v1959_v16 = vstv %s4310_s27  ;;  %s4996_s28 = sld [smem:[#allocation10 + $0x3c]] }
 0x29d   : > { %6047 = vst [vmem:[#allocation110_spill] sm:$0xff] %v4347_v43  ;;  %v4364_v43 = vmul.f32 %v1795_v17, %v1792_v55  ;;  %v4375_v50 = vmul.f32 %v1867_v11, %v4156_v2  ;;  %v4388_v30 = vmul.f32 %v1867_v11, %v4184_v25  ;;  %v1941_v17 = vstv %s4282_s29  ;;  %s5027_s29 = sld [smem:[#allocation10 + $0x84]] }
 0x29e   : > { %6048 = vst [vmem:[#allocation111_spill] sm:$0xff] %v4358_v15  ;;  %v370_v55 = vrot.slane %v3868_v53, 1  ;;  %v387_v11 = vrot.slane %v3805_v8, 1  ;;  %v4419_v15 = vmul.f32 %v1941_v17, %v4222_v62  ;;  %s5051_s27 = sld [smem:[#allocation10 + $0x5a]] }
 0x29f   : > { %6049 = vst [vmem:[#allocation112_spill] sm:$0xff] %v4361_v38  ;;  %v4407_v38 = vmul.f32 %v1941_v17, %v4182_v22 }
 0x2a0   : > { %6050 = vst [vmem:[#allocation113_spill] sm:$0xff] %v4370_v31  ;;  %v369_v31 = vrot.slane %v3860_v47, 1 }
 0x2a1   : > { %6052 = vst [vmem:[#allocation114_spill] sm:$0xff] %v4375_v50  ;;  %v350_v50 = vrot.slane %v3808_v10, 1  ;;  %1672 = vrot.lane.b32.xlu2 %v4290_v29, %s6051_s9  ;;  %v481_v29 = vrot.slane %v3904_v13, 1 }
 0x2a2   : > { %6053 = vst [vmem:[#allocation115_spill] sm:$0xff] %v4377_v24  ;;  %v4396_v24 = vpop.permute.xlu1 %1254  ;;  %1690 = vrot.lane.b32.xlu1 %v4287_v7, %s6051_s9  ;;  %1654 = vrot.lane.b32.xlu0 %v4299_v4, %s6051_s9  ;;  %v444_v4 = vrot.slane %v3854_v44, 1 }
 0x2a3   : > { %6054 = vst [vmem:[#allocation116_spill] sm:$0xff] %v4381_v54  ;;  %v4413_v54 = vmul.f32 %v1903_v58, %v4156_v2 }
 0x2a4   : > { %6055 = vst [vmem:[#allocation117_spill] sm:$0xff] %v4385_v52  ;;  %v4425_v52 = vmul.f32 %v1959_v16, %v4182_v22 }
 0x2a5   : > { %6056 = vst [vmem:[#allocation118_spill] sm:$0xff] %v4388_v30  ;;  %v4402_v30 = vpop.permute.xlu0 %1218 }
 0x2a6   : > { %6057 = vst [vmem:[#allocation119_spill] sm:$0xff] %v4394_v63  ;;  %v4410_v63 = vmul.f32 %v1921_v36, %v4156_v2  ;;  %v6063_v2 = vstv %s4327_s12 }
 0x2a7   : > { %6058 = vst [vmem:[#allocation120_spill] sm:$0xff] %v4396_v24  ;;  %v4416_v24 = vmul.f32 %v1959_v16, %v4222_v62  ;;  %v4434_v58 = vmul.f32 %v6063_v2, %v4182_v22  ;;  %v406_v16 = vrot.slane %v3815_v19, 1  ;;  %v480_v2 = vrot.slane %v3858_v46, 1 }
 0x2a8   : > { %6059 = vst [vmem:[#allocation121_spill] sm:$0xff] %v4402_v30  ;;  %v4422_v30 = vmul.f32 %v1921_v36, %v4184_v25  ;;  %v407_v25 = vsel %vm352_vm13, %v3876_v56, %v405_v12  ;;  %v389_v36 = vsel %vm352_vm13, %v3805_v8, %v387_v11  ;;  %v462_v56 = vrot.slane %v3896_v5, 1 }
 0x2a9   : > { %6060 = vst [vmem:[#allocation122_spill] sm:$0xff] %v4407_v38  ;;  %v371_v38 = vsel %vm352_vm13, %v3860_v47, %v369_v31  ;;  %v351_v47 = vrot.slane %v3817_v20, 1  ;;  %v353_v31 = vsel %vm352_vm13, %v3808_v10, %v350_v50  ;;  %v4464_v50 = vadd.f32 %v407_v25, %v4191_v26  ;;  %1706 = vrot.lane.b32.xlu2 %v4305_v18, %s6051_s9 }
 0x2aa   : > { %6061 = vst [vmem:[#allocation123_spill] sm:$0xff] %v4410_v63  ;;  %v372_v63 = vsel %vm352_vm13, %v3868_v53, %v370_v55  ;;  %v621_v53 = vrot.slane %v3882_v61, 1  ;;  %v640_v55 = vrot.slane %v3888_v0, 1  ;;  %v375_v8 = vadd.f32 %v371_v38, %v4186_v37  ;;  %v4470_v37 = vpop.permute.xlu1 %1274  ;;  %1726 = vrot.lane.b32.xlu1 %v4302_v1, %s6065_s21 }
 0x2ab   : > { %6062 = vst [vmem:[#allocation124_spill] sm:$0xff] %v4416_v24  ;;  %v6064_v24 = vstv %s4337_s25  ;;  %v4461_v10 = vadd.f32 %v372_v63, %v4224_v23  ;;  %v393_v7 = vadd.f32 %v389_v36, %v4193_v60  ;;  %v357_v38 = vadd.f32 %v353_v31, %v4199_v33 }
 0x2ac   : > { %v4439_v17 = vmul.f32 %v6064_v24, %v4182_v22  ;;  %v388_v22 = vrot.slane %v3826_v28, 1  ;;  %v4468_v24 = vpop.permute.xlu2 %1346  ;;  %v408_v12 = vsel %vm352_vm13, %v3815_v19, %v406_v16  ;;  %v354_v23 = vsel %vm352_vm13, %v3817_v20, %v351_v47 }
 0x2ad   : > { %v4478_v26 = vpop.permute.xlu0 %1238  ;;  %v4482_v60 = vsel %vm604_vm14, %v3882_v61, %v621_v53  ;;  %v4486_v63 = vsel %vm604_vm14, %v3888_v0, %v640_v55  ;;  %v602_v33 = vrot.slane %v3824_v27, 1  ;;  %v464_v19 = vsel %vm445_vm15, %v3896_v5, %v462_v56 }
 0x2ae   : > { %v390_v20 = vsel %vm352_vm13, %v3826_v28, %v388_v22  ;;  %v622_v11 = vrot.slane %v3833_v32, 1  ;;  %v412_v61 = vadd.f32 %v408_v12, %v4231_v3  ;;  %v358_v25 = vadd.f32 %v354_v23, %v4233_v14 }
 0x2af   : > { %v483_v0 = vsel %vm445_vm15, %v3904_v13, %v481_v29  ;;  %v603_v36 = vrot.slane %v3835_v35, 1  ;;  %v657_v16 = vrot.slane %v3841_v39, 1  ;;  %v530_v5 = vrot.slane %v3912_v21, 1  ;;  %v6067_v29 = vld [vmem:[#allocation28_spill] sm:$0xff] }
 0x2b0   : > { %v447_v28 = vsel %vm445_vm15, %v3854_v44, %v444_v4  ;;  %v499_v47 = vrot.slane %v3864_v51, 1  ;;  %v4507_v53 = vsel %vm604_vm14, %v3824_v27, %v602_v33  ;;  %v468_v3 = vadd.f32 %v464_v19, %v375_v8  ;;  %v6068_v33 = vld [vmem:[#allocation29_spill] sm:$0xff] }
 0x2b1   : > { %v394_v14 = vadd.f32 %v390_v20, %v4243_v57  ;;  %v443_v13 = vrot.slane %v3847_v41, 1  ;;  %v4517_v44 = vsel %vm604_vm14, %v3833_v32, %v622_v11  ;;  %v639_v31 = vrot.slane %v3843_v9, 1  ;;  %v6066_v57 = vld [vmem:[#allocation105_spill] sm:$0xff]  ;;  %v6069_v11 = vld [vmem:[#allocation31_spill] sm:$0xff]  ;;  %1728 = vrot.lane.b32.xlu2 %v4341_v49, %s6065_s21 }
 0x2b2   : > { %v566_v27 = vrot.slane %v3922_v40, 1  ;;  %v482_v55 = vsel %vm445_vm15, %v3858_v46, %v480_v2  ;;  %1688 = vrot.lane.b32.xlu0 %v6066_v57, %s6051_s9  ;;  %v606_v1 = vsel %vm604_vm14, %v3835_v35, %v603_v36  ;;  %v451_v56 = vadd.f32 %v447_v28, %v358_v25  ;;  %v4529_v32 = vpop.permute.xlu1 %1308  ;;  %v6070_v25 = vld [vmem:[#allocation51_spill] sm:$0xff]  ;;  %v6071_v36 = vld [vmem:[#allocation30_spill] sm:$0xff]  ;;  %1746 = vrot.lane.b32.xlu1 %v4339_v59, %s6065_s21 }
 0x2b3   : > { %v487_v8 = vadd.f32 %v483_v0, %v394_v14  ;;  %v4533_v22 = vsel %vm604_vm14, %v3841_v39, %v657_v16  ;;  %v533_v46 = vsel %vm531_vm0, %v3912_v21, %v530_v5  ;;  %v658_v12 = vrot.slane %v6067_v29, 1  ;;  %v6072_v5 = vld [vmem:[#allocation53_spill] sm:$0xff] }
 0x2b4   : > { %v4527_v18 = vpop.permute.xlu2 %1366  ;;  %v501_v23 = vsel %vm445_vm15, %v3864_v51, %v499_v47  ;;  %v446_v35 = vsel %vm445_vm15, %v3847_v41, %v443_v13  ;;  %v463_v19 = vrot.slane %v6068_v33, 1  ;;  %v486_v20 = vadd.f32 %v482_v55, %v393_v7  ;;  %v6073_v41 = vld [vmem:[#allocation32_spill] sm:$0xff]  ;;  %v6074_v55 = vld [vmem:[#allocation55_spill] sm:$0xff] }
 0x2b5   : > { %v4540_v4 = vpop.permute.xlu0 %1272  ;;  %v548_v2 = vrot.slane %v6069_v11, 1  ;;  %v641_v39 = vsel %vm604_vm14, %v3843_v9, %v639_v31  ;;  %v568_v21 = vsel %vm531_vm0, %v3922_v40, %v566_v27  ;;  %v585_v0 = vrot.slane %v6070_v25, 1  ;;  %v6075_v9 = vld [vmem:[#allocation33_spill] sm:$0xff] }
 0x2b6   : > { %v498_v51 = vrot.slane %v6071_v36, 1  ;;  %v537_v16 = vadd.f32 %v533_v46, %v451_v56  ;;  %v689_v28 = vrot.slane %v6072_v5, 1  ;;  %v505_v47 = vadd.f32 %v501_v23, %v412_v61  ;;  %v6076_v46 = vld [vmem:[#allocation56_spill] sm:$0xff] }
 0x2b7   : > { %v567_v14 = vrot.slane %v6073_v41, 1  ;;  %v450_v13 = vadd.f32 %v446_v35, %v357_v38  ;;  %v660_v7 = vsel %vm604_vm14, %v6067_v29, %v658_v12  ;;  %v725_v57 = vrot.slane %v6074_v55, 1  ;;  %v6077_v12 = vld [vmem:[#allocation35_spill] sm:$0xff]  ;;  %v6078_v35 = vld [vmem:[#allocation102_spill] sm:$0xff] }
 0x2b8   : > { %v529_v31 = vrot.slane %v6075_v9, 1  ;;  %v465_v40 = vsel %vm445_vm15, %v6068_v33, %v463_v19  ;;  %v572_v27 = vadd.f32 %v568_v21, %v486_v20  ;;  %v550_v56 = vsel %vm531_vm0, %v6069_v11, %v548_v2 }
 0x2b9   : > { %v587_v38 = vsel %vm531_vm0, %v6070_v25, %v585_v0  ;;  %v500_v61 = vsel %vm445_vm15, %v6071_v36, %v498_v51  ;;  %v744_v29 = vrot.slane %v6076_v46, 1  ;;  %v549_v23 = vrot.slane %v6077_v12, 1  ;;  %v6079_v0 = vld [vmem:[#allocation37_spill] sm:$0xff] }
 0x2ba   : > { %1708 = vrot.lane.b32.xlu0 %v6078_v35, %s6051_s9  ;;  %v610_v33 = vadd.f32 %v606_v1, %v537_v16  ;;  %v692_v59 = vsel %vm690_vm1, %v6072_v5, %v689_v28  ;;  %v591_v19 = vadd.f32 %v587_v38, %v505_v47  ;;  %v569_v49 = vsel %vm531_vm0, %v6073_v41, %v567_v14  ;;  %v4580_v11 = vpop.permute.xlu1 %1330  ;;  %v6083_v38 = vld [vmem:[#allocation57_spill] sm:$0xff] }
 0x2bb   : > { %v554_v2 = vadd.f32 %v550_v56, %v468_v3  ;;  %v727_v21 = vsel %vm690_vm1, %v6074_v55, %v725_v57  ;;  %v532_v25 = vsel %vm531_vm0, %v6075_v9, %v529_v31  ;;  %v584_v1 = vrot.slane %v6079_v0, 1  ;;  %v6080_v9 = vld [vmem:[#allocation34_spill] sm:$0xff] }
 0x2bc   : > { %v4578_v20 = vpop.permute.xlu2 %1402  ;;  %v469_v51 = vadd.f32 %v465_v40, %v4461_v10  ;;  %v504_v16 = vadd.f32 %v500_v61, %v4464_v50  ;;  %v645_v5 = vadd.f32 %v641_v39, %v572_v27  ;;  %v696_v28 = vadd.f32 %v692_v59, %v610_v33  ;;  %v6081_v50 = vld [vmem:[#allocation39_spill] sm:$0xff]  ;;  %v6082_v40 = vld [vmem:[#allocation41_spill] sm:$0xff] }
 0x2bd   : > { %v4587_v36 = vpop.permute.xlu0 %1292  ;;  %v573_v47 = vadd.f32 %v569_v49, %v487_v8  ;;  %v746_v3 = vsel %vm690_vm1, %v6076_v46, %v744_v29  ;;  %v551_v41 = vsel %vm531_vm0, %v6077_v12, %v549_v23  ;;  %v664_v55 = vadd.f32 %v660_v7, %v591_v19  ;;  %v6084_v29 = vld [vmem:[#allocation36_spill] sm:$0xff]  ;;  %v6086_v7 = vld [vmem:[#allocation107_spill] sm:$0xff]  ;;  %v6087_v23 = vld [vmem:[#allocation38_spill] sm:$0xff] }
 0x2be   : > { %v731_v14 = vadd.f32 %v727_v21, %v645_v5  ;;  %v536_v57 = vadd.f32 %v532_v25, %v450_v13  ;;  %v707_v31 = vrot.slane %v6080_v9, 1  ;;  %v627_v56 = vadd.f32 %v4482_v60, %v554_v2  ;;  %v6085_v13 = vld [vmem:[#allocation106_spill] sm:$0xff]  ;;  %1762 = vrot.lane.b32.xlu2 %v6086_v7, %s6065_s21  ;;  %v6088_v33 = vld [vmem:[#allocation43_spill] sm:$0xff]  ;;  %v6089_v19 = vld [vmem:[#allocation109_spill] sm:$0xff] }
 0x2bf   : > { %v586_v10 = vsel %vm531_vm0, %v6079_v0, %v584_v1  ;;  %v688_v39 = vrot.slane %v6081_v50, 1  ;;  %v708_v8 = vrot.slane %v6082_v40, 1  ;;  %v4601_v27 = vadd.f32 %v746_v3, %v664_v55  ;;  %1780 = vrot.lane.b32.xlu1 %v6085_v13, %s6065_s21  ;;  %v6090_v25 = vld [vmem:[#allocation40_spill] sm:$0xff] }
 0x2c0   : > { %v774_v61 = vrot.slane %v6083_v38, 1  ;;  %v555_v46 = vadd.f32 %v551_v41, %v469_v51  ;;  %v726_v12 = vrot.slane %v6084_v29, 1  ;;  %v646_v60 = vadd.f32 %v4486_v63, %v573_v47  ;;  %v6092_v63 = vld [vmem:[#allocation58_spill] sm:$0xff]  ;;  %v6093_v3 = vld [vmem:[#allocation60_spill] sm:$0xff] }
 0x2c1   : > { %v775_v35 = vrot.slane %v6087_v23, 1  ;;  %v743_v59 = vrot.slane %v6088_v33, 1  ;;  %v709_v49 = vsel %vm690_vm1, %v6080_v9, %v707_v31  ;;  %v590_v2 = vadd.f32 %v586_v10, %v504_v16  ;;  %v6094_v31 = vld [vmem:[#allocation61_spill] sm:$0xff] }
 0x2c2   : > { %1744 = vrot.lane.b32.xlu0 %v6089_v19, %s6065_s21  ;;  %v609_v21 = vadd.f32 %v4507_v53, %v536_v57  ;;  %v811_v0 = vrot.slane %v6090_v25, 1  ;;  %v4620_v51 = vpop.permute.xlu1 %1364  ;;  %v794_v5 = vrot.slane %v6092_v63, 1  ;;  %v691_v47 = vsel %vm690_vm1, %v6081_v50, %v688_v39  ;;  %v6095_v39 = vld [vmem:[#allocation59_spill] sm:$0xff]  ;;  %v6097_v19 = vld [vmem:[#allocation45_spill] sm:$0xff] }
 0x2c3   : > { %v848_v41 = vrot.slane %v6093_v3, 1  ;;  %v710_v55 = vsel %vm690_vm1, %v6082_v40, %v708_v8  ;;  %v777_v53 = vsel %vm776_vm2, %v6083_v38, %v774_v61  ;;  %v728_v16 = vsel %vm690_vm1, %v6084_v29, %v726_v12 }
 0x2c4   : > { %v4618_v1 = vpop.permute.xlu2 %1422  ;;  %v628_v57 = vadd.f32 %v4517_v44, %v555_v46  ;;  %v884_v10 = vrot.slane %v6094_v31, 1  ;;  %v713_v13 = vadd.f32 %v709_v49, %v627_v56  ;;  %v778_v50 = vsel %vm776_vm2, %v6087_v23, %v775_v35  ;;  %v6096_v46 = vld [vmem:[#allocation42_spill] sm:$0xff] }
 0x2c5   : > { %6091 = vst [vmem:[#allocation105_spill] sm:$0xff] %v4618_v1  ;;  %v4628_v9 = vpop.permute.xlu0 %1328  ;;  %v829_v7 = vrot.slane %v6095_v39, 1  ;;  %v745_v40 = vsel %vm690_vm1, %v6088_v33, %v743_v59  ;;  %v695_v8 = vadd.f32 %v691_v47, %v609_v21  ;;  %v813_v38 = vsel %vm776_vm2, %v6090_v25, %v811_v0  ;;  %v6100_v21 = vld [vmem:[#allocation44_spill] sm:$0xff]  ;;  %v6101_v0 = vld [vmem:[#allocation47_spill] sm:$0xff] }
 0x2c6   : > { %v714_v61 = vadd.f32 %v710_v55, %v628_v57  ;;  %v663_v29 = vadd.f32 %v4533_v22, %v590_v2  ;;  %v732_v12 = vadd.f32 %v728_v16, %v646_v60  ;;  %v796_v44 = vsel %vm776_vm2, %v6092_v63, %v794_v5  ;;  %v6099_v22 = vld [vmem:[#allocation110_spill] sm:$0xff]  ;;  %v6102_v47 = vld [vmem:[#allocation48_spill] sm:$0xff] }
 0x2c7   : > { %v851_v56 = vsel %vm849_vm3, %v6093_v3, %v848_v41  ;;  %v830_v23 = vrot.slane %v6096_v46, 1  ;;  %v782_v35 = vadd.f32 %v778_v50, %v696_v28  ;;  %v886_v33 = vsel %vm849_vm3, %v6094_v31, %v884_v10  ;;  %1802 = vrot.lane.b32.xlu1 %v4344_v45, %s6098_s11  ;;  %1782 = vrot.lane.b32.xlu2 %v6099_v22, %s6065_s21  ;;  %v6103_v57 = vld [vmem:[#allocation62_spill] sm:$0xff] }
 0x2c8   : > { %v749_v59 = vadd.f32 %v745_v40, %v663_v29  ;;  %v793_v49 = vrot.slane %v6097_v19, 1  ;;  %v831_v60 = vsel %vm776_vm2, %v6095_v39, %v829_v7  ;;  %v817_v2 = vadd.f32 %v813_v38, %v731_v14  ;;  %v6104_v10 = vld [vmem:[#allocation50_spill] sm:$0xff]  ;;  %v6105_v7 = vld [vmem:[#allocation52_spill] sm:$0xff] }
 0x2c9   : > { %v866_v25 = vrot.slane %v6100_v21, 1  ;;  %v812_v28 = vrot.slane %v6101_v0, 1  ;;  %v855_v63 = vadd.f32 %v851_v56, %v782_v35  ;;  %v781_v5 = vadd.f32 %v777_v53, %v695_v8  ;;  %v6106_v8 = vld [vmem:[#allocation70_spill] sm:$0xff] }
 0x2ca   : > { %1764 = vrot.lane.b32.xlu0 %v4349_v48, %s6065_s21  ;;  %v847_v3 = vrot.slane %v6102_v47, 1  ;;  %v800_v41 = vadd.f32 %v796_v44, %v714_v61  ;;  %v4665_v55 = vpop.permute.xlu1 %1384  ;;  %v832_v16 = vsel %vm776_vm2, %v6096_v46, %v830_v23  ;;  %v890_v14 = vadd.f32 %v886_v33, %v817_v2  ;;  %v6107_v44 = vld [vmem:[#allocation63_spill] sm:$0xff]  ;;  %v6108_v46 = vld [vmem:[#allocation64_spill] sm:$0xff]  ;;  %v6109_v33 = vld [vmem:[#allocation66_spill] sm:$0xff] }
 0x2cb   : > { %v903_v31 = vrot.slane %v6103_v57, 1  ;;  %v867_v50 = vrot.slane %v6104_v10, 1  ;;  %v795_v48 = vsel %vm776_vm2, %v6097_v19, %v793_v49  ;;  %v835_v53 = vadd.f32 %v831_v60, %v749_v59  ;;  %v6110_v19 = vld [vmem:[#allocation65_spill] sm:$0xff] }
 0x2cc   : > { %v4663_v45 = vpop.permute.xlu2 %1456  ;;  %v902_v40 = vrot.slane %v6105_v7, 1  ;;  %v934_v38 = vrot.slane %v6106_v8, 1  ;;  %v868_v61 = vsel %vm849_vm3, %v6100_v21, %v866_v25  ;;  %v814_v29 = vsel %vm776_vm2, %v6101_v0, %v812_v28  ;;  %v6111_v21 = vld [vmem:[#allocation73_spill] sm:$0xff]  ;;  %v6112_v0 = vld [vmem:[#allocation46_spill] sm:$0xff] }
 0x2cd   : > { %v4671_v39 = vpop.permute.xlu0 %1348  ;;  %v933_v56 = vrot.slane %v6107_v44, 1  ;;  %v953_v23 = vrot.slane %v6108_v46, 1  ;;  %v850_v35 = vsel %vm849_vm3, %v6102_v47, %v847_v3  ;;  %v952_v59 = vrot.slane %v6109_v33, 1  ;;  %v6113_v3 = vld [vmem:[#allocation69_spill] sm:$0xff] }
 0x2ce   : > { %v988_v49 = vrot.slane %v6110_v19, 1  ;;  %v905_v22 = vsel %vm849_vm3, %v6103_v57, %v903_v31  ;;  %v799_v60 = vadd.f32 %v795_v48, %v713_v13  ;;  %v869_v2 = vsel %vm849_vm3, %v6104_v10, %v867_v50 }
 0x2cf   : > { %v970_v25 = vrot.slane %v6111_v21, 1  ;;  %v885_v28 = vrot.slane %v6112_v0, 1  ;;  %v904_v1 = vsel %vm849_vm3, %v6105_v7, %v902_v40  ;;  %v937_v47 = vsel %vm935_vm4, %v6106_v8, %v934_v38  ;;  %1836 = vrot.lane.b32.xlu1 %v4353_v42, %s6098_s11  ;;  %1818 = vrot.lane.b32.xlu2 %v4355_v34, %s6098_s11  ;;  %v6114_v7 = vld [vmem:[#allocation76_spill] sm:$0xff] }
 0x2d0   : > { %v971_v62 = vrot.slane %v6113_v3, 1  ;;  %v818_v13 = vadd.f32 %v814_v29, %v732_v12  ;;  %v854_v57 = vadd.f32 %v850_v35, %v781_v5  ;;  %v936_v31 = vsel %vm935_vm4, %v6107_v44, %v933_v56 }
 0x2d1   : > { %v955_v10 = vsel %vm935_vm4, %v6108_v46, %v953_v23  ;;  %v873_v50 = vadd.f32 %v869_v2, %v800_v41  ;;  %v954_v48 = vsel %vm935_vm4, %v6109_v33, %v952_v59  ;;  %v990_v42 = vsel %vm935_vm4, %v6110_v19, %v988_v49  ;;  %v6116_v59 = vld [vmem:[#allocation72_spill] sm:$0xff] }
 0x2d2   : > { %1800 = vrot.lane.b32.xlu0 %v4364_v43, %s6098_s11  ;;  %v989_v34 = vrot.slane %v6114_v7, 1  ;;  %v4715_v5 = vpop.permute.xlu1 %1420  ;;  %v908_v40 = vadd.f32 %v904_v1, %v835_v53  ;;  %v872_v8 = vadd.f32 %v868_v61, %v799_v60  ;;  %v941_v38 = vadd.f32 %v937_v47, %v855_v63  ;;  %v6115_v53 = vld [vmem:[#allocation67_spill] sm:$0xff]  ;;  %v6117_v2 = vld [vmem:[#allocation68_spill] sm:$0xff] }
 0x2d3   : > { %v972_v29 = vsel %vm935_vm4, %v6111_v21, %v970_v25  ;;  %v887_v41 = vsel %vm849_vm3, %v6112_v0, %v885_v28  ;;  %v940_v44 = vadd.f32 %v936_v31, %v854_v57  ;;  %v959_v56 = vadd.f32 %v955_v10, %v873_v50  ;;  %v6118_v25 = vld [vmem:[#allocation93_spill] sm:$0xff]  ;;  %v6122_v57 = vld [vmem:[#allocation82_spill] sm:$0xff] }
 0x2d4   : > { %v4713_v12 = vpop.permute.xlu2 %1476  ;;  %v973_v46 = vsel %vm935_vm4, %v6113_v3, %v971_v62  ;;  %v836_v23 = vadd.f32 %v832_v16, %v4601_v27  ;;  %v958_v35 = vadd.f32 %v954_v48, %v872_v8  ;;  %v994_v33 = vadd.f32 %v990_v42, %v908_v40  ;;  %v6119_v62 = vld [vmem:[#allocation95_spill] sm:$0xff]  ;;  %v6120_v27 = vld [vmem:[#allocation98_spill] sm:$0xff]  ;;  %v6127_v40 = vld [vmem:[#allocation112_spill] sm:$0xff] }
 0x2d5   : > { %v4719_v43 = vpop.permute.xlu0 %1382  ;;  %v891_v1 = vadd.f32 %v887_v41, %v818_v13  ;;  %v1039_v63 = vrot.slane %v6115_v53, 1  ;;  %v976_v61 = vadd.f32 %v972_v29, %v890_v14  ;;  %v1038_v19 = vrot.slane %v6116_v59, 1  ;;  %v6121_v3 = vld [vmem:[#allocation79_spill] sm:$0xff] }
 0x2d6   : > { %v991_v49 = vsel %vm935_vm4, %v6114_v7, %v989_v34  ;;  %v909_v60 = vadd.f32 %v905_v22, %v836_v23  ;;  %v1074_v21 = vrot.slane %v6117_v2, 1  ;;  %v1007_v0 = vadd.f32 %v6118_v25, %v941_v38  ;;  %v6123_v14 = vld [vmem:[#allocation111_spill] sm:$0xff]  ;;  %v6126_v7 = vld [vmem:[#allocation100_spill] sm:$0xff]  ;;  %v6128_v38 = vld [vmem:[#allocation94_spill] sm:$0xff] }
 0x2d7   : > { %v977_v28 = vadd.f32 %v973_v46, %v891_v1  ;;  %v1006_v47 = vadd.f32 %v6119_v62, %v940_v44  ;;  %v1013_v16 = vadd.f32 %v6120_v27, %v959_v56  ;;  %v1056_v13 = vrot.slane %v6121_v3, 1  ;;  %1856 = vrot.lane.b32.xlu1 %v4367_v6, %s6098_s11  ;;  %1838 = vrot.lane.b32.xlu2 %v6123_v14, %s6098_s11  ;;  %v6124_v22 = vld [vmem:[#allocation71_spill] sm:$0xff]  ;;  %v6131_v1 = vld [vmem:[#allocation101_spill] sm:$0xff] }
 0x2d8   : > { %v1075_v31 = vrot.slane %v6122_v57, 1  ;;  %v1093_v10 = vrot.slane %v6124_v22, 1  ;;  %v995_v50 = vadd.f32 %v991_v49, %v909_v60  ;;  %v6125_v48 = vld [vmem:[#allocation99_spill] sm:$0xff]  ;;  %v1024_v34 = vadd.f32 %v6126_v7, %v994_v33  ;;  %v6133_v25 = vld [vmem:[#allocation81_spill] sm:$0xff] }
 0x2d9   : > { %v1012_v42 = vadd.f32 %v6125_v48, %v958_v35  ;;  %v1041_v8 = vsel %vm352_vm13, %v6115_v53, %v1039_v63  ;;  %v1018_v29 = vadd.f32 %v6128_v38, %v976_v61  ;;  %v1040_v6 = vsel %vm352_vm13, %v6116_v59, %v1038_v19  ;;  %v6129_v41 = vld [vmem:[#allocation75_spill] sm:$0xff]  ;;  %v6130_v35 = vld [vmem:[#allocation78_spill] sm:$0xff]  ;;  %v6134_v27 = vld [vmem:[#allocation97_spill] sm:$0xff] }
 0x2da   : > { %1820 = vrot.lane.b32.xlu0 %v6127_v40, %s6098_s11  ;;  %v1057_v44 = vrot.slane %v6129_v41, 1  ;;  %v4753_v46 = vpop.permute.xlu1 %1440  ;;  %v1076_v23 = vsel %vm352_vm13, %v6117_v2, %v1074_v21  ;;  %v1092_v33 = vrot.slane %v6130_v35, 1  ;;  %v1019_v49 = vadd.f32 %v6131_v1, %v977_v28  ;;  %v6132_v63 = vld [vmem:[#allocation74_spill] sm:$0xff]  ;;  %v6135_v28 = vld [vmem:[#allocation85_spill] sm:$0xff] }
 0x2db   : > { %v1045_v60 = vadd.f32 %v1041_v8, %v1007_v0  ;;  %v1130_v61 = vrot.slane %v6132_v63, 1  ;;  %v1058_v59 = vsel %vm352_vm13, %v6121_v3, %v1056_v13  ;;  %v1077_v19 = vsel %vm352_vm13, %v6122_v57, %v1075_v31  ;;  %v6136_v7 = vld [vmem:[#allocation77_spill] sm:$0xff]  ;;  %v6137_v3 = vld [vmem:[#allocation87_spill] sm:$0xff]  ;;  %v6138_v31 = vld [vmem:[#allocation80_spill] sm:$0xff] }
 0x2dc   : > { %v4751_v56 = vpop.permute.xlu2 %1510  ;;  %v1113_v62 = vrot.slane %v6133_v25, 1  ;;  %v1095_v2 = vsel %vm352_vm13, %v6124_v22, %v1093_v10  ;;  %v1044_v21 = vadd.f32 %v1040_v6, %v1006_v47  ;;  %v1025_v14 = vadd.f32 %v6134_v27, %v995_v50  ;;  %v6139_v50 = vld [vmem:[#allocation96_spill] sm:$0xff] }
 0x2dd   : > { %v4759_v53 = vpop.permute.xlu0 %1404  ;;  %v1112_v0 = vrot.slane %v6135_v28, 1  ;;  %v1059_v48 = vsel %vm352_vm13, %v6129_v41, %v1057_v44  ;;  %v1149_v40 = vrot.slane %v6136_v7, 1  ;;  %v1080_v8 = vadd.f32 %v1076_v23, %v1018_v29  ;;  %v6141_v29 = vld [vmem:[#allocation113_spill] sm:$0xff] }
 0x2de   : > { %v1167_v13 = vrot.slane %v6137_v3, 1  ;;  %v1062_v38 = vadd.f32 %v1058_v59, %v1012_v42  ;;  %v1094_v57 = vsel %vm352_vm13, %v6130_v35, %v1092_v33  ;;  %v1186_v1 = vrot.slane %v6138_v31, 1  ;;  %v6142_v42 = vld [vmem:[#allocation114_spill] sm:$0xff]  ;;  %v6143_v35 = vld [vmem:[#allocation84_spill] sm:$0xff] }
 0x2df   : > { %v1081_v22 = vadd.f32 %v1077_v19, %v1019_v49  ;;  %v1132_v47 = vsel %vm445_vm15, %v6132_v63, %v1130_v61  ;;  %v1115_v10 = vsel %vm445_vm15, %v6133_v25, %v1113_v62  ;;  %v1166_v6 = vrot.slane %v6139_v50, 1  ;;  %1890 = vrot.lane.b32.xlu1 %v6141_v29, %s6140_s26  ;;  %1872 = vrot.lane.b32.xlu2 %v6142_v42, %s6140_s26  ;;  %v6144_v63 = vld [vmem:[#allocation115_spill] sm:$0xff]  ;;  %v6145_v25 = vld [vmem:[#allocation92_spill] sm:$0xff] }
 0x2e0   : > { %v1241_v41 = vrot.slane %v4478_v26, 1  ;;  %v4788_v44 = vadd.f32 %v1059_v48, %v1013_v16  ;;  %v1114_v23 = vsel %vm445_vm15, %v6135_v28, %v1112_v0  ;;  %v1148_v33 = vrot.slane %v6143_v35, 1  ;;  %v6146_v29 = vld [vmem:[#allocation83_spill] sm:$0xff] }
 0x2e1   : > { %v1099_v49 = vadd.f32 %v1095_v2, %v1025_v14  ;;  %v1151_v61 = vsel %vm445_vm15, %v6136_v7, %v1149_v40  ;;  %v1098_v59 = vadd.f32 %v1094_v57, %v1024_v34  ;;  %v1169_v19 = vsel %vm445_vm15, %v6137_v3, %v1167_v13  ;;  %v6147_v57 = vld [vmem:[#allocation86_spill] sm:$0xff]  ;;  %v6153_v7 = vld [vmem:[#allocation117_spill] sm:$0xff] }
 0x2e2   : > { %1854 = vrot.lane.b32.xlu0 %v6144_v63, %s6098_s11  ;;  %v1204_v62 = vrot.slane %v6145_v25, 1  ;;  %v4802_v27 = vpop.permute.xlu1 %1474  ;;  %v1188_v28 = vsel %vm531_vm0, %v6138_v31, %v1186_v1  ;;  %v1119_v2 = vadd.f32 %v1115_v10, %v1045_v60  ;;  %v1136_v14 = vadd.f32 %v1132_v47, %v1062_v38  ;;  %v6148_v60 = vld [vmem:[#allocation108_spill] sm:$0xff]  ;;  %v6149_v1 = vld [vmem:[#allocation91_spill] sm:$0xff] }
 0x2e3   : > { %v1155_v0 = vadd.f32 %v1151_v61, %v1081_v22  ;;  %v1118_v34 = vadd.f32 %v1114_v23, %v1044_v21  ;;  %v1168_v40 = vsel %vm445_vm15, %v6139_v50, %v1166_v6  ;;  %v1243_v3 = vsel %vm531_vm0, %v4478_v26, %v1241_v41  ;;  %v6150_v21 = vld [vmem:[#allocation119_spill] sm:$0xff]  ;;  %v6151_v23 = vld [vmem:[#allocation104_spill] sm:$0xff] }
 0x2e4   : > { %v4800_v16 = vpop.permute.xlu2 %1530  ;;  %v1150_v13 = vsel %vm445_vm15, %v6143_v35, %v1148_v33  ;;  %v1240_v42 = vrot.slane %v6147_v57, 1  ;;  %v1173_v31 = vadd.f32 %v1169_v19, %v1099_v49  ;;  %v1187_v38 = vrot.slane %v6148_v60, 1  ;;  %v6152_v63 = vld [vmem:[#allocation88_spill] sm:$0xff] }
 0x2e5   : > { %v4806_v48 = vpop.permute.xlu0 %1438  ;;  %v1259_v22 = vrot.slane %v6149_v1, 1  ;;  %v1206_v47 = vsel %vm531_vm0, %v6145_v25, %v1204_v62  ;;  %v1313_v10 = vrot.slane %v6150_v21, 1  ;;  %v1387_v50 = vrot.slane %v4665_v55, 1  ;;  %v6154_v25 = vld [vmem:[#allocation116_spill] sm:$0xff] }
 0x2e6   : > { %v1172_v6 = vadd.f32 %v1168_v40, %v1098_v59  ;;  %v1223_v26 = vrot.slane %v6151_v23, 1  ;;  %v1247_v41 = vadd.f32 %v1243_v3, %v1173_v31  ;;  %v1312_v35 = vrot.slane %v4529_v32, 1  ;;  %v6155_v40 = vld [vmem:[#allocation121_spill] sm:$0xff] }
 0x2e7   : > { %v1154_v33 = vadd.f32 %v1150_v13, %v1080_v8  ;;  %v4825_v61 = vadd.f32 %v1188_v28, %v1118_v34  ;;  %v1276_v19 = vrot.slane %v4540_v4, 1  ;;  %1910 = vrot.lane.b32.xlu1 %v6153_v7, %s6140_s26  ;;  %1892 = vrot.lane.b32.xlu2 %v6154_v25, %s6140_s26  ;;  %v1242_v59 = vsel %vm531_vm0, %v6147_v57, %v1240_v42  ;;  %v6156_v28 = vld [vmem:[#allocation118_spill] sm:$0xff] }
 0x2e8   : > { %v1189_v62 = vsel %vm531_vm0, %v6148_v60, %v1187_v38  ;;  %v1222_v8 = vrot.slane %v6155_v40, 1  ;;  %v1386_v3 = vrot.slane %v4719_v43, 1  ;;  %v1261_v34 = vsel %vm604_vm14, %v6149_v1, %v1259_v22 }
 0x2e9   : > { %v1210_v7 = vadd.f32 %v1206_v47, %v1136_v14  ;;  %v1315_v13 = vsel %vm604_vm14, %v6150_v21, %v1313_v10  ;;  %v1389_v57 = vsel %vm690_vm1, %v4665_v55, %v1387_v50  ;;  %v1225_v60 = vsel %vm531_vm0, %v6151_v23, %v1223_v26  ;;  %v6157_v10 = vld [vmem:[#allocation120_spill] sm:$0xff] }
 0x2ea   : > { %1874 = vrot.lane.b32.xlu0 %v6156_v28, %s6140_s26  ;;  %v4848_v31 = vpop.permute.xlu1 %1494  ;;  %v1246_v38 = vadd.f32 %v1242_v59, %v1172_v6  ;;  %v1314_v25 = vsel %vm604_vm14, %v4529_v32, %v1312_v35  ;;  %v1319_v28 = vadd.f32 %v1315_v13, %v1247_v41  ;;  %v1193_v14 = vadd.f32 %v1189_v62, %v1119_v2  ;;  %v6158_v59 = vld [vmem:[#allocation103_spill] sm:$0xff] }
 0x2eb   : > { %v1278_v22 = vsel %vm604_vm14, %v4540_v4, %v1276_v19  ;;  %v1533_v47 = vrot.slane %v4800_v16, 1  ;;  %v1224_v21 = vsel %vm531_vm0, %v6155_v40, %v1222_v8  ;;  %v1258_v50 = vrot.slane %v6157_v10, 1  ;;  %v6161_v13 = vld [vmem:[#allocation123_spill] sm:$0xff] }
 0x2ec   : > { %v4846_v42 = vpop.permute.xlu2 %1566  ;;  %v1393_v49 = vadd.f32 %v1389_v57, %v1319_v28  ;;  %v1388_v6 = vsel %vm690_vm1, %v4719_v43, %v1386_v3  ;;  %v1350_v32 = vrot.slane %v4468_v24, 1  ;;  %v1318_v23 = vadd.f32 %v1314_v25, %v1246_v38  ;;  %v6160_v3 = vld [vmem:[#allocation122_spill] sm:$0xff] }
 0x2ed   : > { %v1459_v1 = vpop.permute.xlu0 %1458  ;;  %v1424_v2 = vrot.slane %v4715_v5, 1  ;;  %v1282_v4 = vadd.f32 %v1278_v22, %v1210_v7  ;;  %v1333_v41 = vrot.slane %v4580_v11, 1  ;;  %v1460_v35 = vrot.slane %v4663_v45, 1 }
 0x2ee   : > { %v1461_v55 = vrot.slane %v1459_v1, 1  ;;  %v1294_v62 = vrot.slane %v6158_v59, 1  ;;  %v1295_v40 = vrot.slane %v4587_v36, 1  ;;  %v1392_v8 = vadd.f32 %v1388_v6, %v1318_v23 }
 0x2ef   : > { %v1535_v43 = vsel %vm849_vm3, %v4800_v16, %v1533_v47  ;;  %1946 = vrot.lane.b32.xlu1 %v6160_v3, %s6159_s6  ;;  %1926 = vrot.lane.b32.xlu2 %v6161_v13, %s6140_s26  ;;  %v1229_v7 = vadd.f32 %v1225_v60, %v1155_v0  ;;  %v1265_v57 = vadd.f32 %v1261_v34, %v1193_v14  ;;  %v1407_v38 = vrot.slane %v4759_v53, 1 }
 0x2f0   : > { %v1463_v26 = vsel %vm776_vm2, %v1459_v1, %v1461_v55  ;;  %v1228_v25 = vadd.f32 %v1224_v21, %v1154_v33  ;;  %v1260_v28 = vsel %vm604_vm14, %v6157_v10, %v1258_v50  ;;  %v1352_v16 = vsel %vm690_vm1, %v4468_v24, %v1350_v32 }
 0x2f1   : > { %v1467_v19 = vadd.f32 %v1463_v26, %v1393_v49  ;;  %v1426_v1 = vsel %vm776_vm2, %v4715_v5, %v1424_v2  ;;  %v1335_v34 = vsel %vm690_vm1, %v4580_v11, %v1333_v41  ;;  %v1356_v60 = vadd.f32 %v1352_v16, %v1282_v4 }
 0x2f2   : > { %1908 = vrot.lane.b32.xlu0 %v4413_v54, %s6140_s26  ;;  %v1529_v0 = vpop.permute.xlu1 %1528  ;;  %v1462_v54 = vsel %vm776_vm2, %v4663_v45, %v1460_v35  ;;  %v1297_v47 = vsel %vm604_vm14, %v4587_v36, %v1295_v40  ;;  %v1570_v24 = vrot.slane %v4846_v42, 1  ;;  %v1369_v5 = vrot.slane %v4527_v18, 1 }
 0x2f3   : > { %v4878_v49 = vadd.f32 %v1535_v43, %v1467_v19  ;;  %v1532_v14 = vrot.slane %v1529_v0, 1  ;;  %v1466_v21 = vadd.f32 %v1462_v54, %v1392_v8  ;;  %v1430_v10 = vadd.f32 %v1426_v1, %v1356_v60  ;;  %v6163_v8 = vld [vmem:[#allocation124_spill] sm:$0xff]  ;;  %v1615_v60 = vld [vmem:[#allocation2 + $0x2] ss:$4 sm:$0x3] }
 0x2f4   : > { %v4886_v22 = vpop.permute.xlu2 %1586  ;;  %v1409_v50 = vsel %vm776_vm2, %v4759_v53, %v1407_v38  ;;  %v1339_v6 = vadd.f32 %v1335_v34, %v1265_v57  ;;  %v1443_v45 = vrot.slane %v4753_v46, 1  ;;  %v1301_v36 = vadd.f32 %v1297_v47, %v1229_v7 }
 0x2f5   : > { %v1493_v33 = vpop.permute.xlu0 %1492  ;;  %v1534_v11 = vsel %vm849_vm3, %v1529_v0, %v1532_v14  ;;  %v1368_v2 = vrot.slane %v4620_v51, 1  ;;  %v1479_v26 = vrot.slane %v4713_v12, 1  ;;  %v6162_v41 = vrot.slane %v6152_v63, 1 }
 0x2f6   : > { %v1496_v55 = vrot.slane %v1493_v33, 1  ;;  %v4901_v23 = vadd.f32 %v1534_v11, %v1466_v21  ;;  %v1332_v35 = vrot.slane %v4628_v9, 1  ;;  %v1413_v19 = vadd.f32 %v1409_v50, %v1339_v6  ;;  %v6164_v50 = vld [vmem:[#allocation19_spill] sm:$0xff] }
 0x2f7   : > { %v1133_v53 = vsel %vm445_vm15, %v6152_v63, %v6162_v41  ;;  %v1572_v40 = vsel %vm935_vm4, %v4846_v42, %v1570_v24  ;;  %1966 = vrot.lane.b32.xlu1 %v6163_v8, %s6159_s6  ;;  %1948 = vrot.lane.b32.xlu2 %v4419_v15, %s6159_s6  ;;  %v1296_v43 = vsel %vm604_vm14, %v6158_v59, %v1294_v62  ;;  %v1442_v63 = vrot.slane %v4806_v48, 1 }
 0x2f8   : > { %v1498_v32 = vsel %vm849_vm3, %v1493_v33, %v1496_v55  ;;  %v1264_v3 = vadd.f32 %v1260_v28, %v4825_v61  ;;  %v1277_v42 = vrot.slane %v4470_v37, 1  ;;  %v1371_v15 = vsel %vm690_vm1, %v4527_v18, %v1369_v5 }
 0x2f9   : > { %v1502_v4 = vadd.f32 %v1498_v32, %v1430_v10  ;;  %v1300_v7 = vadd.f32 %v1296_v43, %v1228_v25  ;;  %v1445_v59 = vsel %vm776_vm2, %v4753_v46, %v1443_v45  ;;  %v1370_v57 = vsel %vm690_vm1, %v4620_v51, %v1368_v2  ;;  %v6165_v32 = vld [vmem:[#allocation90_spill] sm:$0xff] }
 0x2fa   : > { %1928 = vrot.lane.b32.xlu0 %v4422_v30, %s6140_s26  ;;  %v1551_v61 = vpop.permute.xlu1 %1550  ;;  %v1481_v30 = vsel %vm849_vm3, %v4713_v12, %v1479_v26  ;;  %v1375_v38 = vadd.f32 %v1371_v15, %v1301_v36  ;;  %v1334_v1 = vsel %vm690_vm1, %v4628_v9, %v1332_v35  ;;  %v1589_v18 = vrot.slane %v4886_v22, 1 }
 0x2fb   : > { %v4922_v13 = vadd.f32 %v1572_v40, %v1502_v4  ;;  %v1553_v16 = vrot.slane %v1551_v61, 1  ;;  %v1485_v0 = vadd.f32 %v1481_v30, %v1413_v19  ;;  %v1406_v46 = vrot.slane %v4578_v20, 1 }
 0x2fc   : > { %v4933_v62 = vpop.permute.xlu2 %1652  ;;  %v1449_v34 = vadd.f32 %v1445_v59, %v1375_v38  ;;  %v1444_v54 = vsel %vm776_vm2, %v4806_v48, %v1442_v63  ;;  %v1374_v12 = vadd.f32 %v1370_v57, %v1300_v7  ;;  %v1478_v33 = vrot.slane %v4802_v27, 1  ;;  %v6169_v63 = vld [vmem:[#allocation105_spill] sm:$0xff] }
 0x2fd   : > { %v1513_v28 = vpop.permute.xlu0 %1512  ;;  %v1555_v51 = vsel %vm935_vm4, %v1551_v61, %v1553_v16  ;;  %v1137_v47 = vadd.f32 %v1133_v53, %v4788_v44  ;;  %v1338_v24 = vadd.f32 %v1334_v1, %v1264_v3  ;;  %v1514_v55 = vrot.slane %v4751_v56, 1  ;;  %v1617_v1 = vld [vmem:[#allocation2 + $0xe] ss:$4 sm:$0x3] }
 0x2fe   : > { %v1515_v25 = vrot.slane %v1513_v28, 1  ;;  %v4948_v14 = vadd.f32 %v1555_v51, %v1485_v0  ;;  %v1351_v48 = vrot.slane %v4671_v39, 1  ;;  %v1448_v5 = vadd.f32 %v1444_v54, %v1374_v12 }
 0x2ff   : > { %v1591_v10 = vsel %vm935_vm4, %v4886_v22, %v1589_v18  ;;  %2000 = vrot.lane.b32.xlu1 %v4434_v58, %s6159_s6  ;;  %1982 = vrot.lane.b32.xlu2 %v4439_v17, %s6159_s6  ;;  %v4960_v11 = vmul.f32 %v1615_v60, %v6164_v50  ;;  %v1621_v6 = vstv %s4916_s14  ;;  %v2015_v45 = vstv %s4926_s7  ;;  %v5011_v18 = vld [vmem:[#allocation2 + $0x2] ss:$4 sm:$0x7]  ;;  %s5092_s7 = sld [smem:[#allocation10 + $0x61]]  ;;  %s6174_s14 = smov 95  }
 0x300   : > { %v1517_v9 = vsel %vm849_vm3, %v1513_v28, %v1515_v25  ;;  %v6166_v36 = vstv %s4327_s12  ;;  %v6167_v22 = vrot.slane %v6146_v29, 1  ;;  %v1279_v17 = vsel %vm604_vm14, %v4470_v37, %v1277_v42  ;;  %v6172_v25 = vld [vmem:[#allocation27_spill] sm:$0xff]  ;;  %s5056_s12 = sld [smem:[#allocation10 + $0x3d]] }
 0x301   : > { %v1521_v21 = vadd.f32 %v1517_v9, %v1449_v34  ;;  %v1997_v2 = vmul.f32 %v6166_v36, %v6165_v32  ;;  %v1408_v26 = vsel %vm776_vm2, %v4578_v20, %v1406_v46  ;;  %v1516_v35 = vsel %vm849_vm3, %v4751_v56, %v1514_v55  ;;  %v6173_v9 = vld [vmem:[#allocation18_spill] sm:$0xff] }
 0x302   : > { %1964 = vrot.lane.b32.xlu0 %v4425_v52, %s6159_s6  ;;  %v1207_v58 = vsel %vm531_vm0, %v6146_v29, %v6167_v22  ;;  %v1480_v52 = vsel %vm849_vm3, %v4802_v27, %v1478_v33  ;;  %v1585_v41 = vpop.permute.xlu1 %1584  ;;  %v1412_v19 = vadd.f32 %v1408_v26, %v1338_v24  ;;  %v1353_v37 = vsel %vm690_vm1, %v4671_v39, %v1351_v48  ;;  %v6168_v27 = vld [vmem:[#allocation89_spill] sm:$0xff] }
 0x303   : > { %v4962_v44 = vadd.f32 %v1591_v10, %v1521_v21  ;;  %v1211_v53 = vadd.f32 %v1207_v58, %v1137_v47  ;;  %v1588_v8 = vrot.slane %v1585_v41, 1  ;;  %v1520_v29 = vadd.f32 %v1516_v35, %v1448_v5 }
 0x304   : > { %v4981_v4 = vpop.permute.xlu2 %1672  ;;  %v2017_v43 = vmul.f32 %v2015_v45, %v6168_v27  ;;  %v1425_v56 = vrot.slane %v6169_v63, 1  ;;  %v1484_v42 = vadd.f32 %v1480_v52, %v1412_v19  ;;  %v1497_v7 = vrot.slane %v4848_v31, 1 }
 0x305   : > { %v1549_v40 = vpop.permute.xlu0 %1548  ;;  %v1283_v3 = vadd.f32 %v1279_v17, %v1211_v53  ;;  %v1590_v15 = vsel %vm935_vm4, %v1585_v41, %v1588_v8  ;;  %v1656_v39 = vrot.slane %v4933_v62, 1  ;;  %v1622_v30 = vmul.f32 %v1621_v6, %v4960_v11 }
 0x306   : > { %v1552_v20 = vrot.slane %v1549_v40, 1  ;;  %v5001_v61 = vadd.f32 %v1590_v15, %v1520_v29  ;;  %v6170_v28 = vstv %s4337_s25  ;;  %v5015_v0 = vmul.f32 %v5011_v18, %v6172_v25  ;;  %s5059_s25 = sld [smem:[#allocation10 + $0x19]] }
 0x307   : > { %v1357_v57 = vadd.f32 %v1353_v37, %v1283_v3  ;;  %v1979_v16 = vmul.f32 %v6170_v28, %v6165_v32  ;;  %2022 = vrot.lane.b32.xlu1 %v2017_v43, %s6171_s10  ;;  %2002 = vrot.lane.b32.xlu2 %v1997_v2, %s6159_s6  ;;  %v1427_v34 = vsel %vm776_vm2, %v6169_v63, %v1425_v56  ;;  %v1627_v48 = vstv %s4985_s30  ;;  %s5106_s30 = sld [smem:[#allocation10 + $0x85]] }
 0x308   : > { %v1554_v59 = vsel %vm935_vm4, %v1549_v40, %v1552_v20  ;;  %v1499_v54 = vsel %vm849_vm3, %v4848_v31, %v1497_v7  ;;  %v1658_v51 = vsel %vm352_vm13, %v4933_v62, %v1656_v39  ;;  %v5025_v47 = vmul.f32 %v1617_v1, %v6173_v9 }
 0x309   : > { %v1558_v38 = vadd.f32 %v1554_v59, %v1484_v42  ;;  %v1431_v33 = vadd.f32 %v1427_v34, %v1357_v57  ;;  %v2051_v31 = vstv %s4992_s8  ;;  %v2033_v36 = vstv %s4996_s28  ;;  %s5109_s8 = sld [smem:[#allocation10 + $0x1a]] }
 0x30a   : > { %1984 = vrot.lane.b32.xlu0 %v1979_v16, %s6159_s6  ;;  %v1605_v12 = vpop.permute.xlu1 %1604  ;;  %v2052_v32 = vmul.f32 %v2051_v31, %v5015_v0  ;;  %v1675_v2 = vrot.slane %v4981_v4, 1  ;;  %v2034_v17 = vmul.f32 %v2033_v36, %v5015_v0  ;;  %v1629_v26 = vmul.f32 %v1627_v48, %v5025_v47  ;;  %s5133_s28 = sld [smem:[#allocation10 + $0x3e]] }
 0x30b   : > { %v1624_v46 = vadd.f32 %v1622_v30, %v1558_v38  ;;  %v1607_v55 = vrot.slane %v1605_v12, 1  ;;  %v1503_v62 = vadd.f32 %v1499_v54, %v1431_v33  ;;  %v2016_v41 = vmul.f32 %v2015_v45, %v5015_v0 }
 0x30c   : > { %v1707_v60 = vpop.permute.xlu2 %1706  ;;  %v1628_v19 = vmul.f32 %v1627_v48, %v4960_v11  ;;  %v2069_v37 = vstv %s5027_s29  ;;  %v1639_v29 = vstv %s5033_s0  ;;  %v2053_v63 = vmul.f32 %v2051_v31, %v6168_v27  ;;  %s5148_s29 = sld [smem:[#allocation10 + $0x86]] }
 0x30d   : > { %v1569_v24 = vpop.permute.xlu0 %1568  ;;  %v5029_v21 = vadd.f32 %v1658_v51, %v1624_v46  ;;  %v1609_v10 = vsel %vm935_vm4, %v1605_v12, %v1607_v55  ;;  %v1710_v56 = vrot.slane %v1707_v60, 1  ;;  %v2071_v7 = vmul.f32 %v2069_v37, %v6168_v27  ;;  %s5150_s0 = sld [smem:[#allocation10 + $0x62]] }
 0x30e   : > { %v1571_v5 = vrot.slane %v1569_v24, 1  ;;  %v5041_v58 = vadd.f32 %v1609_v10, %v4878_v49  ;;  %v1677_v49 = vsel %vm352_vm13, %v4981_v4, %v1675_v2  ;;  %v1630_v3 = vadd.f32 %v1628_v19, %v4922_v13  ;;  %v3287_v19 = vld [vmem:[#allocation2 + $0xe] ss:$4 sm:$0x7] }
 0x30f   : > { %2056 = vrot.lane.b32.xlu1 %v2052_v32, %s6171_s10  ;;  %2038 = vrot.lane.b32.xlu2 %v2034_v17, %s6171_s10  ;;  %v1640_v39 = vmul.f32 %v1639_v29, %v4960_v11  ;;  %v2035_v13 = vmul.f32 %v2033_v36, %v6168_v27  ;;  %v1633_v30 = vstv %s5051_s27  ;;  %v1712_v38 = vsel %vm352_vm13, %v1707_v60, %v1710_v56  ;;  %s5168_s27 = sld [smem:[#allocation10 + $0x1c]] }
 0x310   : > { %v1573_v22 = vsel %vm935_vm4, %v1569_v24, %v1571_v5  ;;  %v1623_v16 = vmul.f32 %v1621_v6, %v5025_v47  ;;  %v1635_v1 = vmul.f32 %v1633_v30, %v5025_v47  ;;  %v2105_v27 = vstv %s5056_s12  ;;  %s5181_s12 = sld [smem:[#allocation10 + $0x64]] }
 0x311   : > { %v1577_v52 = vadd.f32 %v1573_v22, %v1503_v62  ;;  %v2087_v54 = vstv %s5059_s25  ;;  %v2106_v5 = vmul.f32 %v5011_v18, %v2105_v27  ;;  %v2070_v10 = vmul.f32 %v2069_v37, %v5015_v0  ;;  %s5185_s25 = sld [smem:[#allocation10 + $0x40]] }
 0x312   : > { %2020 = vrot.lane.b32.xlu0 %v2016_v41, %s6171_s10  ;;  %v1671_v40 = vpop.permute.xlu1 %1670  ;;  %v1637_v24 = vadd.f32 %v1635_v1, %v4962_v44  ;;  %v1625_v55 = vadd.f32 %v1623_v16, %v4948_v14  ;;  %v2088_v31 = vmul.f32 %v5011_v18, %v2087_v54  ;;  %v1634_v2 = vmul.f32 %v1633_v30, %v4960_v11 }
 0x313   : > { %v1631_v53 = vadd.f32 %v1629_v26, %v1577_v52  ;;  %v1674_v8 = vrot.slane %v1671_v40, 1 }
 0x314   : > { %v1729_v35 = vpop.permute.xlu2 %1728  ;;  %v1636_v52 = vadd.f32 %v1634_v2, %v5001_v61 }
 0x315   : > { %v1603_v45 = vpop.permute.xlu0 %1602  ;;  %v5061_v20 = vadd.f32 %v1677_v49, %v1631_v53  ;;  %v1676_v4 = vsel %vm352_vm13, %v1671_v40, %v1674_v8  ;;  %v1731_v12 = vrot.slane %v1729_v35, 1  ;;  %v2123_v53 = vstv %s5092_s7  ;;  %s5206_s7 = sld [smem:[#allocation10 + $0x88]] }
 0x316   : > { %v1606_v43 = vrot.slane %v1603_v45, 1  ;;  %v5068_v15 = vadd.f32 %v1676_v4, %v1630_v3  ;;  %v2125_v11 = vmul.f32 %v3287_v19, %v2123_v53  ;;  %v2107_v40 = vmul.f32 %v3287_v19, %v2105_v27 }
 0x317   : > { %2076 = vrot.lane.b32.xlu1 %v2071_v7, %s6171_s10  ;;  %2058 = vrot.lane.b32.xlu2 %v2053_v63, %s6171_s10  ;;  %v1733_v32 = vsel %vm445_vm15, %v1729_v35, %v1731_v12  ;;  %v2089_v8 = vmul.f32 %v3287_v19, %v2087_v54  ;;  %v1641_v63 = vmul.f32 %v1639_v29, %v5025_v47  ;;  %v2161_v7 = vstv %s5109_s8  ;;  %s5224_s8 = sld [smem:[#allocation10 + $0x1d]] }
 0x318   : > { %v1608_v42 = vsel %vm935_vm4, %v1603_v45, %v1606_v43  ;;  %v6175_v43 = vld [vmem:[#allocation49_spill] sm:$0xff]  ;;  %v2124_v1 = vmul.f32 %v5011_v18, %v2123_v53 }
 0x319   : > { %v1612_v59 = vadd.f32 %v1608_v42, %v4901_v23 }
 0x31a   : > { %2040 = vrot.lane.b32.xlu0 %v2035_v13, %s6171_s10  ;;  %v1691_v46 = vpop.permute.xlu1 %1690 }
 0x31b   : > { %v1642_v57 = vadd.f32 %v1640_v39, %v1612_v59  ;;  %v1693_v34 = vrot.slane %v1691_v46, 1  ;;  %v2141_v39 = vstv %s5106_s30  ;;  %s5222_s30 = sld [smem:[#allocation10 + $0x41]] }
 0x31c   : > { %v1763_v28 = vpop.permute.xlu2 %1762  ;;  %v2142_v47 = vmul.f32 %v5011_v18, %v2141_v39 }
 0x31d   : > { %v1655_v23 = vpop.permute.xlu0 %1654  ;;  %v5087_v51 = vadd.f32 %v1712_v38, %v1642_v57  ;;  %v1695_v60 = vsel %vm352_vm13, %v1691_v46, %v1693_v34  ;;  %v1766_v0 = vrot.slane %v1763_v28, 1  ;;  %v1643_v57 = vadd.f32 %v1641_v63, %v5041_v58 }
 0x31e   : > { %v1657_v33 = vrot.slane %v1655_v23, 1  ;;  %v5095_v48 = vadd.f32 %v1695_v60, %v1637_v24 }
 0x31f   : > { %2110 = vrot.lane.b32.xlu1 %v2106_v5, %s6174_s14  ;;  %2092 = vrot.lane.b32.xlu2 %v2088_v31, %s6174_s14  ;;  %v1768_v37 = vsel %vm445_vm15, %v1763_v28, %v1766_v0  ;;  %v2197_v0 = vstv %s5150_s0  ;;  %s5265_s0 = sld [smem:[#allocation10 + $0x1e]] }
 0x320   : > { %v1659_v6 = vsel %vm352_vm13, %v1655_v23, %v1657_v33  ;;  %v6176_v23 = vld [vmem:[#allocation54_spill] sm:$0xff] }
 0x321   : > { %v1663_v62 = vadd.f32 %v1659_v6, %v1625_v55  ;;  %v2179_v55 = vstv %s5133_s28  ;;  %s5247_s28 = sld [smem:[#allocation10 + $0x65]] }
 0x322   : > { %2074 = vrot.lane.b32.xlu0 %v2070_v10, %s6171_s10  ;;  %v1727_v36 = vpop.permute.xlu1 %1726  ;;  %v2143_v10 = vmul.f32 %v3287_v19, %v2141_v39 }
 0x323   : > { %v5104_v14 = vadd.f32 %v1733_v32, %v1663_v62  ;;  %v1730_v17 = vrot.slane %v1727_v36, 1 }
 0x324   : > { %v1783_v44 = vpop.permute.xlu2 %1782 }
 0x325   : > { %v1689_v22 = vpop.permute.xlu0 %1688  ;;  %v1732_v41 = vsel %vm445_vm15, %v1727_v36, %v1730_v17  ;;  %v1785_v59 = vrot.slane %v1783_v44, 1  ;;  %v2215_v17 = vstv %s5148_s29  ;;  %s5263_s29 = sld [smem:[#allocation10 + $0x89]] }
 0x326   : > { %v1692_v26 = vrot.slane %v1689_v22, 1  ;;  %v5116_v35 = vadd.f32 %v1732_v41, %v5029_v21  ;;  %v2158_v21 = vmul.f32 %v5011_v18, %v6175_v43 }
 0x327   : > { %2130 = vrot.lane.b32.xlu1 %v2125_v11, %s6174_s14  ;;  %2112 = vrot.lane.b32.xlu2 %v2107_v40, %s6174_s14  ;;  %v1787_v46 = vsel %vm445_vm15, %v1783_v44, %v1785_v59 }
 0x328   : > { %v1694_v49 = vsel %vm352_vm13, %v1689_v22, %v1692_v26  ;;  %v2162_v16 = vmul.f32 %v2161_v7, %v2158_v21  ;;  %v2180_v40 = vmul.f32 %v2179_v55, %v2158_v21 }
 0x329   : > { %v1698_v45 = vadd.f32 %v1694_v49, %v1636_v52  ;;  %v2216_v49 = vmul.f32 %v2215_v17, %v2158_v21 }
 0x32a   : > { %2094 = vrot.lane.b32.xlu0 %v2089_v8, %s6174_s14  ;;  %v1747_v4 = vpop.permute.xlu1 %1746 }
 0x32b   : > { %v5122_v61 = vadd.f32 %v1768_v37, %v1698_v45  ;;  %v1749_v42 = vrot.slane %v1747_v4, 1 }
 0x32c   : > { %v1819_v3 = vpop.permute.xlu2 %1818 }
 0x32d   : > { %v1709_v56 = vpop.permute.xlu0 %1708  ;;  %v1751_v30 = vsel %vm445_vm15, %v1747_v4, %v1749_v42  ;;  %v1822_v18 = vrot.slane %v1819_v3, 1  ;;  %v2265_v42 = vstv %s5168_s27  ;;  %s5300_s27 = sld [smem:[#allocation10 + $0x66]] }
 0x32e   : > { %v1711_v13 = vrot.slane %v1709_v56, 1  ;;  %v5137_v28 = vadd.f32 %v1751_v30, %v5061_v20  ;;  %v2159_v20 = vmul.f32 %v3287_v19, %v6176_v23  ;;  %v2198_v19 = vmul.f32 %v2197_v0, %v2158_v21 }
 0x32f   : > { %2166 = vrot.lane.b32.xlu1 %v2162_v16, %s3479_s20  ;;  %2146 = vrot.lane.b32.xlu2 %v2142_v47, %s6174_s14  ;;  %v1824_v32 = vsel %vm531_vm0, %v1819_v3, %v1822_v18 }
 0x330   : > { %v1713_v38 = vsel %vm352_vm13, %v1709_v56, %v1711_v13  ;;  %v2181_v5 = vmul.f32 %v2179_v55, %v2159_v20  ;;  %v2163_v31 = vmul.f32 %v2161_v7, %v2159_v20  ;;  %v2217_v13 = vmul.f32 %v2215_v17, %v2159_v20 }
 0x331   : > { %v1717_v29 = vadd.f32 %v1713_v38, %v1643_v57  ;;  %v2199_v30 = vmul.f32 %v2197_v0, %v2159_v20 }
 0x332   : > { %2128 = vrot.lane.b32.xlu0 %v2124_v1, %s6174_s14  ;;  %v1781_v27 = vpop.permute.xlu1 %1780 }
 0x333   : > { %v5145_v58 = vadd.f32 %v1787_v46, %v1717_v29  ;;  %v1784_v12 = vrot.slane %v1781_v27, 1  ;;  %v5201_v29 = vld [vmem:[#allocation2 + $0x3] ss:$4 sm:$0x7] }
 0x334   : > { %v1839_v34 = vpop.permute.xlu2 %1838 }
 0x335   : > { %v1745_v54 = vpop.permute.xlu0 %1744  ;;  %v1786_v24 = vsel %vm445_vm15, %v1781_v27, %v1784_v12  ;;  %v1841_v26 = vrot.slane %v1839_v34, 1  ;;  %v2283_v27 = vstv %s5185_s25  ;;  %s5320_s25 = sld [smem:[#allocation10 + $0x1f]] }
 0x336   : > { %v1748_v33 = vrot.slane %v1745_v54, 1  ;;  %v5156_v6 = vadd.f32 %v1786_v24, %v5087_v51  ;;  %v2284_v24 = vmul.f32 %v2283_v27, %v5201_v29 }
 0x337   : > { %2186 = vrot.lane.b32.xlu1 %v2181_v5, %s3479_s20  ;;  %2168 = vrot.lane.b32.xlu2 %v2163_v31, %s3479_s20  ;;  %v1843_v45 = vsel %vm531_vm0, %v1839_v34, %v1841_v26  ;;  %v2301_v34 = vstv %s5181_s12  ;;  %s5302_s12 = sld [smem:[#allocation10 + $0x8a]] }
 0x338   : > { %v1750_v60 = vsel %vm445_vm15, %v1745_v54, %v1748_v33  ;;  %v2302_v33 = vmul.f32 %v2301_v34, %v5201_v29 }
 0x339   : > { %v1754_v62 = vadd.f32 %v1750_v60, %v5068_v15  ;;  %v2266_v60 = vmul.f32 %v2265_v42, %v5201_v29 }
 0x33a   : > { %2148 = vrot.lane.b32.xlu0 %v2143_v10, %s6174_s14  ;;  %v1803_v2 = vpop.permute.xlu1 %1802 }
 0x33b   : > { %v5163_v44 = vadd.f32 %v1824_v32, %v1754_v62  ;;  %v1805_v51 = vrot.slane %v1803_v2, 1 }
 0x33c   : > { %v1873_v36 = vpop.permute.xlu2 %1872 }
 0x33d   : > { %v1765_v22 = vpop.permute.xlu0 %1764  ;;  %v1807_v15 = vsel %vm531_vm0, %v1803_v2, %v1805_v51  ;;  %v1876_v21 = vrot.slane %v1873_v36, 1 }
 0x33e   : > { %v1767_v52 = vrot.slane %v1765_v22, 1  ;;  %v5172_v53 = vadd.f32 %v1807_v15, %v5104_v14  ;;  %v5183_v14 = vld [vmem:[#allocation2 + $0xf] ss:$4 sm:$0x7] }
 0x33f   : > { %2220 = vrot.lane.b32.xlu1 %v2216_v49, %s3479_s20  ;;  %2202 = vrot.lane.b32.xlu2 %v2198_v19, %s3479_s20  ;;  %v2267_v59 = vmul.f32 %v2265_v42, %v5183_v14  ;;  %v1878_v38 = vsel %vm604_vm14, %v1873_v36, %v1876_v21  ;;  %v2303_v26 = vmul.f32 %v2301_v34, %v5183_v14 }
 0x340   : > { %v1769_v41 = vsel %vm445_vm15, %v1765_v22, %v1767_v52  ;;  %v2319_v22 = vstv %s5206_s7  ;;  %v2285_v15 = vmul.f32 %v2283_v27, %v5183_v14  ;;  %s5335_s7 = sld [smem:[#allocation10 + $0x67]] }
 0x341   : > { %v1773_v11 = vadd.f32 %v1769_v41, %v5095_v48  ;;  %v2321_v0 = vmul.f32 %v2319_v22, %v5183_v14 }
 0x342   : > { %2184 = vrot.lane.b32.xlu0 %v2180_v40, %s3479_s20  ;;  %v1837_v3 = vpop.permute.xlu1 %1836 }
 0x343   : > { %v5179_v8 = vadd.f32 %v1843_v45, %v1773_v11  ;;  %v1840_v48 = vrot.slane %v1837_v3, 1 }
 0x344   : > { %v1893_v37 = vpop.permute.xlu2 %1892 }
 0x345   : > { %v1801_v4 = vpop.permute.xlu0 %1800  ;;  %v1842_v56 = vsel %vm531_vm0, %v1837_v3, %v1840_v48  ;;  %v2339_v3 = vstv %s5224_s8  ;;  %s5372_s8 = sld [smem:[#allocation10 + $0x44]] }
 0x346   : > { %v1804_v63 = vrot.slane %v1801_v4, 1  ;;  %v5191_v39 = vadd.f32 %v1842_v56, %v5122_v61 }
 0x347   : > { %2272 = vrot.lane.b32.xlu1 %v2267_v59, %s6051_s9  ;;  %2222 = vrot.lane.b32.xlu2 %v2217_v13, %s3479_s20  ;;  %v2320_v13 = vmul.f32 %v2319_v22, %v5201_v29 }
 0x348   : > { %v1806_v7 = vsel %vm531_vm0, %v1801_v4, %v1804_v63 }
 0x349   : > { %v1810_v57 = vadd.f32 %v1806_v7, %v5116_v35  ;;  %v1895_v35 = vrot.slane %v1893_v37, 1 }
 0x34a   : > { %2204 = vrot.lane.b32.xlu0 %v2199_v30, %s3479_s20  ;;  %v1857_v61 = vpop.permute.xlu1 %1856 }
 0x34b   : > { %v5199_v16 = vadd.f32 %v1878_v38, %v1810_v57  ;;  %v1859_v46 = vrot.slane %v1857_v61, 1  ;;  %v1897_v5 = vsel %vm604_vm14, %v1893_v37, %v1895_v35  ;;  %v2375_v35 = vstv %s5247_s28  ;;  %s5395_s28 = sld [smem:[#allocation10 + $0x68]] }
 0x34c   : > { %v1927_v47 = vpop.permute.xlu2 %1926 }
 0x34d   : > { %v1821_v1 = vpop.permute.xlu0 %1820  ;;  %v1861_v54 = vsel %vm531_vm0, %v1857_v61, %v1859_v46 }
 0x34e   : > { %v1823_v20 = vrot.slane %v1821_v1, 1  ;;  %v5210_v18 = vadd.f32 %v1861_v54, %v5145_v58 }
 0x34f   : > { %2306 = vrot.lane.b32.xlu1 %v2302_v33, %s6051_s9  ;;  %2288 = vrot.lane.b32.xlu2 %v2284_v24, %s6051_s9 }
 0x350   : > { %v1825_v12 = vsel %vm531_vm0, %v1821_v1, %v1823_v20 }
 0x351   : > { %v1829_v55 = vadd.f32 %v1825_v12, %v5137_v28  ;;  %v1930_v28 = vrot.slane %v1927_v47, 1 }
 0x352   : > { %2270 = vrot.lane.b32.xlu0 %v2266_v60, %s6051_s9  ;;  %v1891_v62 = vpop.permute.xlu1 %1890 }
 0x353   : > { %v5220_v31 = vadd.f32 %v1897_v5, %v1829_v55  ;;  %v1894_v32 = vrot.slane %v1891_v62, 1  ;;  %v1932_v41 = vsel %vm604_vm14, %v1927_v47, %v1930_v28  ;;  %v6178_v47 = vld [vmem:[#allocation21_spill] sm:$0xff] }
 0x354   : > { %v1949_v58 = vpop.permute.xlu2 %1948  ;;  %v2337_v61 = vmul.f32 %v5183_v14, %v6178_v47 }
 0x355   : > { %v1855_v10 = vpop.permute.xlu0 %1854  ;;  %v1896_v2 = vsel %vm604_vm14, %v1891_v62, %v1894_v32  ;;  %v1951_v4 = vrot.slane %v1949_v58, 1 }
 0x356   : > { %v1858_v36 = vrot.slane %v1855_v10, 1  ;;  %v5230_v17 = vadd.f32 %v1896_v2, %v5163_v44  ;;  %v6177_v44 = vld [vmem:[#allocation20_spill] sm:$0xff]  ;;  %v2377_v33 = vmul.f32 %v2375_v35, %v2337_v61  ;;  %v2341_v55 = vmul.f32 %v2339_v3, %v2337_v61 }
 0x357   : > { %2326 = vrot.lane.b32.xlu1 %v2321_v0, %s6051_s9  ;;  %2308 = vrot.lane.b32.xlu2 %v2303_v26, %s6051_s9  ;;  %v2336_v19 = vmul.f32 %v5201_v29, %v6177_v44  ;;  %v1953_v57 = vsel %vm690_vm1, %v1949_v58, %v1951_v4 }
 0x358   : > { %v1860_v51 = vsel %vm531_vm0, %v1855_v10, %v1858_v36  ;;  %v2393_v36 = vstv %s5263_s29  ;;  %s5413_s29 = sld [smem:[#allocation10 + $0x8c]] }
 0x359   : > { %v1864_v52 = vadd.f32 %v1860_v51, %v5156_v6  ;;  %v2357_v6 = vstv %s5222_s30  ;;  %v2340_v7 = vmul.f32 %v2339_v3, %v2336_v19  ;;  %v2376_v44 = vmul.f32 %v2375_v35, %v2336_v19  ;;  %s5354_s30 = sld [smem:[#allocation10 + $0x8b]] }
 0x35a   : > { %2290 = vrot.lane.b32.xlu0 %v2285_v15, %s6051_s9  ;;  %v1911_v40 = vpop.permute.xlu1 %1910  ;;  %v2358_v42 = vmul.f32 %v2357_v6, %v2336_v19  ;;  %v2359_v12 = vmul.f32 %v2357_v6, %v2337_v61 }
 0x35b   : > { %v5240_v49 = vadd.f32 %v1932_v41, %v1864_v52  ;;  %v1913_v37 = vrot.slane %v1911_v40, 1  ;;  %v2394_v52 = vmul.f32 %v2393_v36, %v2336_v19 }
 0x35c   : > { %v1983_v11 = vpop.permute.xlu2 %1982 }
 0x35d   : > { %v1875_v45 = vpop.permute.xlu0 %1874  ;;  %v1915_v21 = vsel %vm604_vm14, %v1911_v40, %v1913_v37  ;;  %v1986_v46 = vrot.slane %v1983_v11, 1 }
 0x35e   : > { %v1877_v48 = vrot.slane %v1875_v45, 1  ;;  %v5251_v56 = vadd.f32 %v1915_v21, %v5179_v8 }
 0x35f   : > { %2362 = vrot.lane.b32.xlu1 %v2358_v42, %s6065_s21  ;;  %2344 = vrot.lane.b32.xlu2 %v2340_v7, %s6065_s21  ;;  %v1988_v60 = vsel %vm690_vm1, %v1983_v11, %v1986_v46  ;;  %v2449_v46 = vstv %s5300_s27  ;;  %s5460_s27 = sld [smem:[#allocation10 + $0x1b]] }
 0x360   : > { %v1879_v63 = vsel %vm604_vm14, %v1875_v45, %v1877_v48  ;;  %v6180_v45 = vld [vmem:[#allocation22_spill] sm:$0xff] }
 0x361   : > { %v1883_v59 = vadd.f32 %v1879_v63, %v5172_v53 }
 0x362   : > { %2324 = vrot.lane.b32.xlu0 %v2320_v13, %s6051_s9  ;;  %v1947_v8 = vpop.permute.xlu1 %1946  ;;  %s5285_s9 = sld [smem:[#allocation10 + $0x42]] }
 0x363   : > { %v5259_v30 = vadd.f32 %v1953_v57, %v1883_v59  ;;  %v1950_v1 = vrot.slane %v1947_v8, 1  ;;  %v2395_v57 = vmul.f32 %v2393_v36, %v2337_v61  ;;  %v2485_v36 = vstv %s5320_s25  ;;  %s5469_s25 = sld [smem:[#allocation10 + $0x69]] }
 0x364   : > { %v2003_v38 = vpop.permute.xlu2 %2002 }
 0x365   : > { %v1909_v53 = vpop.permute.xlu0 %1908  ;;  %v1952_v27 = vsel %vm690_vm1, %v1947_v8, %v1950_v1  ;;  %v2005_v2 = vrot.slane %v2003_v38, 1 }
 0x366   : > { %v1912_v34 = vrot.slane %v1909_v53, 1  ;;  %v5271_v54 = vadd.f32 %v1952_v27, %v5199_v16  ;;  %v6179_v16 = vld [vmem:[#allocation23_spill] sm:$0xff] }
 0x367   : > { %2364 = vrot.lane.b32.xlu2 %v2359_v12, %s6065_s21  ;;  %2382 = vrot.lane.b32.xlu1 %v2377_v33, %s6065_s21  ;;  %v2410_v10 = vmul.f32 %v5201_v29, %v6179_v16  ;;  %v2007_v11 = vsel %vm690_vm1, %v2003_v38, %v2005_v2 }
 0x368   : > { %v1914_v20 = vsel %vm604_vm14, %v1909_v53, %v1912_v34  ;;  %v2431_v21 = vstv %s5285_s9  ;;  %v2467_v34 = vstv %s5302_s12  ;;  %s5440_s9 = sld [smem:[#allocation10 + $0x3f]] }
 0x369   : > { %v1918_v24 = vadd.f32 %v1914_v20, %v5191_v39  ;;  %v2413_v39 = vstv %s5265_s0  ;;  %v2450_v12 = vmul.f32 %v2449_v46, %v2410_v10  ;;  %v2468_v33 = vmul.f32 %v2467_v34, %v2410_v10  ;;  %s5417_s0 = sld [smem:[#allocation10 + $0x21]] }
 0x36a   : > { %2346 = vrot.lane.b32.xlu0 %v2341_v55, %s6065_s21  ;;  %v1967_v62 = vpop.permute.xlu1 %1966  ;;  %v2414_v15 = vmul.f32 %v2413_v39, %v2410_v10  ;;  %v2432_v55 = vmul.f32 %v2431_v21, %v2410_v10  ;;  %s5466_s12 = sld [smem:[#allocation10 + $0x63]] }
 0x36b   : > { %v5278_v5 = vadd.f32 %v1988_v60, %v1918_v24  ;;  %v1969_v28 = vrot.slane %v1967_v62, 1 }
 0x36c   : > { %v2039_v58 = vpop.permute.xlu2 %2038 }
 0x36d   : > { %v1929_v32 = vpop.permute.xlu0 %1928  ;;  %v1971_v51 = vsel %vm690_vm1, %v1967_v62, %v1969_v28  ;;  %v2042_v3 = vrot.slane %v2039_v58, 1 }
 0x36e   : > { %v1931_v22 = vrot.slane %v1929_v32, 1  ;;  %v5289_v26 = vadd.f32 %v1971_v51, %v5220_v31  ;;  %v2411_v31 = vmul.f32 %v5183_v14, %v6180_v45  ;;  %v2487_v51 = vmul.f32 %v2485_v36, %v5183_v14 }
 0x36f   : > { %2398 = vrot.lane.b32.xlu2 %v2394_v52, %s6065_s21  ;;  %2418 = vrot.lane.b32.xlu1 %v2414_v15, %s6098_s11  ;;  %v2044_v38 = vsel %vm776_vm2, %v2039_v58, %v2042_v3 }
 0x370   : > { %v1933_v0 = vsel %vm604_vm14, %v1929_v32, %v1931_v22  ;;  %v2415_v7 = vmul.f32 %v2413_v39, %v2411_v31  ;;  %v2433_v59 = vmul.f32 %v2431_v21, %v2411_v31  ;;  %v2469_v22 = vmul.f32 %v2467_v34, %v2411_v31 }
 0x371   : > { %v1937_v41 = vadd.f32 %v1933_v0, %v5210_v18  ;;  %v2451_v52 = vmul.f32 %v2449_v46, %v2411_v31 }
 0x372   : > { %2380 = vrot.lane.b32.xlu0 %v2376_v44, %s6065_s21  ;;  %v2001_v6 = vpop.permute.xlu1 %2000 }
 0x373   : > { %v5296_v40 = vadd.f32 %v2007_v11, %v1937_v41  ;;  %v2004_v19 = vrot.slane %v2001_v6, 1 }
 0x374   : > { %v2059_v37 = vpop.permute.xlu2 %2058 }
 0x375   : > { %v1965_v18 = vpop.permute.xlu0 %1964  ;;  %v2006_v48 = vsel %vm690_vm1, %v2001_v6, %v2004_v19  ;;  %v2061_v27 = vrot.slane %v2059_v37, 1  ;;  %v2521_v6 = vstv %s5335_s7  ;;  %s5514_s7 = sld [smem:[#allocation10 + $0x87]] }
 0x376   : > { %v1968_v4 = vrot.slane %v1965_v18, 1  ;;  %v5308_v42 = vadd.f32 %v2006_v48, %v5240_v49  ;;  %v2522_v48 = vmul.f32 %v2521_v6, %v5201_v29  ;;  %v2523_v34 = vmul.f32 %v2521_v6, %v5183_v14 }
 0x377   : > { %2420 = vrot.lane.b32.xlu2 %v2415_v7, %s6098_s11  ;;  %2438 = vrot.lane.b32.xlu1 %v2433_v59, %s6098_s11  ;;  %v2063_v60 = vsel %vm776_vm2, %v2059_v37, %v2061_v27 }
 0x378   : > { %v1970_v63 = vsel %vm690_vm1, %v1965_v18, %v1968_v4 }
 0x379   : > { %v1974_v13 = vadd.f32 %v1970_v63, %v5230_v17  ;;  %v2486_v63 = vmul.f32 %v2485_v36, %v5201_v29 }
 0x37a   : > { %2400 = vrot.lane.b32.xlu0 %v2395_v57, %s6065_s21  ;;  %v2023_v53 = vpop.permute.xlu1 %2022  ;;  %s5333_s21 = sld [smem:[#allocation10 + $0x43]] }
 0x37b   : > { %v5315_v8 = vadd.f32 %v2044_v38, %v1974_v13  ;;  %v2025_v49 = vrot.slane %v2023_v53, 1 }
 0x37c   : > { %v2093_v47 = vpop.permute.xlu2 %2092 }
 0x37d   : > { %v1985_v1 = vpop.permute.xlu0 %1984  ;;  %v2027_v17 = vsel %vm776_vm2, %v2023_v53, %v2025_v49 }
 0x37e   : > { %v1987_v35 = vrot.slane %v1985_v1, 1  ;;  %v5324_v20 = vadd.f32 %v2027_v17, %v5259_v30 }
 0x37f   : > { %2454 = vrot.lane.b32.xlu2 %v2450_v12, %s6098_s11  ;;  %2472 = vrot.lane.b32.xlu1 %v2468_v33, %s6098_s11 }
 0x380   : > { %v1989_v61 = vsel %vm690_vm1, %v1985_v1, %v1987_v35  ;;  %v2503_v37 = vstv %s5333_s21  ;;  %v2539_v1 = vstv %s5354_s30  ;;  %s5476_s21 = sld [smem:[#allocation10 + $0x8d]] }
 0x381   : > { %v1993_v24 = vadd.f32 %v1989_v61, %v5251_v56  ;;  %v2096_v56 = vrot.slane %v2093_v47, 1  ;;  %v2504_v4 = vmul.f32 %v2503_v37, %v5201_v29  ;;  %v2541_v27 = vmul.f32 %v2539_v1, %v5183_v14  ;;  %s5518_s30 = sld [smem:[#allocation10 + $0x46]] }
 0x382   : > { %2436 = vrot.lane.b32.xlu0 %v2432_v55, %s6098_s11  ;;  %v2057_v16 = vpop.permute.xlu1 %2056  ;;  %v2505_v17 = vmul.f32 %v2503_v37, %v5183_v14 }
 0x383   : > { %v5331_v58 = vadd.f32 %v2063_v60, %v1993_v24  ;;  %v2060_v32 = vrot.slane %v2057_v16, 1  ;;  %v2098_v15 = vsel %vm849_vm3, %v2093_v47, %v2096_v56 }
 0x384   : > { %v2113_v62 = vpop.permute.xlu2 %2112 }
 0x385   : > { %v2021_v30 = vpop.permute.xlu0 %2020  ;;  %v2062_v28 = vsel %vm776_vm2, %v2057_v16, %v2060_v32  ;;  %v2115_v18 = vrot.slane %v2113_v62, 1  ;;  %v2577_v16 = vstv %s5372_s8  ;;  %s5565_s8 = sld [smem:[#allocation10 + $0x23]] }
 0x386   : > { %v2024_v10 = vrot.slane %v2021_v30, 1  ;;  %v5341_v2 = vadd.f32 %v2062_v28, %v5278_v5 }
 0x387   : > { %2474 = vrot.lane.b32.xlu2 %v2469_v22, %s6098_s11  ;;  %2492 = vrot.lane.b32.xlu1 %v2487_v51, %s6140_s26  ;;  %v2117_v7 = vsel %vm849_vm3, %v2113_v62, %v2115_v18  ;;  %v2540_v51 = vmul.f32 %v2539_v1, %v5201_v29  ;;  %v2595_v18 = vstv %s5395_s28  ;;  %v2633_v1 = vstv %s5417_s0  ;;  %s5568_s28 = sld [smem:[#allocation10 + $0x47]] }
 0x388   : > { %v2026_v39 = vsel %vm776_vm2, %v2021_v30, %v2024_v10  ;;  %s5605_s0 = sld [smem:[#allocation10 + $0x8f]] }
 0x389   : > { %v2030_v0 = vadd.f32 %v2026_v39, %v5271_v54 }
 0x38a   : > { %2456 = vrot.lane.b32.xlu0 %v2451_v52, %s6098_s11  ;;  %v2077_v11 = vpop.permute.xlu1 %2076  ;;  %s5370_s11 = sld [smem:[#allocation10 + $0x20]] }
 0x38b   : > { %v5349_v41 = vadd.f32 %v2098_v15, %v2030_v0  ;;  %v2079_v45 = vrot.slane %v2077_v11, 1  ;;  %v6182_v15 = vld [vmem:[#allocation25_spill] sm:$0xff] }
 0x38c   : > { %v2147_v44 = vpop.permute.xlu2 %2146 }
 0x38d   : > { %v2041_v5 = vpop.permute.xlu0 %2040  ;;  %v2081_v54 = vsel %vm776_vm2, %v2077_v11, %v2079_v45 }
 0x38e   : > { %v2043_v19 = vrot.slane %v2041_v5, 1  ;;  %v5358_v3 = vadd.f32 %v2081_v54, %v5296_v40 }
 0x38f   : > { %2508 = vrot.lane.b32.xlu2 %v2504_v4, %s6140_s26  ;;  %2526 = vrot.lane.b32.xlu1 %v2522_v48, %s6140_s26 }
 0x390   : > { %v2045_v31 = vsel %vm776_vm2, %v2041_v5, %v2043_v19 }
 0x391   : > { %v2049_v21 = vadd.f32 %v2045_v31, %v5289_v26  ;;  %v2150_v26 = vrot.slane %v2147_v44, 1 }
 0x392   : > { %2490 = vrot.lane.b32.xlu0 %v2486_v63, %s6140_s26  ;;  %v2111_v13 = vpop.permute.xlu1 %2110 }
 0x393   : > { %v5368_v59 = vadd.f32 %v2117_v7, %v2049_v21  ;;  %v2114_v38 = vrot.slane %v2111_v13, 1  ;;  %v2152_v61 = vsel %vm849_vm3, %v2147_v44, %v2150_v26 }
 0x394   : > { %v2169_v40 = vpop.permute.xlu2 %2168 }
 0x395   : > { %v2075_v57 = vpop.permute.xlu0 %2074  ;;  %v2116_v53 = vsel %vm849_vm3, %v2111_v13, %v2114_v38  ;;  %v2171_v30 = vrot.slane %v2169_v40, 1  ;;  %v2613_v38 = vstv %s5413_s29  ;;  %s5591_s29 = sld [smem:[#allocation10 + $0x6b]] }
 0x396   : > { %v2078_v47 = vrot.slane %v2075_v57, 1  ;;  %v5378_v46 = vadd.f32 %v2116_v53, %v5315_v8  ;;  %v6181_v8 = vld [vmem:[#allocation24_spill] sm:$0xff] }
 0x397   : > { %2528 = vrot.lane.b32.xlu2 %v2523_v34, %s6140_s26  ;;  %2546 = vrot.lane.b32.xlu1 %v2541_v27, %s6140_s26  ;;  %v2556_v33 = vmul.f32 %v5201_v29, %v6181_v8  ;;  %v2173_v0 = vsel %vm935_vm4, %v2169_v40, %v2171_v30  ;;  %v2233_v8 = vld [vmem:[#allocation2 + $0x3] ss:$4 sm:$0x3] }
 0x398   : > { %v2080_v49 = vsel %vm776_vm2, %v2075_v57, %v2078_v47 }
 0x399   : > { %v2084_v35 = vadd.f32 %v2080_v49, %v5308_v42  ;;  %v2559_v42 = vstv %s5370_s11  ;;  %v2578_v39 = vmul.f32 %v2577_v16, %v2556_v33  ;;  %s5521_s11 = sld [smem:[#allocation10 + $0x6a]] }
 0x39a   : > { %2510 = vrot.lane.b32.xlu0 %v2505_v17, %s6140_s26  ;;  %v2131_v55 = vpop.permute.xlu1 %2130  ;;  %v2560_v36 = vmul.f32 %v2559_v42, %v2556_v33  ;;  %v2596_v17 = vmul.f32 %v2595_v18, %v2556_v33 }
 0x39b   : > { %v5388_v12 = vadd.f32 %v2152_v61, %v2084_v35  ;;  %v2133_v62 = vrot.slane %v2131_v55, 1 }
 0x39c   : > { %v2203_v24 = vpop.permute.xlu2 %2202 }
 0x39d   : > { %v2095_v60 = vpop.permute.xlu0 %2094  ;;  %v2135_v56 = vsel %vm849_vm3, %v2131_v55, %v2133_v62  ;;  %v2206_v45 = vrot.slane %v2203_v24, 1  ;;  %v5463_v62 = vmul.f32 %v2233_v8, %v6164_v50 }
 0x39e   : > { %v2097_v32 = vrot.slane %v2095_v60, 1  ;;  %v5399_v28 = vadd.f32 %v2135_v56, %v5331_v58  ;;  %v5411_v58 = vmul.f32 %v5183_v14, %v6182_v15 }
 0x39f   : > { %2564 = vrot.lane.b32.xlu2 %v2560_v36, %s6159_s6  ;;  %2582 = vrot.lane.b32.xlu1 %v2578_v39, %s6159_s6  ;;  %v2208_v63 = vsel %vm935_vm4, %v2203_v24, %v2206_v45  ;;  %v6183_v24 = vld [vmem:[#allocation26_spill] sm:$0xff] }
 0x3a0   : > { %v2099_v10 = vsel %vm849_vm3, %v2095_v60, %v2097_v32  ;;  %v2579_v31 = vmul.f32 %v2577_v16, %v5411_v58  ;;  %v2597_v4 = vmul.f32 %v2595_v18, %v5411_v58  ;;  %v2561_v21 = vmul.f32 %v2559_v42, %v5411_v58  ;;  %v2235_v60 = vld [vmem:[#allocation2 + $0xf] ss:$4 sm:$0x3] }
 0x3a1   : > { %v2103_v22 = vadd.f32 %v2099_v10, %v5324_v20  ;;  %v5455_v55 = vmul.f32 %v5183_v14, %v6183_v24  ;;  %v2245_v32 = vstv %s5440_s9  ;;  %v5474_v39 = vmul.f32 %v2235_v60, %v6173_v9 }
 0x3a2   : > { %2544 = vrot.lane.b32.xlu0 %v2540_v51, %s6140_s26  ;;  %v2167_v11 = vpop.permute.xlu1 %2166  ;;  %s5438_s26 = sld [smem:[#allocation10 + $0x45]]  ;;  %v2246_v15 = vmul.f32 %v2245_v32, %v5463_v62 }
 0x3a3   : > { %v5406_v52 = vadd.f32 %v2173_v0, %v2103_v22  ;;  %v2170_v5 = vrot.slane %v2167_v11, 1  ;;  %v2635_v36 = vmul.f32 %v2633_v1, %v5455_v55 }
 0x3a4   : > { %v2223_v44 = vpop.permute.xlu2 %2222 }
 0x3a5   : > { %v2129_v20 = vpop.permute.xlu0 %2128  ;;  %v2172_v6 = vsel %vm935_vm4, %v2167_v11, %v2170_v5  ;;  %v2225_v26 = vrot.slane %v2223_v44, 1  ;;  %v2615_v11 = vmul.f32 %v2613_v38, %v5411_v58 }
 0x3a6   : > { %v2132_v37 = vrot.slane %v2129_v20, 1  ;;  %v5421_v54 = vadd.f32 %v2172_v6, %v5349_v41  ;;  %v5435_v41 = vmul.f32 %v5201_v29, %v6172_v25  ;;  %v2614_v25 = vmul.f32 %v2613_v38, %v2556_v33 }
 0x3a7   : > { %2584 = vrot.lane.b32.xlu2 %v2579_v31, %s6159_s6  ;;  %2602 = vrot.lane.b32.xlu1 %v2597_v4, %s6159_s6  ;;  %v2227_v61 = vsel %vm935_vm4, %v2223_v44, %v2225_v26  ;;  %v2669_v31 = vstv %s5469_s25  ;;  %v2251_v4 = vstv %s5466_s12  ;;  %s5743_s12 = sld [smem:[#allocation11 + $0x2]]  ;;  %s3187_s25 = sshll.u32 %s3528_s19, 4 }
 0x3a8   : > { %v2134_v19 = vsel %vm849_vm3, %v2129_v20, %v2132_v37  ;;  %v2634_v27 = vmul.f32 %v2633_v1, %v5435_v41  ;;  %v2651_v30 = vstv %s5438_s26  ;;  %v2253_v38 = vmul.f32 %v2251_v4, %v5474_v39  ;;  %s6186_s26 = sshll.u32 %s3608_s5, 4 }
 0x3a9   : > { %v2138_v48 = vadd.f32 %v2134_v19, %v5341_v2  ;;  %v2653_v0 = vmul.f32 %v2651_v30, %v5455_v55  ;;  %v2652_v26 = vmul.f32 %v2651_v30, %v5435_v41  ;;  %s5709_s9 = scalar_lea.vmem [#allocation12], %s6186_s26 }
 0x3aa   : > { %2566 = vrot.lane.b32.xlu0 %v2561_v21, %s6159_s6  ;;  %v2187_v13 = vpop.permute.xlu1 %2186  ;;  %v2670_v21 = vmul.f32 %v2669_v31, %v5435_v41  ;;  %s2899_s19 = sshll.u32 %s5709_s9, 4  ;;  %s2900_s19 = int_to_ptr.vmem [resolvable:$true] %s2899_s19 }
 0x3ab   : > { %v5430_v7 = vadd.f32 %v2208_v63, %v2138_v48  ;;  %v2189_v57 = vrot.slane %v2187_v13, 1  ;;  %v2687_v63 = vstv %s5476_s21 }
 0x3ac   : > { %v2289_v40 = vpop.permute.xlu2 %2288 }
 0x3ad   : > { %v2149_v2 = vpop.permute.xlu0 %2148  ;;  %v2191_v53 = vsel %vm935_vm4, %v2187_v13, %v2189_v57  ;;  %v2292_v50 = vrot.slane %v2289_v40, 1  ;;  %v2688_v57 = vmul.f32 %v2687_v63, %v5435_v41 }
 0x3ae   : > { %v2151_v47 = vrot.slane %v2149_v2, 1  ;;  %v5446_v34 = vadd.f32 %v2191_v53, %v5368_v59 }
 0x3af   : > { %2618 = vrot.lane.b32.xlu2 %v2614_v25, %s6159_s6  ;;  %2638 = vrot.lane.b32.xlu1 %v2634_v27, %s6171_s10  ;;  %v2294_v20 = vsel %vm352_vm13, %v2289_v40, %v2292_v50 }
 0x3b0   : > { %v2153_v49 = vsel %vm849_vm3, %v2149_v2, %v2151_v47 }
 0x3b1   : > { %v2157_v35 = vadd.f32 %v2153_v49, %v5358_v3  ;;  %v2252_v49 = vmul.f32 %v2251_v4, %v5463_v62 }
 0x3b2   : > { %2600 = vrot.lane.b32.xlu0 %v2596_v17, %s6159_s6  ;;  %v2221_v33 = vpop.permute.xlu1 %2220 }
 0x3b3   : > { %v5457_v59 = vadd.f32 %v2227_v61, %v2157_v35  ;;  %v2224_v16 = vrot.slane %v2221_v33, 1  ;;  %v2254_v8 = vadd.f32 %v2252_v49, %v5430_v7 }
 0x3b4   : > { %v2309_v3 = vpop.permute.xlu2 %2308 }
 0x3b5   : > { %v2185_v42 = vpop.permute.xlu0 %2184  ;;  %v2226_v10 = vsel %vm935_vm4, %v2221_v33, %v2224_v16  ;;  %v2311_v40 = vrot.slane %v2309_v3, 1  ;;  %v2689_v16 = vmul.f32 %v2687_v63, %v5455_v55 }
 0x3b6   : > { %v2188_v56 = vrot.slane %v2185_v42, 1  ;;  %v5480_v51 = vadd.f32 %v2226_v10, %v5388_v12  ;;  %v2239_v12 = vstv %s5460_s27  ;;  %v2671_v10 = vmul.f32 %v2669_v31, %v5455_v55  ;;  %s5723_s27 = sld [smem:[#allocation11 + $0x3]] }
 0x3b7   : > { %2640 = vrot.lane.b32.xlu2 %v2635_v36, %s6171_s10  ;;  %2658 = vrot.lane.b32.xlu1 %v2653_v0, %s6171_s10  ;;  %v2241_v45 = vmul.f32 %v2239_v12, %v5474_v39  ;;  %v2313_v53 = vsel %vm352_vm13, %v2309_v3, %v2311_v40 }
 0x3b8   : > { %v2190_v22 = vsel %vm935_vm4, %v2185_v42, %v2188_v56 }
 0x3b9   : > { %v2194_v44 = vadd.f32 %v2190_v22, %v5378_v46  ;;  %v2243_v19 = vadd.f32 %v2241_v45, %v5406_v52 }
 0x3ba   : > { %2620 = vrot.lane.b32.xlu0 %v2615_v11, %s6159_s6  ;;  %v2273_v37 = vpop.permute.xlu1 %2272  ;;  %s5502_s6 = sld [smem:[#allocation10 + $0x22]]  ;;  %v2723_v11 = vstv %s5518_s30 }
 0x3bb   : > { %v2248_v9 = vadd.f32 %v2246_v15, %v2194_v44  ;;  %v2275_v6 = vrot.slane %v2273_v37, 1  ;;  %v2247_v15 = vmul.f32 %v2245_v32, %v5474_v39  ;;  %v2724_v32 = vmul.f32 %v2723_v11, %v5201_v29 }
 0x3bc   : > { %v2345_v5 = vpop.permute.xlu2 %2344  ;;  %v2725_v49 = vmul.f32 %v2723_v11, %v5183_v14 }
 0x3bd   : > { %v2205_v46 = vpop.permute.xlu0 %2204  ;;  %v5494_v18 = vadd.f32 %v2294_v20, %v2248_v9  ;;  %v2277_v48 = vsel %vm352_vm13, %v2273_v37, %v2275_v6  ;;  %v2348_v17 = vrot.slane %v2345_v5, 1  ;;  %v2741_v9 = vstv %s5521_s11  ;;  %s2886_s11 = scalar_lea.sflag [#allocation5], %s3608_s5 }
 0x3be   : > { %v2207_v58 = vrot.slane %v2205_v46, 1  ;;  %v5505_v2 = vadd.f32 %v2277_v48, %v2243_v19  ;;  %v2249_v45 = vadd.f32 %v2247_v15, %v5446_v34 }
 0x3bf   : > { %2674 = vrot.lane.b32.xlu2 %v2670_v21, %s6171_s10  ;;  %2692 = vrot.lane.b32.xlu1 %v2688_v57, %s6171_s10  ;;  %v2350_v7 = vsel %vm445_vm15, %v2345_v5, %v2348_v17 }
 0x3c0   : > { %v2209_v13 = vsel %vm935_vm4, %v2205_v46, %v2207_v58  ;;  %v2705_v33 = vstv %s5502_s6 }
 0x3c1   : > { %v2213_v52 = vadd.f32 %v2209_v13, %v5399_v28  ;;  %v2240_v28 = vmul.f32 %v2239_v12, %v5463_v62  ;;  %v2707_v30 = vmul.f32 %v2705_v33, %v5183_v14  ;;  %v2706_v19 = vmul.f32 %v2705_v33, %v5201_v29 }
 0x3c2   : > { %2656 = vrot.lane.b32.xlu0 %v2652_v26, %s6171_s10  ;;  %v2307_v25 = vpop.permute.xlu1 %2306 }
 0x3c3   : > { %v2255_v47 = vadd.f32 %v2253_v38, %v2213_v52  ;;  %v2310_v27 = vrot.slane %v2307_v25, 1  ;;  %v2242_v24 = vadd.f32 %v2240_v28, %v5421_v54  ;;  %v2257_v54 = vstv %s5514_s7  ;;  %s2898_s7 = scalar_lea.hbm %s5841_s4, %s3187_s25 }
 0x3c4   : > { %v2365_v1 = vpop.permute.xlu2 %2364  ;;  %v2259_v22 = vmul.f32 %v2257_v54, %v5474_v39  ;;  %v2742_v39 = vmul.f32 %v2741_v9, %v5201_v29  ;;  %v2258_v48 = vmul.f32 %v2257_v54, %v5463_v62  ;;  %v2743_v62 = vmul.f32 %v2741_v9, %v5183_v14  ;;  %s2901_s30 = sshll.u32 %s2898_s7, 4  ;;  %s2902_s30 = int_to_ptr.hbm [resolvable:$true] %s2901_s30 }
 0x3c5   : > { %v2271_v41 = vpop.permute.xlu0 %2270  ;;  %v5523_v35 = vadd.f32 %v2313_v53, %v2255_v47  ;;  %v2312_v3 = vsel %vm352_vm13, %v2307_v25, %v2310_v27  ;;  %v2367_v12 = vrot.slane %v2365_v1, 1 }
 0x3c6   : > { %v2274_v61 = vrot.slane %v2271_v41, 1  ;;  %v5530_v42 = vadd.f32 %v2312_v3, %v2254_v8  ;;  %v2261_v5 = vadd.f32 %v2259_v22, %v5457_v59  ;;  %v2260_v57 = vadd.f32 %v2258_v48, %v5480_v51 }
 0x3c7   : > { %2694 = vrot.lane.b32.xlu2 %v2689_v16, %s6171_s10  ;;  %2712 = vrot.lane.b32.xlu1 %v2707_v30, %s6174_s14  ;;  %v2369_v31 = vsel %vm445_vm15, %v2365_v1, %v2367_v12  ;;  %v2797_v8 = vstv %s5568_s28 }
 0x3c8   : > { %v2276_v60 = vsel %vm352_vm13, %v2271_v41, %v2274_v61  ;;  %v2779_v61 = vstv %s5565_s8 }
 0x3c9   : > { %v2280_v56 = vadd.f32 %v2276_v60, %v2242_v24 }
 0x3ca   : > { %2676 = vrot.lane.b32.xlu0 %v2671_v10, %s6171_s10  ;;  %v2327_v0 = vpop.permute.xlu1 %2326  ;;  %s5551_s10 = sld [smem:[#allocation10 + $0x8e]] }
 0x3cb   : > { %v5540_v36 = vadd.f32 %v2350_v7, %v2280_v56  ;;  %v2329_v55 = vrot.slane %v2327_v0, 1 }
 0x3cc   : > { %v2399_v50 = vpop.permute.xlu2 %2398 }
 0x3cd   : > { %v2291_v44 = vpop.permute.xlu0 %2290  ;;  %v2331_v37 = vsel %vm352_vm13, %v2327_v0, %v2329_v55  ;;  %v2402_v40 = vrot.slane %v2399_v50, 1  ;;  %v2815_v55 = vstv %s5591_s29 }
 0x3ce   : > { %v2293_v20 = vrot.slane %v2291_v44, 1  ;;  %v5554_v6 = vadd.f32 %v2331_v37, %v2261_v5 }
 0x3cf   : > { %2728 = vrot.lane.b32.xlu2 %v2724_v32, %s6174_s14  ;;  %2746 = vrot.lane.b32.xlu1 %v2742_v39, %s6174_s14  ;;  %v2404_v25 = vsel %vm445_vm15, %v2399_v50, %v2402_v40 }
 0x3d0   : > { %v2295_v46 = vsel %vm352_vm13, %v2291_v44, %v2293_v20  ;;  %v2759_v52 = vstv %s5551_s10  ;;  %s3392_s10 = sshra.s32 %s2902_s30, 4  ;;  %s3393_s10 = int_to_ptr.hbm [resolvable:$true] %s3392_s10 }
 0x3d1   : > { %v2299_v58 = vadd.f32 %v2295_v46, %v2249_v45  ;;  %v2761_v53 = vmul.f32 %v2759_v52, %v5183_v14  ;;  %v2760_v10 = vmul.f32 %v2759_v52, %v5201_v29  ;;  %s3394_s8 = scalar_lea.hbm %s3393_s10, 16  ;;  %p3399_p11 = scmp.lt.s32.totalorder %s3393_s10, %s5841_s4 }
 0x3d2   : > { %2710 = vrot.lane.b32.xlu0 %v2706_v19, %s6174_s14  ;;  %v2363_v4 = vpop.permute.xlu1 %2362  ;;  %p3395_p1 = scmp.ne.s32.totalorder %s3393_s10, %s3394_s8 }
 0x3d3   : > { %v5563_v34 = vadd.f32 %v2369_v31, %v2299_v58  ;;  %v2366_v63 = vrot.slane %v2363_v4, 1 }
 0x3d4   : > { %v2421_v59 = vpop.permute.xlu2 %2420  ;;  %p3396_p4 = pnand %p3395_p1, %p3580_p7 }
 0x3d5   : > { %v2325_v21 = vpop.permute.xlu0 %2324  ;;  %v2368_v38 = vsel %vm445_vm15, %v2363_v4, %v2366_v63  ;;  %v2423_v24 = vrot.slane %v2421_v59, 1 }
 0x3d6   : > { %v2328_v13 = vrot.slane %v2325_v21, 1  ;;  %v5575_v47 = vadd.f32 %v2368_v38, %v5494_v18  ;;  %v2776_v18 = vmul.f32 %v5201_v29, %v6175_v43  ;;  %p3397_p8 = pneg %p3396_p4 }
 0x3d7   : > { %2748 = vrot.lane.b32.xlu2 %v2743_v62, %s6174_s14  ;;  %2766 = vrot.lane.b32.xlu1 %v2761_v53, %s6174_s14  ;;  %v2425_v7 = vsel %vm531_vm0, %v2421_v59, %v2423_v24 }
 0x3d8   : > { %v2330_v26 = vsel %vm352_vm13, %v2325_v21, %v2328_v13  ;;  %v2780_v30 = vmul.f32 %v2779_v61, %v2776_v18  ;;  %v2798_v56 = vmul.f32 %v2797_v8, %v2776_v18  ;;  %v2816_v21 = vmul.f32 %v2815_v55, %v2776_v18 }
 0x3d9   : > { %v2334_v1 = vadd.f32 %v2330_v26, %v2260_v57 }
 0x3da   : > { %2730 = vrot.lane.b32.xlu0 %v2725_v49, %s6174_s14  ;;  %v2383_v41 = vpop.permute.xlu1 %2382 }
 0x3db   : > { %v5584_v51 = vadd.f32 %v2404_v25, %v2334_v1  ;;  %v2385_v17 = vrot.slane %v2383_v41, 1 }
 0x3dc   : > { %v2455_v28 = vpop.permute.xlu2 %2454 }
 0x3dd   : > { %v2347_v27 = vpop.permute.xlu0 %2346  ;;  %v2387_v33 = vsel %vm445_vm15, %v2383_v41, %v2385_v17 }
 0x3de   : > { %v2349_v3 = vrot.slane %v2347_v27, 1  ;;  %v5595_v16 = vadd.f32 %v2387_v33, %v5523_v35  ;;  %v2777_v35 = vmul.f32 %v5183_v14, %v6176_v23 }
 0x3df   : > { %2784 = vrot.lane.b32.xlu2 %v2780_v30, %s3479_s20  ;;  %2802 = vrot.lane.b32.xlu1 %v2798_v56, %s3479_s20 }
 0x3e0   : > { %v2351_v60 = vsel %vm445_vm15, %v2347_v27, %v2349_v3  ;;  %v2799_v12 = vmul.f32 %v2797_v8, %v2777_v35  ;;  %v2817_v20 = vmul.f32 %v2815_v55, %v2777_v35  ;;  %v2781_v14 = vmul.f32 %v2779_v61, %v2777_v35 }
 0x3e1   : > { %v2355_v43 = vadd.f32 %v2351_v60, %v5505_v2  ;;  %v2458_v2 = vrot.slane %v2455_v28, 1 }
 0x3e2   : > { %2764 = vrot.lane.b32.xlu0 %v2760_v10, %s6174_s14  ;;  %v2419_v22 = vpop.permute.xlu1 %2418  ;;  %s5690_s14 = sld [smem:[#allocation11 + $0x1]] }
 0x3e3   : > { %v2429_v54 = vadd.f32 %v2425_v7, %v2355_v43  ;;  %v2422_v15 = vrot.slane %v2419_v22, 1  ;;  %v2460_v5 = vsel %vm531_vm0, %v2455_v28, %v2458_v2 }
 0x3e4   : > { %v2475_v50 = vpop.permute.xlu2 %2474 }
 0x3e5   : > { %v2381_v0 = vpop.permute.xlu0 %2380  ;;  %v2424_v44 = vsel %vm531_vm0, %v2419_v22, %v2422_v15  ;;  %v2477_v58 = vrot.slane %v2475_v50, 1 }
 0x3e6   : > { %v2384_v29 = vrot.slane %v2381_v0, 1  ;;  %v5611_v9 = vadd.f32 %v2424_v44, %v5540_v36  ;;  %v2833_v36 = vstv %s5605_s0  ;;  %s3398_s0 = scalar_lea.hbm %s5841_s4, 32 }
 0x3e7   : > { %2804 = vrot.lane.b32.xlu2 %v2799_v12, %s3479_s20  ;;  %2822 = vrot.lane.b32.xlu1 %v2817_v20, %s3479_s20  ;;  %v2834_v4 = vmul.f32 %v2833_v36, %v2776_v18  ;;  %v2479_v63 = vsel %vm531_vm0, %v2475_v50, %v2477_v58  ;;  %v2835_v49 = vmul.f32 %v2833_v36, %v2777_v35  ;;  %p3400_p9 = scmp.lt.s32.totalorder %s3398_s0, %s3394_s8 }
 0x3e8   : > { %v2386_v11 = vsel %vm445_vm15, %v2381_v0, %v2384_v29 }
 0x3e9   : > { %v2390_v23 = vadd.f32 %v2386_v11, %v5530_v42  ;;  %p3401_p2 = por %p3400_p9, %p3399_p11 }
 0x3ea   : > { %2786 = vrot.lane.b32.xlu0 %v2781_v14, %s3479_s20  ;;  %v2439_v46 = vpop.permute.xlu1 %2438 }
 0x3eb   : > { %v2464_v45 = vadd.f32 %v2460_v5, %v2390_v23  ;;  %v2441_v39 = vrot.slane %v2439_v46, 1  ;;  %p3402_p10 = pnand %p3401_p2, %p3397_p8 }
 0x3ec   : > { %v2509_v37 = vpop.permute.xlu2 %2508 }
 0x3ed   : > { %v2401_v32 = vpop.permute.xlu0 %2400  ;;  %v2443_v31 = vsel %vm531_vm0, %v2439_v46, %v2441_v39  ;;  %v2512_v26 = vrot.slane %v2509_v37, 1 }
 0x3ee   : > { %v2403_v19 = vrot.slane %v2401_v32, 1  ;;  %v5622_v59 = vadd.f32 %v2443_v31, %v5563_v34 }
 0x3ef   : > { %2838 = vrot.lane.b32.xlu2 %v2834_v4, %s3479_s20  ;;  %v2514_v25 = vsel %vm604_vm14, %v2509_v37, %v2512_v26 }
 0x3f0   : > { %v2405_v42 = vsel %vm445_vm15, %v2401_v32, %v2403_v19 }
 0x3f1   : > { %v2409_v48 = vadd.f32 %v2405_v42, %v5554_v6 }
 0x3f2   : > { %2820 = vrot.lane.b32.xlu0 %v2816_v21, %s3479_s20  ;;  %v2473_v57 = vpop.permute.xlu1 %2472 }
 0x3f3   : > { %v2483_v40 = vadd.f32 %v2479_v63, %v2409_v48  ;;  %v2476_v52 = vrot.slane %v2473_v57, 1 }
 0x3f4   : > { %v2529_v13 = vpop.permute.xlu2 %2528 }
 0x3f5   : > { %v2437_v38 = vpop.permute.xlu0 %2436  ;;  %v2478_v34 = vsel %vm531_vm0, %v2473_v57, %v2476_v52  ;;  %v2531_v61 = vrot.slane %v2529_v13, 1 }
 0x3f6   : > { %v2440_v62 = vrot.slane %v2437_v38, 1  ;;  %v5631_v6 = vadd.f32 %v2478_v34, %v5584_v51 }
 0x3f7   : > { %v2533_v33 = vsel %vm604_vm14, %v2529_v13, %v2531_v61 }
 0x3f8   : > { %v2442_v53 = vsel %vm531_vm0, %v2437_v38, %v2440_v62 }
 0x3f9   : > { %v2446_v1 = vadd.f32 %v2442_v53, %v5575_v47 }
 0x3fa   : > { %2840 = vrot.lane.b32.xlu0 %v2835_v49, %s3479_s20  ;;  %v2493_v41 = vpop.permute.xlu1 %2492  ;;  %s5680_s20 = sld [smem:[#allocation11]] }
 0x3fb   : > { %v5636_v18 = vadd.f32 %v2514_v25, %v2446_v1  ;;  %v2495_v17 = vrot.slane %v2493_v41, 1  ;;  %v2854_v25 = vlaneseq }
 0x3fc   : > { %v2565_v28 = vpop.permute.xlu2 %2564 }
 0x3fd   : > { %v2457_v27 = vpop.permute.xlu0 %2456  ;;  %v2497_v24 = vsel %vm604_vm14, %v2493_v41, %v2495_v17  ;;  %v2568_v4 = vrot.slane %v2565_v28, 1  ;;  %vm5697_vm5 = vcmp.lt.s32.totalorder %v2854_v25, 256 }
 0x3fe   : > { %v2459_v8 = vrot.slane %v2457_v27, 1  ;;  %v5640_v3 = vadd.f32 %v2497_v24, %v2429_v54 }
 0x400   : > { %v2461_v51 = vsel %vm531_vm0, %v2457_v27, %v2459_v8  ;;  %v2851_v24 = vstv %s5680_s20 }
 0x401   : > { %v2465_v47 = vadd.f32 %v2461_v51, %v5595_v16 }
 0x402   : > { %v2527_v56 = vpop.permute.xlu1 %2526 }
 0x403   : > { %v5644_v60 = vadd.f32 %v2533_v33, %v2465_v47  ;;  %v2530_v10 = vrot.slane %v2527_v56, 1 }
 0x404   : > { %v2585_v30 = vpop.permute.xlu2 %2584 }
 0x405   : > { %v2491_v43 = vpop.permute.xlu0 %2490  ;;  %v2532_v7 = vsel %vm604_vm14, %v2527_v56, %v2530_v10  ;;  %v2587_v1 = vrot.slane %v2585_v30, 1 }
 0x406   : > { %v5647_v35 = vadd.f32 %v2532_v7, %v2464_v45  ;;  %v2494_v36 = vrot.slane %v2491_v43, 1 }
 0x407   : > { %v2589_v33 = vsel %vm690_vm1, %v2585_v30, %v2587_v1 }
 0x408   : > { %v2496_v31 = vsel %vm604_vm14, %v2491_v43, %v2494_v36 }
 0x409   : > { %v2500_v21 = vadd.f32 %v2496_v31, %v5611_v9 }
 0x40a   : > { %v2547_v22 = vpop.permute.xlu1 %2546 }
 0x40b   : > { %v2549_v54 = vrot.slane %v2547_v22, 1 }
 0x40c   : > { %v5649_v50 = vpop.permute.xlu2 %2618 }
 0x40d   : > { %v2511_v0 = vpop.permute.xlu0 %2510  ;;  %v2551_v15 = vsel %vm604_vm14, %v2547_v22, %v2549_v54  ;;  %v2622_v30 = vrot.slane %v5649_v50, 1 }
 0x40e   : > { %v5652_v16 = vadd.f32 %v2551_v15, %v2483_v40  ;;  %v2513_v63 = vrot.slane %v2511_v0, 1  ;;  %v2570_v40 = vsel %vm690_vm1, %v2565_v28, %v2568_v4 }
 0x40f   : > { %v2574_v38 = vadd.f32 %v2570_v40, %v2500_v21 }
 0x410   : > { %v2515_v26 = vsel %vm604_vm14, %v2511_v0, %v2513_v63 }
 0x411   : > { %v2519_v41 = vadd.f32 %v2515_v26, %v5622_v59 }
 0x412   : > { %v2583_v29 = vpop.permute.xlu1 %2582 }
 0x413   : > { %v2586_v27 = vrot.slane %v2583_v29, 1  ;;  %v2593_v22 = vadd.f32 %v2589_v33, %v2519_v41 }
 0x414   : > { %v5654_v2 = vpop.permute.xlu2 %2640 }
 0x415   : > { %v2545_v44 = vpop.permute.xlu0 %2544  ;;  %v2588_v7 = vsel %vm690_vm1, %v2583_v29, %v2586_v27 }
 0x416   : > { %v2548_v28 = vrot.slane %v2545_v44, 1 }
 0x418   : > { %v2550_v10 = vsel %vm604_vm14, %v2545_v44, %v2548_v28  ;;  %v2592_v44 = vadd.f32 %v2588_v7, %v5636_v18 }
 0x419   : > { %v2554_v29 = vadd.f32 %v2550_v10, %v5631_v6  ;;  %v2624_v6 = vsel %vm690_vm1, %v5649_v50, %v2622_v30 }
 0x41a   : > { %v5658_v11 = vpop.permute.xlu1 %2602 }
 0x41b   : > { %v2605_v4 = vrot.slane %v5658_v11, 1  ;;  %v2628_v26 = vadd.f32 %v2624_v6, %v2554_v29 }
 0x41c   : > { %v5656_v55 = vpop.permute.xlu2 %2674 }
 0x41d   : > { %v5660_v12 = vpop.permute.xlu0 %2566 }
 0x41e   : > { %v2569_v21 = vrot.slane %v5660_v12, 1 }
 0x420   : > { %v2571_v50 = vsel %vm690_vm1, %v5660_v12, %v2569_v21 }
 0x422   : > { %v2639_v23 = vpop.permute.xlu1 %2638 }
 0x423   : > { %v2642_v48 = vrot.slane %v2639_v23, 1 }
 0x424   : > { %v5662_v20 = vpop.permute.xlu2 %2694 }
 0x425   : > { %v5664_v14 = vpop.permute.xlu0 %2600  ;;  %v2644_v13 = vsel %vm776_vm2, %v2639_v23, %v2642_v48 }
 0x426   : > { %v2648_v53 = vadd.f32 %v2644_v13, %v2574_v38  ;;  %v2862_v13 = vstv %s5690_s14  ;;  %v2604_v33 = vrot.slane %v5664_v14, 1 }
 0x42a   : > { %v2659_v45 = vpop.permute.xlu1 %2658 }
 0x42b   : > { %v2661_v49 = vrot.slane %v2659_v45, 1 }
 0x42c   : > { %v5666_v5 = vpop.permute.xlu2 %2728 }
 0x42d   : > { %v5668_v37 = vpop.permute.xlu0 %2620  ;;  %v2663_v56 = vsel %vm776_vm2, %v2659_v45, %v2661_v49  ;;  %v2732_v48 = vrot.slane %v5666_v5, 1 }
 0x42e   : > { %v2667_v45 = vadd.f32 %v2663_v56, %v2593_v22 }
 0x42f   : > { %v2734_v1 = vsel %vm849_vm3, %v5666_v5, %v2732_v48 }
 0x432   : > { %v5670_v46 = vpop.permute.xlu1 %2692 }
 0x433   : > { %v2696_v31 = vrot.slane %v5670_v46, 1 }
 0x434   : > { %v5672_v32 = vpop.permute.xlu2 %2748 }
 0x435   : > { %v2657_v39 = vpop.permute.xlu0 %2656 }
 0x436   : > { %v2660_v51 = vrot.slane %v2657_v39, 1 }
 0x438   : > { %v2662_v36 = vsel %vm776_vm2, %v2657_v39, %v2660_v51 }
 0x439   : > { %v2666_v63 = vadd.f32 %v2662_v36, %v2592_v44  ;;  %v2606_v44 = vsel %vm690_vm1, %v5664_v14, %v2604_v33 }
 0x43a   : > { %v5674_v58 = vpop.permute.xlu1 %2712  ;;  %v2610_v14 = vadd.f32 %v2606_v44, %v5647_v35 }
 0x43b   : > { %v2738_v27 = vadd.f32 %v2734_v1, %v2666_v63  ;;  %v2715_v5 = vrot.slane %v5674_v58, 1 }
 0x43c   : > { %v2785_v42 = vpop.permute.xlu2 %2784 }
 0x43d   : > { %v5676_v19 = vpop.permute.xlu0 %2676  ;;  %v2788_v62 = vrot.slane %v2785_v42, 1 }
 0x43e   : > { %v2679_v18 = vrot.slane %v5676_v19, 1 }
 0x43f   : > { %v2790_v8 = vsel %vm935_vm4, %v2785_v42, %v2788_v62  ;;  %v2698_v62 = vsel %vm776_vm2, %v5670_v46, %v2696_v31 }
 0x440   : > { %v2681_v46 = vsel %vm776_vm2, %v5676_v19, %v2679_v18  ;;  %v2751_v19 = vrot.slane %v5672_v32, 1 }
 0x442   : > { %v5684_v57 = vpop.permute.xlu1 %2746 }
 0x443   : > { %v2750_v48 = vrot.slane %v5684_v57, 1 }
 0x444   : > { %v2805_v17 = vpop.permute.xlu2 %2804 }
 0x445   : > { %v2711_v52 = vpop.permute.xlu0 %2710  ;;  %v2807_v15 = vrot.slane %v2805_v17, 1 }
 0x446   : > { %v2714_v34 = vrot.slane %v2711_v52, 1 }
 0x447   : > { %v2809_v40 = vsel %vm935_vm4, %v2805_v17, %v2807_v15  ;;  %v2643_v17 = vrot.slane %v5654_v2, 1  ;;  %v2717_v15 = vsel %vm849_vm3, %v5674_v58, %v2715_v5  ;;  %v2870_v58 = vstv %s5743_s12 }
 0x448   : > { %v2716_v9 = vsel %vm849_vm3, %v2711_v52, %v2714_v34 }
 0x449   : > { %v2720_v61 = vadd.f32 %v2716_v9, %v2648_v53  ;;  %v2607_v53 = vsel %vm690_vm1, %v5658_v11, %v2605_v4 }
 0x44a   : > { %v5695_v43 = vpop.permute.xlu1 %2766  ;;  %v2611_v12 = vadd.f32 %v2607_v53, %v5644_v60  ;;  %v2645_v60 = vsel %vm776_vm2, %v5654_v2, %v2643_v17 }
 0x44b   : > { %v2794_v47 = vadd.f32 %v2790_v8, %v2720_v61  ;;  %v2702_v61 = vadd.f32 %v2698_v62, %v2628_v26 }
 0x44c   : > { %v2839_v38 = vpop.permute.xlu2 %2838  ;;  %v2685_v10 = vadd.f32 %v2681_v46, %v2611_v12 }
 0x44d   : > { %v2731_v0 = vpop.permute.xlu0 %2730  ;;  %v2852_v54 = vadd.f32 %v2851_v24, %v2794_v47  ;;  %v2842_v41 = vrot.slane %v2839_v38, 1  ;;  %v2575_v47 = vadd.f32 %v2571_v50, %v5640_v3 }
 0x44e   : > { %v2733_v23 = vrot.slane %v2731_v0, 1 }
 0x44f   : > { %2858 = vst.msk [vmem:[%s5709_s9] ss:$4 sm:$0x3] %vm5697_vm5, %v2852_v54  ;;  %v2844_v7 = vsel %vm935_vm4, %v2839_v38, %v2842_v41  ;;  %v2649_v30 = vadd.f32 %v2645_v60, %v2575_v47  ;;  %v2752_v38 = vsel %vm849_vm3, %v5684_v57, %v2750_v48 }
 0x450   : > { %v2735_v42 = vsel %vm849_vm3, %v2731_v0, %v2733_v23  ;;  %v2878_v0 = vstv %s5723_s27  ;;  %v2753_v23 = vsel %vm849_vm3, %v5672_v32, %v2751_v19  ;;  %v2678_v32 = vrot.slane %v5656_v55, 1 }
 0x451   : > { %v2739_v39 = vadd.f32 %v2735_v42, %v2667_v45  ;;  %v2757_v2 = vadd.f32 %v2753_v23, %v2685_v10  ;;  %v2721_v42 = vadd.f32 %v2717_v15, %v2649_v30 }
 0x452   : > { %v2803_v34 = vpop.permute.xlu1 %2802  ;;  %v2680_v18 = vsel %vm776_vm2, %v5656_v55, %v2678_v32  ;;  %v2697_v55 = vrot.slane %v5662_v20, 1 }
 0x453   : > { %v2813_v52 = vadd.f32 %v2809_v40, %v2739_v39  ;;  %v2806_v25 = vrot.slane %v2803_v34, 1  ;;  %v2623_v40 = vrot.slane %v5668_v37, 1 }
 0x455   : > { %v2765_v49 = vpop.permute.xlu0 %2764  ;;  %v2864_v9 = vadd.f32 %v2862_v13, %v2813_v52  ;;  %v2808_v11 = vsel %vm935_vm4, %v2803_v34, %v2806_v25  ;;  %v2684_v52 = vadd.f32 %v2680_v18, %v2610_v14  ;;  %v2625_v26 = vsel %vm690_vm1, %v5668_v37, %v2623_v40 }
 0x456   : > { %v2768_v28 = vrot.slane %v2765_v49, 1  ;;  %v2812_v51 = vadd.f32 %v2808_v11, %v2738_v27  ;;  %v2769_v34 = vrot.slane %v5695_v43, 1  ;;  %v2629_v53 = vadd.f32 %v2625_v26, %v5652_v16 }
 0x457   : > { %3171 = vst.msk [vmem:[%s5709_s9 + $0x9] ss:$4 sm:$0x3] %vm5697_vm5, %v2864_v9  ;;  %v2699_v9 = vsel %vm776_vm2, %v5662_v20, %v2697_v55 }
 0x458   : > { %v2770_v8 = vsel %vm849_vm3, %v2765_v49, %v2768_v28  ;;  %v2863_v22 = vadd.f32 %v2862_v13, %v2812_v51  ;;  %v2771_v37 = vsel %vm849_vm3, %v5695_v43, %v2769_v34  ;;  %v2703_v25 = vadd.f32 %v2699_v9, %v2629_v53 }
 0x459   : > { %v2774_v56 = vadd.f32 %v2770_v8, %v2702_v61 }
 0x45a   : > { %3170 = vst.msk [vmem:[%s5709_s9 + $0x1] ss:$4 sm:$0x3] %vm5697_vm5, %v2863_v22  ;;  %v2823_v3 = vpop.permute.xlu1 %2822  ;;  %v2775_v41 = vadd.f32 %v2771_v37, %v2703_v25 }
 0x45b   : > { %v2848_v54 = vadd.f32 %v2844_v7, %v2774_v56  ;;  %v2825_v36 = vrot.slane %v2823_v3, 1 }
 0x45d   : > { %v2787_v45 = vpop.permute.xlu0 %2786  ;;  %v2879_v29 = vadd.f32 %v2878_v0, %v2848_v54  ;;  %v2827_v4 = vsel %vm935_vm4, %v2823_v3, %v2825_v36 }
 0x45e   : > { %v2789_v31 = vrot.slane %v2787_v45, 1  ;;  %v2831_v21 = vadd.f32 %v2827_v4, %v2757_v2 }
 0x45f   : > { %3176 = vst.msk [vmem:[%s5709_s9 + $0x3] ss:$4 sm:$0x3] %vm5697_vm5, %v2879_v29 }
 0x460   : > { %v2791_v39 = vsel %vm935_vm4, %v2787_v45, %v2789_v31  ;;  %v2872_v13 = vadd.f32 %v2870_v58, %v2831_v21 }
 0x461   : > { %v2795_v63 = vadd.f32 %v2791_v39, %v2721_v42 }
 0x462   : > { %3174 = vst.msk [vmem:[%s5709_s9 + $0xa] ss:$4 sm:$0x3] %vm5697_vm5, %v2872_v13 }
 0x463   : > { %v2853_v6 = vadd.f32 %v2851_v24, %v2795_v63  ;;  %v2756_v24 = vadd.f32 %v2752_v38, %v2684_v52 }
 0x465   : > { %3168 = vst.msk [vmem:[%s5709_s9 + $0x8] ss:$4 sm:$0x3] %vm5697_vm5, %v2853_v6  ;;  %v2821_v35 = vpop.permute.xlu0 %2820 }
 0x466   : > { %v2824_v62 = vrot.slane %v2821_v35, 1 }
 0x468   : > { %v2826_v57 = vsel %vm935_vm4, %v2821_v35, %v2824_v62 }
 0x469   : > { %v2830_v1 = vadd.f32 %v2826_v57, %v2756_v24 }
 0x46b   : > { %v2871_v49 = vadd.f32 %v2870_v58, %v2830_v1 }
 0x46d   : > { %3173 = vst.msk [vmem:[%s5709_s9 + $0x2] ss:$4 sm:$0x3] %vm5697_vm5, %v2871_v49  ;;  %v2841_v16 = vpop.permute.xlu0 %2840 }
 0x46e   : > { %v2843_v50 = vrot.slane %v2841_v16, 1 }
 0x470   : > { %v2845_v20 = vsel %vm935_vm4, %v2841_v16, %v2843_v50 }
 0x471   : > { %v2849_v28 = vadd.f32 %v2845_v20, %v2775_v41 }
 0x473   : > { %v2880_v43 = vadd.f32 %v2878_v0, %v2849_v28 }
 0x475   : > { %3177 = vst.msk [vmem:[%s5709_s9 + $0xb] ss:$4 sm:$0x3] %vm5697_vm5, %v2880_v43 }
 0x476   : > { %3405 = shalt.err (!%p3402_p10)
}
 0x477   : > { %s3480_s5 = smov 128   ;;  %s3481_s26 = smov 8  }
 0x478   : > { %3202 = dma.vmem_to_hbm [thread:$0]  (%p3580_p7), %s2900_s19, 256, %s2902_s30, %s2886_s11, %s3480_s5, %s3480_s5, %s3481_s26  }
 0x479 PF: > { %s2916_s9 = sand.u32 1, %s3444_s15   ;;  %p6187_p12 = scmp.ge.s32.totalorder %s3456_s18, 2 }
 0x47a   : > { %s2917_s27 = scalar_lea.sflag [#allocation5], %s2916_s9 }
 0x47b   : > { %p3219_p13 = pnand %p6187_p12, %p3542_p6 }
 0x47d   : > { %p3220_p0 = pneg %p3219_p13 }
 0x47f   : > { %3439 = dma.done.wait (%p3220_p0), %s2917_s27, 256  }
 0x480   : > { %3441 = vsyncadd (%p3220_p0), %s2917_s27, 4294967040  ;;  %p20_p3 = scmp.ge.s32.totalorder %s3566_s13, 4   ;;  %s6188_s15 = smov %s3448_s16 }
 0x481   : > { %s6189_s16 = smov %s3452_s17  ;;  %s6190_s17 = smov %s3576_s23 }
 0x482   : > { %s6191_s18 = smov %s3566_s13  ;;  %22 = sbr.rel (!%p20_p3) target bundleno = 10 (0xa), region = 110 }
 0x487   :  { %2923 = vsyncpa [#allocation4], 1 }
 0x488   :  { %2925 = vsyncpa [#allocation4 + $0x1], 1 }
 0x489   :  { %2926 = vsyncpa [#allocation9], 1 }
 0x48a   :  { %2927 = vsyncpa [#allocation5], 1 }
 0x48b   :  { %2929 = vsyncpa [#allocation5 + $0x1], 1 }
 0x48c   :  { %2930 = vsyncpa [#allocation6], 1 }
 0x48d   :  { %2932 = vsyncpa [#allocation6 + $0x1], 1 }
 0x48e   :  { %2933 = vsyncpa [#allocation7], 1 }
 0x48f   :  { %2935 = vsyncpa [#allocation7 + $0x1], 1 }

</bundles_post_ra>
